<compile_context>
chip_gen: v6e
topology: v6e:2x2x1
jax: 0.10.0
libtpu: 0.0.40
codegen_flags: <defaults>
</compile_context>

<pallas_src>
import jax
import jax.numpy as jnp
from jax import lax
from jax.experimental import pallas as pl
from jax.experimental.pallas import tpu as pltpu


# ----------------------------------------------------------------------------
# Fused kernel: conv2/3 (+ReLU+pool) -> flatten -> FC head
# ----------------------------------------------------------------------------
def _fused_forward_kernel(a1_ref, num_ref,
                          w2_ref, b2_ref, w3_ref, b3_ref,
                          f1i_ref, f1n_ref, fb1_ref,
                          f2_ref, fb2_ref, f3_ref, fb3_ref,
                          o_ref, feats_ref):
    BB = a1_ref.shape[0]
    QC = feats_ref.shape[1]                      # Q * 128 flattened feature length

    def mm(a, b):
        # MXU matmul: operands in the weight dtype (bf16 or f32), f32 accumulate.
        return jnp.dot(a.astype(b.dtype), b, preferred_element_type=jnp.float32)

    def conv3x3_relu_pool(xi, w_slabs, b):
        # xi: (Hc, Wc, Cin) f32; w_slabs: (3, 3*Cin, Cout); b: (1, Cout) f32.
        Hc, Wc, Cin = xi.shape
        Cout = w_slabs.shape[2]
        # In-kernel zero padding (rows then cols) -- stays in VMEM.
        zr = jnp.zeros((1, Wc, Cin), jnp.float32)
        xp = jnp.concatenate([zr, xi, zr], axis=0)              # (Hc+2, Wc, Cin)
        zc = jnp.zeros((Hc + 2, 1, Cin), jnp.float32)
        xp = jnp.concatenate([zc, xp, zc], axis=1)              # (Hc+2, Wc+2, Cin)
        # im2col grouped by kernel row: 3 accumulated matmuls of K = 3*Cin.
        acc = None
        for dy in range(3):
            g = jnp.concatenate(
                [xp[dy:dy + Hc, dx:dx + Wc, :] for dx in range(3)], axis=2)
            t = mm(g.reshape(Hc * Wc, 3 * Cin), w_slabs[dy])    # (Hc*Wc, Cout) f32
            acc = t if acc is None else acc + t
        acc = jnp.maximum(acc + b, 0.0)                         # bias + ReLU
        # 2x2 max pool, stride 2.
        a = acc.reshape(Hc // 2, 2, Wc, Cout)
        m = jnp.maximum(a[:, 0], a[:, 1])                       # (Hc//2, Wc, Cout)
        m = m.reshape(Hc // 2, Wc // 2, 2, Cout)
        return jnp.maximum(m[:, :, 0, :], m[:, :, 1, :])        # (Hc//2, Wc//2, Cout)

    # Grid-invariant weights: loaded once, hoisted out of the per-image loop.
    w2, b2 = w2_ref[...], b2_ref[...]
    w3, b3 = w3_ref[...], b3_ref[...]

    # Per-image conv stack; features written to VMEM scratch in HWC-flatten
    # order.  fori_loop bounds live ranges to one image's working set.
    def body(i, carry):
        y = conv3x3_relu_pool(a1_ref[i], w2, b2)                # (H/4, W/4, 64)
        y = conv3x3_relu_pool(y, w3, b3)                        # (H/8, W/8, 128)
        feats_ref[pl.ds(i, 1), :] = y.reshape(1, QC).astype(feats_ref.dtype)
        return carry

    lax.fori_loop(0, BB, body, 0)

    # fc1: one contraction over the whole flattened image feature vector,
    # plus the numerical-feature term, then ReLU.
    num = num_ref[...][:, 0, :]                                 # (BB, n_num)
    h = mm(feats_ref[...], f1i_ref[...]) + mm(num, f1n_ref[...]) + fb1_ref[...]
    h = jnp.maximum(h, 0.0)
    # nn.Dropout(0.5): identity at inference.
    # TODO(synk): training-mode dropout (random masking) is not implemented.
    h = jnp.maximum(mm(h, f2_ref[...]) + fb2_ref[...], 0.0)     # (BB, 64)
    z = mm(h, f3_ref[...]) + fb3_ref[...]                       # (BB, 1)
    # Numerically stable sigmoid.
    ez = jnp.exp(-jnp.abs(z))
    sig = jnp.where(z >= 0.0, 1.0 / (1.0 + ez), ez / (1.0 + ez))
    o_ref[...] = sig[:, :, None].astype(o_ref.dtype)            # (BB, 1, 1)


# ----------------------------------------------------------------------------
# One-time host-side weight relayout
# ----------------------------------------------------------------------------
def prepare_pallas_params(params, image_hw, compute_dtype=jnp.bfloat16):
    """Flattens conv weights into per-dy slabs, permutes fc1 rows to HWC order,
    and casts matmul operands to `compute_dtype` (biases stay f32)."""
    H, W = image_hw
    H8, W8 = H // 8, W // 8
    C3 = params["conv3_w"].shape[-1]             # 128
    Q = H8 * W8
    F = C3 * Q
    fc1_out = params["fc1_w"].shape[1]

    def conv_slabs(w):                           # (3,3,Cin,Cout) -> (3, 3*Cin, Cout)
        k0, k1, cin, cout = w.shape
        return w.reshape(k0, k1 * cin, cout).astype(compute_dtype)

    fc1_w = params["fc1_w"]                      # rows: torch CHW-flatten order, then numerical
    f1_img = (fc1_w[:F].reshape(C3, H8, W8, fc1_out)
              .transpose(1, 2, 0, 3)             # CHW row order -> HWC row order
              .reshape(Q * C3, fc1_out)).astype(compute_dtype)
    f1_num = fc1_w[F:].astype(compute_dtype)

    f32 = jnp.float32
    return {
        # conv1 stays in XLA (wrapper), in full f32.
        "conv1_w": params["conv1_w"].astype(f32),
        "conv1_b": params["conv1_b"].astype(f32),
        "w2": conv_slabs(params["conv2_w"]), "b2": params["conv2_b"].reshape(1, -1).astype(f32),
        "w3": conv_slabs(params["conv3_w"]), "b3": params["conv3_b"].reshape(1, -1).astype(f32),
        "f1_img": f1_img, "f1_num": f1_num,
        "fb1": params["fc1_b"].reshape(1, -1).astype(f32),
        "f2": params["fc2_w"].astype(compute_dtype), "fb2": params["fc2_b"].reshape(1, -1).astype(f32),
        "f3": params["fc3_w"].astype(compute_dtype), "fb3": params["fc3_b"].reshape(1, -1).astype(f32),
    }


def _weight_spec(arr):
    # Grid-invariant (replicated) weight block: single-buffered.
    nd = arr.ndim
    return pl.BlockSpec(arr.shape, lambda i: (0,) * nd,
                        pipeline_mode=pl.Buffered(1))


def _default_vmem_limit_bytes():
    mib = 1024 * 1024
    try:
        phys = int(pltpu.get_tpu_info().vmem_capacity_bytes)
        return int(min(phys - 8 * mib, 100 * mib))   # ~100 MiB v5e/v6e, ~56 MiB v7x
    except Exception:
        return 64 * mib                              # safe on every generation


# ----------------------------------------------------------------------------
# Wrapper: conv1 (+ReLU+pool) in XLA, everything else in the fused kernel
# ----------------------------------------------------------------------------
def pneumonia_cnn_forward(prep, image_nchw, numerical_features, *,
                          block_batch=None, vmem_limit_bytes=None):
    N, C, H, W = image_nchw.shape
    assert C == 1 and H % 8 == 0 and W % 8 == 0
    num = numerical_features.astype(jnp.float32)
    nnum = num.shape[1]

    # Stage 0 (XLA): conv1 (Cin=1) + ReLU + 2x2 maxpool.  <2% of FLOPs; keeping
    # it out of the kernel removes the lane-padded C=1 / K=9 im2col entirely.
    x = image_nchw.astype(jnp.float32).reshape(N, H, W, 1)   # C==1: metadata-only NHWC view
    a1 = lax.conv_general_dilated(x, prep["conv1_w"], (1, 1), "SAME",
                                  dimension_numbers=("NHWC", "HWIO", "NHWC"))
    a1 = jnp.maximum(a1 + prep["conv1_b"], 0.0)
    a1 = lax.reduce_window(a1, -jnp.inf, lax.max,
                           (1, 2, 2, 1), (1, 2, 2, 1), "VALID")   # (N, H/2, W/2, 32)
    H2, W2, C1 = H // 2, W // 2, a1.shape[-1]

    C3 = prep["w3"].shape[-1]                    # 128
    QC = (H // 8) * (W // 8) * C3

    if block_batch is None:
        cap = max(1, min(8, N // 2))             # keep grid >= 2 (v7x megacore + DMA overlap)
        block_batch = max(bb for bb in range(1, cap + 1) if N % bb == 0)
    BB = block_batch
    assert N % BB == 0

    if vmem_limit_bytes is None:
        vmem_limit_bytes = _default_vmem_limit_bytes()

    # 3-D views keep the batch-blocked dim out of the last-two (8,128)-tiled dims.
    num3 = num.reshape(N, 1, nnum)

    out = pl.pallas_call(
        _fused_forward_kernel,
        out_shape=jax.ShapeDtypeStruct((N, 1, 1), jnp.float32),
        grid=(N // BB,),
        in_specs=[
            pl.BlockSpec((BB, H2, W2, C1), lambda i: (i, 0, 0, 0)),
            pl.BlockSpec((BB, 1, nnum), lambda i: (i, 0, 0)),
            _weight_spec(prep["w2"]), _weight_spec(prep["b2"]),
            _weight_spec(prep["w3"]), _weight_spec(prep["b3"]),
            _weight_spec(prep["f1_img"]), _weight_spec(prep["f1_num"]),
            _weight_spec(prep["fb1"]),
            _weight_spec(prep["f2"]), _weight_spec(prep["fb2"]),
            _weight_spec(prep["f3"]), _weight_spec(prep["fb3"]),
        ],
        out_specs=pl.BlockSpec((BB, 1, 1), lambda i: (i, 0, 0)),
        scratch_shapes=[pltpu.VMEM((BB, QC), prep["f1_img"].dtype)],
        compiler_params=pltpu.CompilerParams(
            dimension_semantics=("parallel",),
            vmem_limit_bytes=vmem_limit_bytes,
        ),
    )(a1, num3,
      prep["w2"], prep["b2"], prep["w3"], prep["b3"],
      prep["f1_img"], prep["f1_num"], prep["fb1"],
      prep["f2"], prep["fb2"], prep["f3"], prep["fb3"])
    return out.reshape(N, 1)


# ----------------------------------------------------------------------------
# Pure-JAX reference (torch semantics: NCHW flatten order) for correctness
# ----------------------------------------------------------------------------
def reference_forward(params, image_nchw, numerical_features):
    x = jnp.transpose(image_nchw, (0, 2, 3, 1))
    for i in (1, 2, 3):
        w, b = params[f"conv{i}_w"], params[f"conv{i}_b"]
        x = lax.conv_general_dilated(
            x, w, (1, 1), "SAME",
            dimension_numbers=("NHWC", "HWIO", "NHWC")) + b
        x = jnp.maximum(x, 0.0)
        x = lax.reduce_window(x, -jnp.inf, lax.max,
                              (1, 2, 2, 1), (1, 2, 2, 1), "VALID")
    x = jnp.transpose(x, (0, 3, 1, 2)).reshape(x.shape[0], -1)   # torch view order
    c = jnp.concatenate([x, numerical_features], axis=1)
    h = jnp.maximum(c @ params["fc1_w"] + params["fc1_b"], 0.0)
    h = jnp.maximum(h @ params["fc2_w"] + params["fc2_b"], 0.0)
    z = h @ params["fc3_w"] + params["fc3_b"]
    return 1.0 / (1.0 + jnp.exp(-z))


def init_params(key, fc_in_dim):
    ks = jax.random.split(key, 12)

    def nrm(k, shape, scale):
        return (scale * jax.random.normal(k, shape)).astype(jnp.float32)

    return {
        "conv1_w": nrm(ks[0], (3, 3, 1, 32), 0.2),    "conv1_b": nrm(ks[1], (32,), 0.1),
        "conv2_w": nrm(ks[2], (3, 3, 32, 64), 0.05),  "conv2_b": nrm(ks[3], (64,), 0.1),
        "conv3_w": nrm(ks[4], (3, 3, 64, 128), 0.05), "conv3_b": nrm(ks[5], (128,), 0.1),
        "fc1_w": nrm(ks[6], (fc_in_dim, 128), 0.02),  "fc1_b": nrm(ks[7], (128,), 0.1),
        "fc2_w": nrm(ks[8], (128, 64), 0.05),         "fc2_b": nrm(ks[9], (64,), 0.1),
        "fc3_w": nrm(ks[10], (64, 1), 0.05),          "fc3_b": nrm(ks[11], (1,), 0.1),
    }


if __name__ == "__main__":
    key = jax.random.PRNGKey(0)
    B, Hin, Win = 2, 32, 32            # small spatial size (module intends 128x128)
    num_numerical_features = 4
    k_img, k_num, k_p = jax.random.split(key, 3)

    image = jax.random.normal(k_img, (B, 1, Hin, Win), dtype=jnp.float32)
    numerical = jax.random.normal(k_num, (B, num_numerical_features), dtype=jnp.float32)

    fc_in_dim = 128 * (Hin // 8) * (Win // 8) + num_numerical_features
    params = init_params(k_p, fc_in_dim)
    ref = reference_forward(params, image, numerical)

    # 1) f32 matmul operands: tight correctness check.
    prep_f32 = prepare_pallas_params(params, (Hin, Win), compute_dtype=jnp.float32)
    out_f32 = jax.block_until_ready(pneumonia_cnn_forward(prep_f32, image, numerical))
    assert out_f32.shape == (B, 1), out_f32.shape
    assert bool(jnp.all(jnp.isfinite(out_f32)))
    assert bool(jnp.allclose(out_f32, ref, atol=2e-3, rtol=2e-3)), (out_f32, ref)

    # 2) bf16 matmul operands (native MXU rate on v6e/v7x), f32 accumulation.
    prep_bf16 = prepare_pallas_params(params, (Hin, Win), compute_dtype=jnp.bfloat16)
    out_bf16 = jax.block_until_ready(pneumonia_cnn_forward(prep_bf16, image, numerical))
    assert bool(jnp.all(jnp.isfinite(out_bf16)))
    assert bool(jnp.allclose(out_bf16, ref, atol=2e-2, rtol=2e-2)), (out_bf16, ref)

    print("KERNEL_OK")
</pallas_src>

<mosaic_0001>
module attributes {stable_mosaic.version = 11 : i64} {
  func.func @_fused_forward_kernel(%arg0: i32, %arg1: memref<1x16x16x32xf32, #tpu.memory_space<vmem>>, %arg2: memref<1x1x4xf32, #tpu.memory_space<vmem>>, %arg3: memref<3x96x64xf32, #tpu.memory_space<vmem>>, %arg4: memref<1x64xf32, #tpu.memory_space<vmem>>, %arg5: memref<3x192x128xf32, #tpu.memory_space<vmem>>, %arg6: memref<1x128xf32, #tpu.memory_space<vmem>>, %arg7: memref<2048x128xf32, #tpu.memory_space<vmem>>, %arg8: memref<4x128xf32, #tpu.memory_space<vmem>>, %arg9: memref<1x128xf32, #tpu.memory_space<vmem>>, %arg10: memref<128x64xf32, #tpu.memory_space<vmem>>, %arg11: memref<1x64xf32, #tpu.memory_space<vmem>>, %arg12: memref<64x1xf32, #tpu.memory_space<vmem>>, %arg13: memref<1x1xf32, #tpu.memory_space<vmem>>, %arg14: memref<1x1x1xf32, #tpu.memory_space<vmem>>, %arg15: memref<1x2048xf32, #tpu.memory_space<vmem>>) attributes {dimension_semantics = [#tpu.dimension_semantics<parallel>], iteration_bounds = array<i64: 2>, scalar_prefetch = 0 : i64, scratch_operands = 1 : i64, tpu.core_type = #tpu.core_type<tc>, window_params = [{transform_indices = @transform_0, window_bounds = array<i64: 1, 16, 16, 32>}, {transform_indices = @transform_1, window_bounds = array<i64: 1, 1, 4>}, {pipeline_mode = #tpu.pipeline_mode<synchronous>, transform_indices = @transform_2, window_bounds = array<i64: 3, 96, 64>}, {pipeline_mode = #tpu.pipeline_mode<synchronous>, transform_indices = @transform_3, window_bounds = array<i64: 1, 64>}, {pipeline_mode = #tpu.pipeline_mode<synchronous>, transform_indices = @transform_4, window_bounds = array<i64: 3, 192, 128>}, {pipeline_mode = #tpu.pipeline_mode<synchronous>, transform_indices = @transform_5, window_bounds = array<i64: 1, 128>}, {pipeline_mode = #tpu.pipeline_mode<synchronous>, transform_indices = @transform_6, window_bounds = array<i64: 2048, 128>}, {pipeline_mode = #tpu.pipeline_mode<synchronous>, transform_indices = @transform_7, window_bounds = array<i64: 4, 128>}, {pipeline_mode = #tpu.pipeline_mode<synchronous>, transform_indices = @transform_8, window_bounds = array<i64: 1, 128>}, {pipeline_mode = #tpu.pipeline_mode<synchronous>, transform_indices = @transform_9, window_bounds = array<i64: 128, 64>}, {pipeline_mode = #tpu.pipeline_mode<synchronous>, transform_indices = @transform_10, window_bounds = array<i64: 1, 64>}, {pipeline_mode = #tpu.pipeline_mode<synchronous>, transform_indices = @transform_11, window_bounds = array<i64: 64, 1>}, {pipeline_mode = #tpu.pipeline_mode<synchronous>, transform_indices = @transform_12, window_bounds = array<i64: 1, 1>}, {transform_indices = @transform_13, window_bounds = array<i64: 1, 1, 1>}]} {
    %c0 = arith.constant 0 : index
    %c0_0 = arith.constant 0 : index
    %c0_1 = arith.constant 0 : index
    %0 = vector.load %arg3[%c0, %c0_0, %c0_1] : memref<3x96x64xf32, #tpu.memory_space<vmem>>, vector<3x96x64xf32>
    %c0_2 = arith.constant 0 : index
    %c0_3 = arith.constant 0 : index
    %1 = vector.load %arg4[%c0_2, %c0_3] : memref<1x64xf32, #tpu.memory_space<vmem>>, vector<1x64xf32>
    %c0_4 = arith.constant 0 : index
    %c0_5 = arith.constant 0 : index
    %c0_6 = arith.constant 0 : index
    %2 = vector.load %arg5[%c0_4, %c0_5, %c0_6] : memref<3x192x128xf32, #tpu.memory_space<vmem>>, vector<3x192x128xf32>
    %c0_7 = arith.constant 0 : index
    %c0_8 = arith.constant 0 : index
    %3 = vector.load %arg6[%c0_7, %c0_8] : memref<1x128xf32, #tpu.memory_space<vmem>>, vector<1x128xf32>
    %c0_i32 = arith.constant 0 : i32
    %4 = arith.index_cast %c0_i32 : i32 to index
    %c0_9 = arith.constant 0 : index
    %c0_10 = arith.constant 0 : index
    %c0_11 = arith.constant 0 : index
    %5 = vector.load %arg1[%4, %c0_9, %c0_10, %c0_11] : memref<1x16x16x32xf32, #tpu.memory_space<vmem>>, vector<1x16x16x32xf32>
    %6 = vector.shape_cast %5 : vector<1x16x16x32xf32> to vector<16x16x32xf32>
    %cst = arith.constant 0.000000e+00 : f32
    %7 = vector.broadcast %cst : f32 to vector<1x16x32xf32>
    %8 = tpu.concatenate %7, %6, %7 in 0 : vector<1x16x32xf32>, vector<16x16x32xf32>, vector<1x16x32xf32> -> vector<18x16x32xf32>
    %cst_12 = arith.constant 0.000000e+00 : f32
    %9 = vector.broadcast %cst_12 : f32 to vector<18x1x32xf32>
    %10 = tpu.concatenate %9, %8, %9 in 1 : vector<18x1x32xf32>, vector<18x16x32xf32>, vector<18x1x32xf32> -> vector<18x18x32xf32>
    %11 = vector.extract_strided_slice %10 {offsets = [0, 0, 0], sizes = [16, 16, 32], strides = [1, 1, 1]} : vector<18x18x32xf32> to vector<16x16x32xf32>
    %12 = vector.extract_strided_slice %10 {offsets = [0, 1, 0], sizes = [16, 16, 32], strides = [1, 1, 1]} : vector<18x18x32xf32> to vector<16x16x32xf32>
    %13 = vector.extract_strided_slice %10 {offsets = [0, 2, 0], sizes = [16, 16, 32], strides = [1, 1, 1]} : vector<18x18x32xf32> to vector<16x16x32xf32>
    %14 = tpu.concatenate %11, %12, %13 in 2 : vector<16x16x32xf32>, vector<16x16x32xf32>, vector<16x16x32xf32> -> vector<16x16x96xf32>
    %15 = vector.shape_cast %14 : vector<16x16x96xf32> to vector<256x96xf32>
    %16 = vector.extract_strided_slice %0 {offsets = [0, 0, 0], sizes = [1, 96, 64], strides = [1, 1, 1]} : vector<3x96x64xf32> to vector<1x96x64xf32>
    %17 = vector.shape_cast %16 : vector<1x96x64xf32> to vector<96x64xf32>
    %cst_13 = arith.constant dense<0.000000e+00> : vector<256x64xf32>
    %18 = tpu.matmul %15, %17, %cst_13 {dimension_numbers = #tpu.dot_dimension_numbers<[1], [0], [0], [1], [0, 0, 1, 1], [], []>} : vector<256x96xf32>, vector<96x64xf32>, vector<256x64xf32> -> vector<256x64xf32>
    %19 = vector.extract_strided_slice %10 {offsets = [1, 0, 0], sizes = [16, 16, 32], strides = [1, 1, 1]} : vector<18x18x32xf32> to vector<16x16x32xf32>
    %20 = vector.extract_strided_slice %10 {offsets = [1, 1, 0], sizes = [16, 16, 32], strides = [1, 1, 1]} : vector<18x18x32xf32> to vector<16x16x32xf32>
    %21 = vector.extract_strided_slice %10 {offsets = [1, 2, 0], sizes = [16, 16, 32], strides = [1, 1, 1]} : vector<18x18x32xf32> to vector<16x16x32xf32>
    %22 = tpu.concatenate %19, %20, %21 in 2 : vector<16x16x32xf32>, vector<16x16x32xf32>, vector<16x16x32xf32> -> vector<16x16x96xf32>
    %23 = vector.shape_cast %22 : vector<16x16x96xf32> to vector<256x96xf32>
    %24 = vector.extract_strided_slice %0 {offsets = [1, 0, 0], sizes = [1, 96, 64], strides = [1, 1, 1]} : vector<3x96x64xf32> to vector<1x96x64xf32>
    %25 = vector.shape_cast %24 : vector<1x96x64xf32> to vector<96x64xf32>
    %cst_14 = arith.constant dense<0.000000e+00> : vector<256x64xf32>
    %26 = tpu.matmul %23, %25, %cst_14 {dimension_numbers = #tpu.dot_dimension_numbers<[1], [0], [0], [1], [0, 0, 1, 1], [], []>} : vector<256x96xf32>, vector<96x64xf32>, vector<256x64xf32> -> vector<256x64xf32>
    %27 = arith.addf %18, %26 : vector<256x64xf32>
    %28 = vector.extract_strided_slice %10 {offsets = [2, 0, 0], sizes = [16, 16, 32], strides = [1, 1, 1]} : vector<18x18x32xf32> to vector<16x16x32xf32>
    %29 = vector.extract_strided_slice %10 {offsets = [2, 1, 0], sizes = [16, 16, 32], strides = [1, 1, 1]} : vector<18x18x32xf32> to vector<16x16x32xf32>
    %30 = vector.extract_strided_slice %10 {offsets = [2, 2, 0], sizes = [16, 16, 32], strides = [1, 1, 1]} : vector<18x18x32xf32> to vector<16x16x32xf32>
    %31 = tpu.concatenate %28, %29, %30 in 2 : vector<16x16x32xf32>, vector<16x16x32xf32>, vector<16x16x32xf32> -> vector<16x16x96xf32>
    %32 = vector.shape_cast %31 : vector<16x16x96xf32> to vector<256x96xf32>
    %33 = vector.extract_strided_slice %0 {offsets = [2, 0, 0], sizes = [1, 96, 64], strides = [1, 1, 1]} : vector<3x96x64xf32> to vector<1x96x64xf32>
    %34 = vector.shape_cast %33 : vector<1x96x64xf32> to vector<96x64xf32>
    %cst_15 = arith.constant dense<0.000000e+00> : vector<256x64xf32>
    %35 = tpu.matmul %32, %34, %cst_15 {dimension_numbers = #tpu.dot_dimension_numbers<[1], [0], [0], [1], [0, 0, 1, 1], [], []>} : vector<256x96xf32>, vector<96x64xf32>, vector<256x64xf32> -> vector<256x64xf32>
    %36 = arith.addf %27, %35 : vector<256x64xf32>
    %37 = vector.broadcast %1 : vector<1x64xf32> to vector<256x64xf32>
    %38 = arith.addf %36, %37 : vector<256x64xf32>
    %cst_16 = arith.constant 0.000000e+00 : f32
    %39 = vector.broadcast %cst_16 : f32 to vector<256x64xf32>
    %40 = arith.maximumf %38, %39 : vector<256x64xf32>
    %41 = vector.shape_cast %40 : vector<256x64xf32> to vector<8x2x16x64xf32>
    %42 = vector.extract_strided_slice %41 {offsets = [0, 0, 0, 0], sizes = [8, 1, 16, 64], strides = [1, 1, 1, 1]} : vector<8x2x16x64xf32> to vector<8x1x16x64xf32>
    %43 = vector.shape_cast %42 : vector<8x1x16x64xf32> to vector<8x16x64xf32>
    %44 = vector.extract_strided_slice %41 {offsets = [0, 1, 0, 0], sizes = [8, 1, 16, 64], strides = [1, 1, 1, 1]} : vector<8x2x16x64xf32> to vector<8x1x16x64xf32>
    %45 = vector.shape_cast %44 : vector<8x1x16x64xf32> to vector<8x16x64xf32>
    %46 = arith.maximumf %43, %45 : vector<8x16x64xf32>
    %47 = vector.shape_cast %46 : vector<8x16x64xf32> to vector<8x8x2x64xf32>
    %48 = vector.extract_strided_slice %47 {offsets = [0, 0, 0, 0], sizes = [8, 8, 1, 64], strides = [1, 1, 1, 1]} : vector<8x8x2x64xf32> to vector<8x8x1x64xf32>
    %49 = vector.shape_cast %48 : vector<8x8x1x64xf32> to vector<8x8x64xf32>
    %50 = vector.extract_strided_slice %47 {offsets = [0, 0, 1, 0], sizes = [8, 8, 1, 64], strides = [1, 1, 1, 1]} : vector<8x8x2x64xf32> to vector<8x8x1x64xf32>
    %51 = vector.shape_cast %50 : vector<8x8x1x64xf32> to vector<8x8x64xf32>
    %52 = arith.maximumf %49, %51 : vector<8x8x64xf32>
    %cst_17 = arith.constant 0.000000e+00 : f32
    %53 = vector.broadcast %cst_17 : f32 to vector<1x8x64xf32>
    %54 = tpu.concatenate %53, %52, %53 in 0 : vector<1x8x64xf32>, vector<8x8x64xf32>, vector<1x8x64xf32> -> vector<10x8x64xf32>
    %cst_18 = arith.constant 0.000000e+00 : f32
    %55 = vector.broadcast %cst_18 : f32 to vector<10x1x64xf32>
    %56 = tpu.concatenate %55, %54, %55 in 1 : vector<10x1x64xf32>, vector<10x8x64xf32>, vector<10x1x64xf32> -> vector<10x10x64xf32>
    %57 = vector.extract_strided_slice %56 {offsets = [0, 0, 0], sizes = [8, 8, 64], strides = [1, 1, 1]} : vector<10x10x64xf32> to vector<8x8x64xf32>
    %58 = vector.extract_strided_slice %56 {offsets = [0, 1, 0], sizes = [8, 8, 64], strides = [1, 1, 1]} : vector<10x10x64xf32> to vector<8x8x64xf32>
    %59 = vector.extract_strided_slice %56 {offsets = [0, 2, 0], sizes = [8, 8, 64], strides = [1, 1, 1]} : vector<10x10x64xf32> to vector<8x8x64xf32>
    %60 = tpu.concatenate %57, %58, %59 in 2 : vector<8x8x64xf32>, vector<8x8x64xf32>, vector<8x8x64xf32> -> vector<8x8x192xf32>
    %61 = vector.shape_cast %60 : vector<8x8x192xf32> to vector<64x192xf32>
    %62 = vector.extract_strided_slice %2 {offsets = [0, 0, 0], sizes = [1, 192, 128], strides = [1, 1, 1]} : vector<3x192x128xf32> to vector<1x192x128xf32>
    %63 = vector.shape_cast %62 : vector<1x192x128xf32> to vector<192x128xf32>
    %cst_19 = arith.constant dense<0.000000e+00> : vector<64x128xf32>
    %64 = tpu.matmul %61, %63, %cst_19 {dimension_numbers = #tpu.dot_dimension_numbers<[1], [0], [0], [1], [0, 0, 1, 1], [], []>} : vector<64x192xf32>, vector<192x128xf32>, vector<64x128xf32> -> vector<64x128xf32>
    %65 = vector.extract_strided_slice %56 {offsets = [1, 0, 0], sizes = [8, 8, 64], strides = [1, 1, 1]} : vector<10x10x64xf32> to vector<8x8x64xf32>
    %66 = vector.extract_strided_slice %56 {offsets = [1, 1, 0], sizes = [8, 8, 64], strides = [1, 1, 1]} : vector<10x10x64xf32> to vector<8x8x64xf32>
    %67 = vector.extract_strided_slice %56 {offsets = [1, 2, 0], sizes = [8, 8, 64], strides = [1, 1, 1]} : vector<10x10x64xf32> to vector<8x8x64xf32>
    %68 = tpu.concatenate %65, %66, %67 in 2 : vector<8x8x64xf32>, vector<8x8x64xf32>, vector<8x8x64xf32> -> vector<8x8x192xf32>
    %69 = vector.shape_cast %68 : vector<8x8x192xf32> to vector<64x192xf32>
    %70 = vector.extract_strided_slice %2 {offsets = [1, 0, 0], sizes = [1, 192, 128], strides = [1, 1, 1]} : vector<3x192x128xf32> to vector<1x192x128xf32>
    %71 = vector.shape_cast %70 : vector<1x192x128xf32> to vector<192x128xf32>
    %cst_20 = arith.constant dense<0.000000e+00> : vector<64x128xf32>
    %72 = tpu.matmul %69, %71, %cst_20 {dimension_numbers = #tpu.dot_dimension_numbers<[1], [0], [0], [1], [0, 0, 1, 1], [], []>} : vector<64x192xf32>, vector<192x128xf32>, vector<64x128xf32> -> vector<64x128xf32>
    %73 = arith.addf %64, %72 : vector<64x128xf32>
    %74 = vector.extract_strided_slice %56 {offsets = [2, 0, 0], sizes = [8, 8, 64], strides = [1, 1, 1]} : vector<10x10x64xf32> to vector<8x8x64xf32>
    %75 = vector.extract_strided_slice %56 {offsets = [2, 1, 0], sizes = [8, 8, 64], strides = [1, 1, 1]} : vector<10x10x64xf32> to vector<8x8x64xf32>
    %76 = vector.extract_strided_slice %56 {offsets = [2, 2, 0], sizes = [8, 8, 64], strides = [1, 1, 1]} : vector<10x10x64xf32> to vector<8x8x64xf32>
    %77 = tpu.concatenate %74, %75, %76 in 2 : vector<8x8x64xf32>, vector<8x8x64xf32>, vector<8x8x64xf32> -> vector<8x8x192xf32>
    %78 = vector.shape_cast %77 : vector<8x8x192xf32> to vector<64x192xf32>
    %79 = vector.extract_strided_slice %2 {offsets = [2, 0, 0], sizes = [1, 192, 128], strides = [1, 1, 1]} : vector<3x192x128xf32> to vector<1x192x128xf32>
    %80 = vector.shape_cast %79 : vector<1x192x128xf32> to vector<192x128xf32>
    %cst_21 = arith.constant dense<0.000000e+00> : vector<64x128xf32>
    %81 = tpu.matmul %78, %80, %cst_21 {dimension_numbers = #tpu.dot_dimension_numbers<[1], [0], [0], [1], [0, 0, 1, 1], [], []>} : vector<64x192xf32>, vector<192x128xf32>, vector<64x128xf32> -> vector<64x128xf32>
    %82 = arith.addf %73, %81 : vector<64x128xf32>
    %83 = vector.broadcast %3 : vector<1x128xf32> to vector<64x128xf32>
    %84 = arith.addf %82, %83 : vector<64x128xf32>
    %cst_22 = arith.constant 0.000000e+00 : f32
    %85 = vector.broadcast %cst_22 : f32 to vector<64x128xf32>
    %86 = arith.maximumf %84, %85 : vector<64x128xf32>
    %87 = vector.shape_cast %86 : vector<64x128xf32> to vector<4x2x8x128xf32>
    %88 = vector.extract_strided_slice %87 {offsets = [0, 0, 0, 0], sizes = [4, 1, 8, 128], strides = [1, 1, 1, 1]} : vector<4x2x8x128xf32> to vector<4x1x8x128xf32>
    %89 = vector.shape_cast %88 : vector<4x1x8x128xf32> to vector<4x8x128xf32>
    %90 = vector.extract_strided_slice %87 {offsets = [0, 1, 0, 0], sizes = [4, 1, 8, 128], strides = [1, 1, 1, 1]} : vector<4x2x8x128xf32> to vector<4x1x8x128xf32>
    %91 = vector.shape_cast %90 : vector<4x1x8x128xf32> to vector<4x8x128xf32>
    %92 = arith.maximumf %89, %91 : vector<4x8x128xf32>
    %93 = vector.shape_cast %92 : vector<4x8x128xf32> to vector<4x4x2x128xf32>
    %94 = vector.extract_strided_slice %93 {offsets = [0, 0, 0, 0], sizes = [4, 4, 1, 128], strides = [1, 1, 1, 1]} : vector<4x4x2x128xf32> to vector<4x4x1x128xf32>
    %95 = vector.shape_cast %94 : vector<4x4x1x128xf32> to vector<4x4x128xf32>
    %96 = vector.extract_strided_slice %93 {offsets = [0, 0, 1, 0], sizes = [4, 4, 1, 128], strides = [1, 1, 1, 1]} : vector<4x4x2x128xf32> to vector<4x4x1x128xf32>
    %97 = vector.shape_cast %96 : vector<4x4x1x128xf32> to vector<4x4x128xf32>
    %98 = arith.maximumf %95, %97 : vector<4x4x128xf32>
    %99 = vector.shape_cast %98 : vector<4x4x128xf32> to vector<1x2048xf32>
    %100 = arith.index_cast %c0_i32 : i32 to index
    %c0_23 = arith.constant 0 : index
    %101 = vector.load %arg15[%100, %c0_23] : memref<1x2048xf32, #tpu.memory_space<vmem>>, vector<1x2048xf32>
    tpu.vector_store %arg15[%100, %c0_23], %99 {strides = array<i32>} : memref<1x2048xf32, #tpu.memory_space<vmem>>, vector<1x2048xf32>,
    %c1_i32 = arith.constant 1 : i32
    %c0_24 = arith.constant 0 : index
    %c0_25 = arith.constant 0 : index
    %c0_26 = arith.constant 0 : index
    %102 = vector.load %arg2[%c0_24, %c0_25, %c0_26] : memref<1x1x4xf32, #tpu.memory_space<vmem>>, vector<1x1x4xf32>
    %103 = vector.shape_cast %102 : vector<1x1x4xf32> to vector<1x4xf32>
    %c0_27 = arith.constant 0 : index
    %c0_28 = arith.constant 0 : index
    %104 = vector.load %arg15[%c0_27, %c0_28] : memref<1x2048xf32, #tpu.memory_space<vmem>>, vector<1x2048xf32>
    %c0_29 = arith.constant 0 : index
    %c0_30 = arith.constant 0 : index
    %105 = vector.load %arg7[%c0_29, %c0_30] : memref<2048x128xf32, #tpu.memory_space<vmem>>, vector<2048x128xf32>
    %cst_31 = arith.constant dense<0.000000e+00> : vector<1x128xf32>
    %106 = tpu.matmul %104, %105, %cst_31 {dimension_numbers = #tpu.dot_dimension_numbers<[1], [0], [0], [1], [0, 0, 1, 1], [], []>} : vector<1x2048xf32>, vector<2048x128xf32>, vector<1x128xf32> -> vector<1x128xf32>
    %c0_32 = arith.constant 0 : index
    %c0_33 = arith.constant 0 : index
    %107 = vector.load %arg8[%c0_32, %c0_33] : memref<4x128xf32, #tpu.memory_space<vmem>>, vector<4x128xf32>
    %cst_34 = arith.constant dense<0.000000e+00> : vector<1x128xf32>
    %108 = tpu.matmul %103, %107, %cst_34 {dimension_numbers = #tpu.dot_dimension_numbers<[1], [0], [0], [1], [0, 0, 1, 1], [], []>} : vector<1x4xf32>, vector<4x128xf32>, vector<1x128xf32> -> vector<1x128xf32>
    %109 = arith.addf %106, %108 : vector<1x128xf32>
    %c0_35 = arith.constant 0 : index
    %c0_36 = arith.constant 0 : index
    %110 = vector.load %arg9[%c0_35, %c0_36] : memref<1x128xf32, #tpu.memory_space<vmem>>, vector<1x128xf32>
    %111 = arith.addf %109, %110 : vector<1x128xf32>
    %cst_37 = arith.constant 0.000000e+00 : f32
    %112 = vector.broadcast %cst_37 : f32 to vector<1x128xf32>
    %113 = arith.maximumf %111, %112 : vector<1x128xf32>
    %c0_38 = arith.constant 0 : index
    %c0_39 = arith.constant 0 : index
    %114 = vector.load %arg10[%c0_38, %c0_39] : memref<128x64xf32, #tpu.memory_space<vmem>>, vector<128x64xf32>
    %cst_40 = arith.constant dense<0.000000e+00> : vector<1x64xf32>
    %115 = tpu.matmul %113, %114, %cst_40 {dimension_numbers = #tpu.dot_dimension_numbers<[1], [0], [0], [1], [0, 0, 1, 1], [], []>} : vector<1x128xf32>, vector<128x64xf32>, vector<1x64xf32> -> vector<1x64xf32>
    %c0_41 = arith.constant 0 : index
    %c0_42 = arith.constant 0 : index
    %116 = vector.load %arg11[%c0_41, %c0_42] : memref<1x64xf32, #tpu.memory_space<vmem>>, vector<1x64xf32>
    %117 = arith.addf %115, %116 : vector<1x64xf32>
    %cst_43 = arith.constant 0.000000e+00 : f32
    %118 = vector.broadcast %cst_43 : f32 to vector<1x64xf32>
    %119 = arith.maximumf %117, %118 : vector<1x64xf32>
    %c0_44 = arith.constant 0 : index
    %c0_45 = arith.constant 0 : index
    %120 = vector.load %arg12[%c0_44, %c0_45] : memref<64x1xf32, #tpu.memory_space<vmem>>, vector<64x1xf32>
    %cst_46 = arith.constant dense<0.000000e+00> : vector<1x1xf32>
    %121 = tpu.matmul %119, %120, %cst_46 {dimension_numbers = #tpu.dot_dimension_numbers<[1], [0], [0], [1], [0, 0, 1, 1], [], []>} : vector<1x64xf32>, vector<64x1xf32>, vector<1x1xf32> -> vector<1x1xf32>
    %c0_47 = arith.constant 0 : index
    %c0_48 = arith.constant 0 : index
    %122 = vector.load %arg13[%c0_47, %c0_48] : memref<1x1xf32, #tpu.memory_space<vmem>>, vector<1x1xf32>
    %123 = arith.addf %121, %122 : vector<1x1xf32>
    %124 = math.absf %123 : vector<1x1xf32>
    %cst_49 = arith.constant 0.000000e+00 : f32
    %125 = vector.broadcast %cst_49 : f32 to vector<1x1xf32>
    %126 = arith.subf %125, %124 : vector<1x1xf32>
    %127 = math.exp %126 : vector<1x1xf32>
    %cst_50 = arith.constant 0.000000e+00 : f32
    %128 = vector.broadcast %cst_50 : f32 to vector<1x1xf32>
    %129 = arith.cmpf oge, %123, %128 : vector<1x1xf32>
    %cst_51 = arith.constant 1.000000e+00 : f32
    %130 = vector.broadcast %cst_51 : f32 to vector<1x1xf32>
    %131 = arith.addf %130, %127 : vector<1x1xf32>
    %cst_52 = arith.constant 1.000000e+00 : f32
    %132 = vector.broadcast %cst_52 : f32 to vector<1x1xf32>
    %133 = arith.divf %132, %131 : vector<1x1xf32>
    %cst_53 = arith.constant 1.000000e+00 : f32
    %134 = vector.broadcast %cst_53 : f32 to vector<1x1xf32>
    %135 = arith.addf %134, %127 : vector<1x1xf32>
    %136 = arith.divf %127, %135 : vector<1x1xf32>
    %137 = arith.select %129, %133, %136 : vector<1x1xi1>, vector<1x1xf32>
    %138 = vector.shape_cast %137 : vector<1x1xf32> to vector<1x1x1xf32>
    %c0_54 = arith.constant 0 : index
    %c0_55 = arith.constant 0 : index
    %c0_56 = arith.constant 0 : index
    %139 = vector.load %arg14[%c0_54, %c0_55, %c0_56] : memref<1x1x1xf32, #tpu.memory_space<vmem>>, vector<1x1x1xf32>
    tpu.vector_store %arg14[%c0_54, %c0_55, %c0_56], %138 {strides = array<i32>} : memref<1x1x1xf32, #tpu.memory_space<vmem>>, vector<1x1x1xf32>,
    return
  }
  func.func @transform_0(%arg0: i32) -> (i32, i32, i32, i32) {
    %c0_i32 = arith.constant 0 : i32
    %c0_i32_0 = arith.constant 0 : i32
    %c0_i32_1 = arith.constant 0 : i32
    %c0_i32_2 = arith.constant 0 : i32
    return %arg0, %c0_i32, %c0_i32_0, %c0_i32_1 : i32, i32, i32, i32
  }
  func.func @transform_1(%arg0: i32) -> (i32, i32, i32) {
    %c0_i32 = arith.constant 0 : i32
    %c0_i32_0 = arith.constant 0 : i32
    %c0_i32_1 = arith.constant 0 : i32
    return %arg0, %c0_i32, %c0_i32_0 : i32, i32, i32
  }
  func.func @transform_2(%arg0: i32) -> (i32, i32, i32) {
    %c0_i32 = arith.constant 0 : i32
    %c0_i32_0 = arith.constant 0 : i32
    %c0_i32_1 = arith.constant 0 : i32
    %c0_i32_2 = arith.constant 0 : i32
    return %c0_i32, %c0_i32_0, %c0_i32_1 : i32, i32, i32
  }
  func.func @transform_3(%arg0: i32) -> (i32, i32) {
    %c0_i32 = arith.constant 0 : i32
    %c0_i32_0 = arith.constant 0 : i32
    %c0_i32_1 = arith.constant 0 : i32
    return %c0_i32, %c0_i32_0 : i32, i32
  }
  func.func @transform_4(%arg0: i32) -> (i32, i32, i32) {
    %c0_i32 = arith.constant 0 : i32
    %c0_i32_0 = arith.constant 0 : i32
    %c0_i32_1 = arith.constant 0 : i32
    %c0_i32_2 = arith.constant 0 : i32
    return %c0_i32, %c0_i32_0, %c0_i32_1 : i32, i32, i32
  }
  func.func @transform_5(%arg0: i32) -> (i32, i32) {
    %c0_i32 = arith.constant 0 : i32
    %c0_i32_0 = arith.constant 0 : i32
    %c0_i32_1 = arith.constant 0 : i32
    return %c0_i32, %c0_i32_0 : i32, i32
  }
  func.func @transform_6(%arg0: i32) -> (i32, i32) {
    %c0_i32 = arith.constant 0 : i32
    %c0_i32_0 = arith.constant 0 : i32
    %c0_i32_1 = arith.constant 0 : i32
    return %c0_i32, %c0_i32_0 : i32, i32
  }
  func.func @transform_7(%arg0: i32) -> (i32, i32) {
    %c0_i32 = arith.constant 0 : i32
    %c0_i32_0 = arith.constant 0 : i32
    %c0_i32_1 = arith.constant 0 : i32
    return %c0_i32, %c0_i32_0 : i32, i32
  }
  func.func @transform_8(%arg0: i32) -> (i32, i32) {
    %c0_i32 = arith.constant 0 : i32
    %c0_i32_0 = arith.constant 0 : i32
    %c0_i32_1 = arith.constant 0 : i32
    return %c0_i32, %c0_i32_0 : i32, i32
  }
  func.func @transform_9(%arg0: i32) -> (i32, i32) {
    %c0_i32 = arith.constant 0 : i32
    %c0_i32_0 = arith.constant 0 : i32
    %c0_i32_1 = arith.constant 0 : i32
    return %c0_i32, %c0_i32_0 : i32, i32
  }
  func.func @transform_10(%arg0: i32) -> (i32, i32) {
    %c0_i32 = arith.constant 0 : i32
    %c0_i32_0 = arith.constant 0 : i32
    %c0_i32_1 = arith.constant 0 : i32
    return %c0_i32, %c0_i32_0 : i32, i32
  }
  func.func @transform_11(%arg0: i32) -> (i32, i32) {
    %c0_i32 = arith.constant 0 : i32
    %c0_i32_0 = arith.constant 0 : i32
    %c0_i32_1 = arith.constant 0 : i32
    return %c0_i32, %c0_i32_0 : i32, i32
  }
  func.func @transform_12(%arg0: i32) -> (i32, i32) {
    %c0_i32 = arith.constant 0 : i32
    %c0_i32_0 = arith.constant 0 : i32
    %c0_i32_1 = arith.constant 0 : i32
    return %c0_i32, %c0_i32_0 : i32, i32
  }
  func.func @transform_13(%arg0: i32) -> (i32, i32, i32) {
    %c0_i32 = arith.constant 0 : i32
    %c0_i32_0 = arith.constant 0 : i32
    %c0_i32_1 = arith.constant 0 : i32
    return %arg0, %c0_i32, %c0_i32_0 : i32, i32, i32
  }
}

</mosaic_0001>

<bundles_post_ra>
// kernel: tpu_custom_call.1
= control target key start
LH: loop header
LB: loop body
LE: loop exit
PB: predicated region body
PF: predicated region fallthrough
CT: control target
= control target key end

     0   :  { %s8806_s0 = inlined_call_operand.hbm [shape: f32[2,16,16,32], index: 0, kind: input, shape index: {}]   ;;  %s8807_s1 = inlined_call_operand.vmem [shape: f32[2,1,4], index: 1, kind: input, shape index: {}]   ;;  %s8808_s2 = inlined_call_operand.vmem [shape: f32[3,96,64], index: 2, kind: input, shape index: {}]   ;;  %s8809_s3 = inlined_call_operand.vmem [shape: f32[1,64], index: 3, kind: input, shape index: {}]   ;;  %s8810_s4 = inlined_call_operand.vmem [shape: f32[3,192,128], index: 4, kind: input, shape index: {}]   ;;  %s8811_s5 = inlined_call_operand.vmem [shape: f32[1,128], index: 5, kind: input, shape index: {}]   ;;  %s8812_s6 = inlined_call_operand.hbm [shape: f32[2048,128], index: 6, kind: input, shape index: {}]   ;;  %s8813_s7 = inlined_call_operand.vmem [shape: f32[4,128], index: 7, kind: input, shape index: {}]   ;;  %s8814_s8 = inlined_call_operand.vmem [shape: f32[1,128], index: 8, kind: input, shape index: {}]   ;;  %s8815_s9 = inlined_call_operand.vmem [shape: f32[128,64], index: 9, kind: input, shape index: {}]   ;;  %s8816_s10 = inlined_call_operand.vmem [shape: f32[1,64], index: 10, kind: input, shape index: {}]   ;;  %s8817_s11 = inlined_call_operand.vmem [shape: f32[64,1], index: 11, kind: input, shape index: {}]   ;;  %s8818_s12 = inlined_call_operand.<no memory space> [shape: f32[1,1], index: 12, kind: input, shape index: {}]   ;;  %s8819_s13 = inlined_call_operand.vmem [shape: f32[2,1,1], index: 13, kind: output, shape index: {}]  }
   0x1   :  { %8842 = sst [smem:[#allocation18_spill]] %s8816_s10  ;;  %v18_v0 = vstv %s8818_s12 }
   0x2   :  { %8843 = sst [smem:[#allocation19_spill]] %s8819_s13  ;;  %19 = vst [vmem:[#allocation3] sm:$0x1] %v18_v0 }
   0x3   :  { %20 = vsyncpa [#allocation5], 0 }
   0x4   :  { %22 = vsyncpa [#allocation5 + $0x1], 0 }
   0x5   :  { %23 = vsyncpa [#allocation7], 0  ;;  %s6486_s27 = smov 0   ;;  %s6488_s28 = smov 0  }
   0x6   :  { %s6490_s29 = smov 0   ;;  %s6492_s30 = smov 0  }
   0x7 LB: > { %s6505_s12 = sadd.s32 4294967295, %s6401_s30   ;;  %p49_p0 = scmp.ne.s32.totalorder %s6393_s28, %s6389_s27  ;;  %s6401_s30 = sphi %s6492_s30, %s8894_s30   ;;  %s6397_s29 = sphi %s6490_s29, %s8898_s29   ;;  %s6393_s28 = sphi %s6488_s28, %s8897_s28   ;;  %s6389_s27 = sphi %s6486_s27, %s8896_s27  }
   0x8   : > { %p8823_p1 = scmp.eq.s32.totalorder %s6505_s12, 0  ;;  %p5304_p2 = scmp.ge.s32.totalorder %s6401_s30, 1 }
   0x9   : > { %p343_p3 = scmp.lt.s32.totalorder %s6401_s30, 3  ;;  %s6403_s16 = smov [#allocation6]  }
   0xa   : > { %p6513_p4 = por %p8823_p1, %p49_p0  ;;  %s367_s17 = sshll.u32 %s6403_s16, 4  ;;  %s368_s17 = int_to_ptr.vmem [resolvable:$true] %s367_s17 }
   0xb   : > { %p6517_p5 = pnand %p5304_p2, %p343_p3  ;;  %s6530_s19 = sadd.s32 1, %s6401_s30  }
   0xc   : > { %s8844_s14 = scalar_select %p6513_p4, 1, 0 }
   0xd   : > { %s8845_s15 = scalar_select %p6517_p5, 1, 0 }
   0xe   : > { %p6242_p6 = pneg %p6517_p5  ;;  %8847 = sst [smem:[#allocation10_spill]] %s6530_s19 }
   0xf   : > { %s36_s20 = sadd.s32 1, %s6397_s29  ;;  %s33_s21 = ssub.s32 %s6401_s30, %s6530_s19 }
  0x10   : > { %p6525_p7 = pnand %p6242_p6, %p8823_p1  ;;  %s6320_s22 = scalar_lea.vmem %s368_s17, 32768 }
  0x11   : > { %p6321_p9 = scmp.ne.s32.totalorder %s368_s17, %s6320_s22  ;;  %p6328_p12 = scmp.lt.s32.totalorder %s368_s17, %s368_s17 }
  0x12   : > { %p6311_p8 = pneg %p6525_p7  ;;  %p6329_p13 = scmp.lt.s32.totalorder %s6320_s22, %s6320_s22 }
  0x14   : > { %p6323_p10 = pnand %p6321_p9, %p6311_p8  ;;  %p6330_p0 = por %p6329_p13, %p6328_p12 }
  0x16   : > { %p6324_p11 = pneg %p6323_p10 }
  0x18   : > { %p6331_p2 = pnand %p6330_p0, %p6324_p11 }
  0x1a   : > { %6334 = shalt.err (!%p6331_p2)
}
  0x1b   : > { %s8822_s23 = smov 128   ;;  %s6405_s24 = smov 8  }
  0x1c   : > { %6245 = dma.hbm_to_vmem [thread:$0]  (!%p6525_p7), %s8812_s6, 32768, %s368_s17, [#allocation7], %s8822_s23, %s8822_s23, %s6405_s24  }
  0x1d   : > { %p34_p3 = scmp.eq.s32.totalorder %s33_s21, 0  ;;  %p43_p6 = scmp.ne.s32.totalorder %s6397_s29, %s6393_s28 }
  0x1e   : > { %p44_p8 = scmp.eq.s32.totalorder %s6401_s30, 0  ;;  %p6251_p9 = scmp.lt.s32.totalorder %s6401_s30, 2 }
  0x1f   : > { %s6550_s27 = scalar_select %p34_p3, %s6397_s29, %s36_s20  }
  0x20   : > { %p45_p10 = por %p44_p8, %p43_p6  ;;  %s399_s16 = sand.u32 1, %s6397_s29  }
  0x21   : > { %s5307_s22 = sshll.u32 %s399_s16, 8  ;;  %s5520_s19 = sshll.u32 %s6401_s30, 12 }
  0x22   : > { %s6557_s18 = scalar_lea.hbm %s8806_s0, %s5520_s19  ;;  %s403_s25 = scalar_lea.vmem [#allocation4], %s5307_s22 }
  0x23   : > { %s410_s17 = sshll.u32 %s403_s25, 4  ;;  %p6561_p7 = pnand %p6251_p9, %p45_p10  ;;  %s6559_s17 = int_to_ptr.vmem [resolvable:$true] %s410_s17 }
  0x24   : > { %s6565_s20 = scalar_lea.sflag [#allocation5], %s399_s16  ;;  %s6335_s30 = scalar_lea.hbm %s6557_s18, 4096 }
  0x25   : > { %p6336_p11 = scmp.ne.s32.totalorder %s6557_s18, %s6335_s30  ;;  %p6337_p12 = pneg %p6561_p7 }
  0x26   : > { %s6340_s19 = scalar_lea.hbm %s8806_s0, 8192  ;;  %p6341_p2 = scmp.lt.s32.totalorder %s6557_s18, %s8806_s0 }
  0x27   : > { %p6338_p13 = pnand %p6337_p12, %p6336_p11  ;;  %p6342_p3 = scmp.lt.s32.totalorder %s6340_s19, %s6335_s30 }
  0x29   : > { %p6339_p0 = pneg %p6338_p13  ;;  %p6343_p6 = por %p6342_p3, %p6341_p2 }
  0x2b   : > { %p6344_p8 = pnand %p6343_p6, %p6339_p0 }
  0x2d   : > { %6347 = shalt.err (!%p6344_p8)
}
  0x2e   : > { %s6348_s16 = scalar_lea.vmem %s6559_s17, 4096  ;;  %s6406_s25 = smov [#allocation4]  }
  0x2f   : > { %p6349_p9 = scmp.ne.s32.totalorder %s6559_s17, %s6348_s16  ;;  %s6353_s23 = sshll.u32 %s6406_s25, 4  ;;  %s6354_s23 = int_to_ptr.vmem [resolvable:$false] %s6353_s23 }
  0x30   : > { %s6355_s10 = scalar_lea.vmem %s6354_s23, 8192  ;;  %p6356_p13 = scmp.lt.s32.totalorder %s6559_s17, %s6354_s23 }
  0x31   : > { %p6351_p10 = pnand %p6349_p9, %p6337_p12  ;;  %p6357_p1 = scmp.lt.s32.totalorder %s6355_s10, %s6348_s16 }
  0x33   : > { %p6352_p11 = pneg %p6351_p10  ;;  %p6358_p4 = por %p6357_p1, %p6356_p13 }
  0x35   : > { %p6359_p5 = pnand %p6358_p4, %p6352_p11 }
  0x37   : > { %6362 = shalt.err (!%p6359_p5)
}
  0x38   : > { %s8849_s30 = smov 128   ;;  %p8850_p12 = scmp.ne.s32.totalorder %s8845_s15, 0 }
  0x39   : > { %6249 = dma.hbm_to_vmem [thread:$0]  (!%p6561_p7), %s6557_s18, 4096, %s6559_s17, %s6565_s20, %s8849_s30, %s8849_s30, %s6405_s24  }
  0x3a   : > { %428 = sbr.rel (%p8850_p12) target bundleno = 1770 (0x6ea), region = 72 }
  0x3f   : > { %s430_s13 = sand.u32 1, %s6393_s28   ;;  %p8851_p1 = scmp.ne.s32.totalorder %s8844_s14, 0 }
  0x40   : > { %s5311_s23 = sshll.u32 %s430_s13, 8  ;;  %s431_s19 = scalar_lea.sflag [#allocation5], %s430_s13 }
  0x41   : > { %s6592_s26 = scalar_lea.vmem [#allocation4], %s5311_s23 }
  0x42   : > { %6380 = dma.done.wait (%p8851_p1), %s431_s19, 4096  }
  0x43   : > { %6382 = vsyncadd (%p8851_p1), %s431_s19, 4294963200  ;;  %p8852_p4 = scmp.eq.s32.totalorder %s6505_s12, 0 }
  0x45   : > { %6384 = dma.done.wait (%p8852_p4), [#allocation7], 32768   ;;  %p8853_p5 = pmov %p8852_p4 }
  0x46   : > { %v598_v1 = vld [vmem:[%s6592_s26] sm:$0xff]  ;;  %v599_v2 = vld [vmem:[%s6592_s26 + $0x8] sm:$0xff]  ;;  %vm663_vm0 = vcmask 1040384   ;;  %v600_v3 = vld [vmem:[%s6592_s26 + $0x10] sm:$0xff]  ;;  %vm1007_vm1 = vcmask 1045504   ;;  %vm830_vm2 = vcmask 1046528  }
  0x47   : > { %6386 = vsyncadd (%p8853_p5), [#allocation7], 4294934528  ;;  %v666_v4 = vrot.slane %v598_v1, 7  ;;  %v667_v5 = vrot.slane %v599_v2, 7  ;;  %v601_v6 = vld [vmem:[%s6592_s26 + $0x18] sm:$0xff]  ;;  %v669_v7 = vrot.slane %v600_v3, 7 }
  0x48   : > { %v670_v8 = vrot.slane %v601_v6, 7  ;;  %v602_v17 = vld [vmem:[%s6592_s26 + $0x20] sm:$0xff]  ;;  %v603_v22 = vld [vmem:[%s6592_s26 + $0x28] sm:$0xff]  ;;  %s6407_s14 = smov 64   ;;  %s6408_s15 = smov 32   ;;  %v511_v32 = vld [vmem:[%s8808_s2 + $0xb8] sm:$0xff] }
  0x49   : > { %v6607_v9 = vsel %vm663_vm0, %v666_v4, %v667_v5  ;;  %v6610_v10 = vsel %vm663_vm0, 0.0, %v666_v4  ;;  %v782_v11 = vsel %vm663_vm0, %v667_v5, 0.0  ;;  %v6614_v12 = vsel %vm663_vm0, 0.0, %v669_v7  ;;  %5961 = vmatprep.subr.mxu0 %v511_v32  ;;  %v510_v33 = vld [vmem:[%s8808_s2 + $0xb0] sm:$0xff]  ;;  %v509_v42 = vld [vmem:[%s8808_s2 + $0xa8] sm:$0xff]  ;;  %v605_v44 = vld [vmem:[%s6592_s26 + $0x38] sm:$0xff] }
  0x4a   : > { %v1013_v13 = vrot.slane %v6610_v10, 2  ;;  %v1014_v14 = vrot.slane %v6607_v9, 2  ;;  %v836_v15 = vrot.slane %v6610_v10, 1  ;;  %v837_v16 = vrot.slane %v6607_v9, 1  ;;  %5962 = vmatpush3.msra.mxu0 %v511_v32  ;;  %v604_v43 = vld [vmem:[%s6592_s26 + $0x30] sm:$0xff]  ;;  %v508_v46 = vld [vmem:[%s8808_s2 + $0xa0] sm:$0xff] }
  0x4b   : > { %v1016_v18 = vrot.slane %v782_v11, 2  ;;  %v839_v19 = vrot.slane %v782_v11, 1  ;;  %v6622_v20 = vsel %vm663_vm0, %v669_v7, %v670_v8  ;;  %v783_v21 = vsel %vm663_vm0, %v670_v8, 0.0  ;;  %5963 = vmatprep.subr.mxu0 %v510_v33  ;;  %v507_v53 = vld [vmem:[%s8808_s2 + $0x98] sm:$0xff]  ;;  %v506_v62 = vld [vmem:[%s8808_s2 + $0x90] sm:$0xff]  ;;  %v606_v63 = vld [vmem:[%s6592_s26 + $0x40] sm:$0xff] }
  0x4c   : > { %v1015_v23 = vsel %vm1007_vm1, %v1013_v13, %v1014_v14  ;;  %v838_v24 = vsel %vm830_vm2, %v836_v15, %v837_v16  ;;  %v842_v25 = vrot.slane %v6622_v20, 1  ;;  %v844_v26 = vrot.slane %v783_v21, 1  ;;  %5964 = vmatpush3.msra.mxu0 %v510_v33  ;;  %v607_v0 = vld [vmem:[%s6592_s26 + $0x48] sm:$0xff]  ;;  %v504_v11 = vld [vmem:[%s8808_s2 + $0x80] sm:$0xff]  ;;  %p482_p7 = scmp.lt.s32.totalorder %s6505_s12, 1  ;;  %s8892_s25 = sld [smem:[#allocation18_spill]] }
  0x4d   : > { %1092 = vrot.lane.b32.xlu1 %v1015_v23, %s6407_s14  ;;  %915 = vrot.lane.b32.xlu0 %v838_v24, %s6408_s15  ;;  %v672_v27 = vrot.slane %v602_v17, 7  ;;  %v1017_v28 = vsel %vm1007_vm1, %v1014_v14, %v1016_v18  ;;  %v840_v29 = vsel %vm830_vm2, %v837_v16, %v839_v19  ;;  %v841_v30 = vrot.slane %v6614_v12, 1  ;;  %v505_v2 = vld [vmem:[%s8808_s2 + $0x88] sm:$0xff]  ;;  %v608_v18 = vld [vmem:[%s6592_s26 + $0x50] sm:$0xff] }
  0x4e   : > { %v673_v31 = vrot.slane %v603_v22, 7  ;;  %v845_v34 = vsel %vm830_vm2, %v842_v25, %v844_v26  ;;  %v1019_v35 = vrot.slane %v6622_v20, 2  ;;  %v1021_v37 = vrot.slane %v783_v21, 2  ;;  %5965 = vmatprep.subr.mxu0 %v509_v42  ;;  %v503_v23 = vld [vmem:[%s8808_s2 + $0x78] sm:$0xff]  ;;  %v501_v33 = vld [vmem:[%s8808_s2 + $0x68] sm:$0xff]  ;;  %s8900_s12 = smov (!%p482_p7, %s6505_s12), 1 }
  0x4f   : > { %v843_v36 = vsel %vm830_vm2, %v841_v30, %v842_v25  ;;  %v1018_v38 = vrot.slane %v6614_v12, 2  ;;  %v6651_v41 = vsel %vm663_vm0, 0.0, %v672_v27  ;;  %v675_v51 = vrot.slane %v604_v43, 7  ;;  %5966 = vmatpush3.msra.mxu0 %v509_v42  ;;  %v609_v24 = vld [vmem:[%s6592_s26 + $0x58] sm:$0xff] }
  0x50   : > { %v6647_v39 = vsel %vm663_vm0, %v672_v27, %v673_v31  ;;  %v784_v40 = vsel %vm663_vm0, %v673_v31, 0.0  ;;  %v1022_v47 = vsel %vm1007_vm1, %v1019_v35, %v1021_v37  ;;  %v846_v50 = vrot.slane %v6651_v41, 1  ;;  %5967 = vmatprep.subr.mxu0 %v508_v46  ;;  %v502_v27 = vld [vmem:[%s8808_s2 + $0x70] sm:$0xff] }
  0x51   : > { %1094 = vrot.lane.b32.xlu1 %v1017_v28, %s6407_s14  ;;  %917 = vrot.lane.b32.xlu0 %v840_v29, %s6408_s15  ;;  %v847_v45 = vrot.slane %v6647_v39, 1  ;;  %v1020_v48 = vsel %vm1007_vm1, %v1018_v38, %v1019_v35  ;;  %v849_v49 = vrot.slane %v784_v40, 1  ;;  %v676_v52 = vrot.slane %v605_v44, 7  ;;  %v500_v44 = vld [vmem:[%s8808_s2 + $0x60] sm:$0xff] }
  0x52   : > { %v1024_v54 = vrot.slane %v6647_v39, 2  ;;  %v1026_v55 = vrot.slane %v784_v40, 2  ;;  %v1023_v58 = vrot.slane %v6651_v41, 2  ;;  %5968 = vmatpush3.msra.mxu0 %v508_v46  ;;  %v6681_v61 = vsel %vm663_vm0, 0.0, %v675_v51  ;;  %v611_v46 = vld [vmem:[%s6592_s26 + $0x68] sm:$0xff] }
  0x53   : > { %v850_v56 = vsel %vm830_vm2, %v847_v45, %v849_v49  ;;  %v848_v57 = vsel %vm830_vm2, %v846_v50, %v847_v45  ;;  %v6677_v59 = vsel %vm663_vm0, %v675_v51, %v676_v52  ;;  %v785_v60 = vsel %vm663_vm0, %v676_v52, 0.0  ;;  %5969 = vmatprep.subr.mxu0 %v507_v53  ;;  %v610_v45 = vld [vmem:[%s6592_s26 + $0x60] sm:$0xff] }
  0x54   : > { %5970 = vmatpush3.msra.mxu0 %v507_v53  ;;  %v1027_v1 = vsel %vm1007_vm1, %v1024_v54, %v1026_v55  ;;  %v1025_v3 = vsel %vm1007_vm1, %v1023_v58, %v1024_v54  ;;  %v852_v4 = vrot.slane %v6677_v59, 1  ;;  %v854_v5 = vrot.slane %v785_v60, 1 }
  0x55   : > { %921 = vrot.lane.b32.xlu1 %v845_v34, %s6408_s15  ;;  %919 = vrot.lane.b32.xlu0 %v843_v36, %s6408_s15  ;;  %v851_v6 = vrot.slane %v6681_v61, 1  ;;  %v678_v7 = vrot.slane %v606_v63, 7  ;;  %v679_v8 = vrot.slane %v607_v0, 7  ;;  %v1029_v13 = vrot.slane %v6677_v59, 2 }
  0x56   : > { %5971 = vmatprep.subr.mxu0 %v506_v62  ;;  %v1031_v14 = vrot.slane %v785_v60, 2  ;;  %v855_v15 = vsel %vm830_vm2, %v852_v4, %v854_v5  ;;  %v1028_v17 = vrot.slane %v6681_v61, 2  ;;  %v681_v26 = vrot.slane %v608_v18, 7  ;;  %v612_v60 = vld [vmem:[%s6592_s26 + $0x70] sm:$0xff] }
  0x57   : > { %5972 = vmatpush3.msra.mxu0 %v506_v62  ;;  %v853_v16 = vsel %vm830_vm2, %v851_v6, %v852_v4  ;;  %v6708_v19 = vsel %vm663_vm0, %v678_v7, %v679_v8  ;;  %v786_v21 = vsel %vm663_vm0, %v679_v8, 0.0  ;;  %v6712_v22 = vsel %vm663_vm0, 0.0, %v678_v7  ;;  %v613_v62 = vld [vmem:[%s6592_s26 + $0x78] sm:$0xff] }
  0x58   : > { %5973 = vmatprep.subr.mxu0 %v505_v2  ;;  %v1032_v25 = vsel %vm1007_vm1, %v1029_v13, %v1031_v14  ;;  %v1030_v28 = vsel %vm1007_vm1, %v1028_v17, %v1029_v13  ;;  %v857_v29 = vrot.slane %v6708_v19, 1  ;;  %v859_v30 = vrot.slane %v786_v21, 1 }
  0x59   : > { %1098 = vrot.lane.b32.xlu1 %v1022_v47, %s6407_s14  ;;  %1096 = vrot.lane.b32.xlu0 %v1020_v48, %s6407_s14  ;;  %v856_v31 = vrot.slane %v6712_v22, 1  ;;  %v682_v32 = vrot.slane %v609_v24, 7  ;;  %v1034_v34 = vrot.slane %v6708_v19, 2  ;;  %v1036_v35 = vrot.slane %v786_v21, 2  ;;  %v615_v24 = vld [vmem:[%s6592_s26 + $0x88] sm:$0xff] }
  0x5a   : > { %5974 = vmatpush3.msra.mxu0 %v505_v2  ;;  %v860_v36 = vsel %vm830_vm2, %v857_v29, %v859_v30  ;;  %v1033_v38 = vrot.slane %v6712_v22, 2  ;;  %v6737_v40 = vsel %vm663_vm0, 0.0, %v681_v26  ;;  %v684_v52 = vrot.slane %v610_v45, 7  ;;  %v617_v45 = vld [vmem:[%s6592_s26 + $0x98] sm:$0xff] }
  0x5b   : > { %5975 = vmatprep.subr.mxu0 %v504_v11  ;;  %v858_v37 = vsel %vm830_vm2, %v856_v31, %v857_v29  ;;  %v6740_v42 = vsel %vm663_vm0, %v681_v26, %v682_v32  ;;  %v787_v43 = vsel %vm663_vm0, %v682_v32, 0.0  ;;  %v861_v47 = vrot.slane %v6737_v40, 1 }
  0x5c   : > { %5976 = vmatpush3.msra.mxu0 %v504_v11  ;;  %v1037_v48 = vsel %vm1007_vm1, %v1034_v34, %v1036_v35  ;;  %v1035_v49 = vsel %vm1007_vm1, %v1033_v38, %v1034_v34  ;;  %v862_v50 = vrot.slane %v6740_v42, 1  ;;  %v864_v51 = vrot.slane %v787_v43, 1 }
  0x5d   : > { %925 = vrot.lane.b32.xlu1 %v850_v56, %s6408_s15  ;;  %923 = vrot.lane.b32.xlu0 %v848_v57, %s6408_s15  ;;  %v685_v53 = vrot.slane %v611_v46, 7  ;;  %v1039_v54 = vrot.slane %v6740_v42, 2  ;;  %v1041_v55 = vrot.slane %v787_v43, 2  ;;  %v1038_v58 = vrot.slane %v6737_v40, 2 }
  0x5e   : > { %5977 = vmatprep.subr.mxu0 %v503_v23  ;;  %v865_v56 = vsel %vm830_vm2, %v862_v50, %v864_v51  ;;  %v863_v57 = vsel %vm830_vm2, %v861_v47, %v862_v50  ;;  %v688_v4 = vrot.slane %v613_v62, 7  ;;  %v691_v31 = vrot.slane %v615_v24, 7  ;;  %v6817_v47 = vld [vmem:[%s8808_s2 + $0x118] sm:$0xff]  ;;  %v619_v62 = vld [vmem:[%s6592_s26 + $0xa8] sm:$0xff] }
  0x5f   : > { %5978 = vmatpush3.msra.mxu0 %v503_v23  ;;  %v6763_v63 = vsel %vm663_vm0, %v684_v52, %v685_v53  ;;  %v788_v0 = vsel %vm663_vm0, %v685_v53, 0.0  ;;  %v1042_v2 = vsel %vm1007_vm1, %v1039_v54, %v1041_v55  ;;  %v1040_v5 = vsel %vm1007_vm1, %v1038_v58, %v1039_v54  ;;  %v614_v23 = vld [vmem:[%s6592_s26 + $0x80] sm:$0xff] }
  0x60   : > { %5979 = vmatprep.subr.mxu0 %v502_v27  ;;  %v867_v6 = vrot.slane %v6763_v63, 1  ;;  %v869_v7 = vrot.slane %v788_v0, 1  ;;  %v1044_v11 = vrot.slane %v6763_v63, 2  ;;  %v789_v18 = vsel %vm663_vm0, %v688_v4, 0.0 }
  0x61   : > { %1102 = vrot.lane.b32.xlu1 %v1027_v1, %s6407_s14  ;;  %1100 = vrot.lane.b32.xlu0 %v1025_v3, %s6407_s14  ;;  %v6767_v1 = vsel %vm663_vm0, 0.0, %v684_v52  ;;  %v687_v3 = vrot.slane %v612_v60, 7  ;;  %v690_v30 = vrot.slane %v614_v23, 7  ;;  %v790_v38 = vsel %vm663_vm0, %v691_v31, 0.0  ;;  %v618_v60 = vld [vmem:[%s6592_s26 + $0xa0] sm:$0xff] }
  0x62   : > { %5980 = vmatpush3.msra.mxu0 %v502_v27  ;;  %v866_v8 = vrot.slane %v6767_v1, 1  ;;  %v870_v14 = vsel %vm830_vm2, %v867_v6, %v869_v7  ;;  %v1043_v17 = vrot.slane %v6767_v1, 2  ;;  %v879_v50 = vrot.slane %v790_v38, 1 }
  0x63   : > { %5981 = vmatprep.subr.mxu0 %v501_v33  ;;  %v6779_v13 = vsel %vm663_vm0, %v687_v3, %v688_v4  ;;  %v6786_v21 = vsel %vm663_vm0, 0.0, %v687_v3  ;;  %v6807_v43 = vsel %vm663_vm0, 0.0, %v690_v30  ;;  %v694_v53 = vrot.slane %v617_v45, 7 }
  0x64   : > { %5982 = vmatpush3.msra.mxu0 %v501_v33  ;;  %v1045_v27 = vsel %vm1007_vm1, %v1043_v17, %v1044_v11  ;;  %v871_v29 = vrot.slane %v6786_v21, 1  ;;  %v1049_v32 = vrot.slane %v6779_v13, 2  ;;  %v1051_v33 = vrot.slane %v789_v18, 2 }
  0x65   : > { %929 = vrot.lane.b32.xlu1 %v855_v15, %s6408_s15  ;;  %927 = vrot.lane.b32.xlu0 %v853_v16, %s6408_s15  ;;  %v868_v15 = vsel %vm830_vm2, %v866_v8, %v867_v6  ;;  %v1046_v16 = vrot.slane %v788_v0, 2  ;;  %v876_v51 = vrot.slane %v6807_v43, 1  ;;  %v1056_v55 = vrot.slane %v790_v38, 2 }
  0x66   : > { %5983 = vmatprep.subr.mxu0 %v500_v44  ;;  %v1052_v46 = vsel %vm1007_vm1, %v1049_v32, %v1051_v33  ;;  %v1053_v58 = vrot.slane %v6807_v43, 2  ;;  %v697_v6 = vrot.slane %v619_v62, 7  ;;  %vm1184_vm3 = vcmask 261120  }
  0x67   : > { %5984 = vmatpush3.msra.mxu0 %v500_v44  ;;  %v1047_v26 = vsel %vm1007_vm1, %v1044_v11, %v1046_v16  ;;  %v616_v44 = vld [vmem:[%s6592_s26 + $0x90] sm:$0xff]  ;;  %vm1217_vm4 = vcmask 523264   ;;  %vm1278_vm5 = vcmask 785408   ;;  %vm3102_vm6 = vcmask 1041409  }
  0x68   : > { %6105 = vmatprep.subr.mxu0 %v6817_v47  ;;  %v693_v52 = vrot.slane %v616_v44, 7  ;;  %vm3104_vm7 = vcmask 1042434   ;;  %vm3106_vm8 = vcmask 1043459   ;;  %vm3108_vm9 = vcmask 1044484  }
  0x69   : > { %1106 = vrot.lane.b32.xlu1 %v1032_v25, %s6407_s14  ;;  %1104 = vrot.lane.b32.xlu0 %v1030_v28, %s6407_s14  ;;  %v872_v25 = vrot.slane %v6779_v13, 1  ;;  %v874_v28 = vrot.slane %v789_v18, 1  ;;  %vm3110_vm10 = vcmask 1045509   ;;  %vm3112_vm11 = vcmask 1046534  }
  0x6a   : > { %v6832_v0 = vsel %vm663_vm0, %v693_v52, %v694_v53  ;;  %v6836_v3 = vsel %vm663_vm0, 0.0, %v693_v52  ;;  %vm3114_vm12 = vcmask 1047559   ;;  %vm4324_vm13 = vcmask 1043456  }
  0x6b   : > { %v875_v34 = vsel %vm830_vm2, %v872_v25, %v874_v28  ;;  %v873_v35 = vsel %vm830_vm2, %v871_v29, %v872_v25  ;;  %v882_v8 = vrot.slane %v6832_v0, 1  ;;  %v1058_v23 = vrot.slane %v6836_v3, 2  ;;  %v621_v28 = vld [vmem:[%s6592_s26 + $0xb8] sm:$0xff] }
  0x6c   : > { %v792_v25 = vsel %vm663_vm0, %v697_v6, 0.0  ;;  %vm6411_vm14 = vmmov 0   ;;  %vm4320_vm15 = vcmask 31744  }
  0x6d   : > { %933 = vrot.lane.b32.xlu1 %v860_v36, %s6408_s15  ;;  %931 = vrot.lane.b32.xlu0 %v858_v37, %s6408_s15  ;;  %v1048_v36 = vrot.slane %v6786_v21, 2  ;;  %v6803_v37 = vsel %vm663_vm0, %v690_v30, %v691_v31  ;;  %v1066_v38 = vrot.slane %v792_v25, 2 }
  0x6e   : > { %v1054_v54 = vrot.slane %v6803_v37, 2 }
  0x70   : > { %v1057_v4 = vsel %vm1007_vm1, %v1054_v54, %v1056_v55  ;;  %v1055_v7 = vsel %vm1007_vm1, %v1053_v58, %v1054_v54 }
  0x71   : > { %1110 = vrot.lane.b32.xlu1 %v1037_v48, %s6407_s14  ;;  %1108 = vrot.lane.b32.xlu0 %v1035_v49, %s6407_s14  ;;  %v1050_v48 = vsel %vm1007_vm1, %v1048_v36, %v1049_v32  ;;  %v877_v49 = vrot.slane %v6803_v37, 1  ;;  %v889_v32 = vrot.slane %v792_v25, 1 }
  0x75   : > { %937 = vrot.lane.b32.xlu1 %v865_v56, %s6408_s15  ;;  %935 = vrot.lane.b32.xlu0 %v863_v57, %s6408_s15  ;;  %v880_v56 = vsel %vm830_vm2, %v877_v49, %v879_v50  ;;  %v878_v57 = vsel %vm830_vm2, %v876_v51, %v877_v49  ;;  %v623_v49 = vld [vmem:[%s6592_s26 + $0xc8] sm:$0xff] }
  0x76   : > { %v703_v55 = vrot.slane %v623_v49, 7 }
  0x79   : > { %1114 = vrot.lane.b32.xlu1 %v1042_v2, %s6407_s14  ;;  %1112 = vrot.lane.b32.xlu0 %v1040_v5, %s6407_s14  ;;  %v791_v2 = vsel %vm663_vm0, %v694_v53, 0.0  ;;  %v696_v5 = vrot.slane %v618_v60, 7 }
  0x7a   : > { %v884_v11 = vrot.slane %v791_v2, 1  ;;  %v1061_v16 = vrot.slane %v791_v2, 2 }
  0x7b   : > { %v6851_v24 = vsel %vm663_vm0, %v696_v5, %v697_v6 }
  0x7c   : > { %v885_v17 = vsel %vm830_vm2, %v882_v8, %v884_v11  ;;  %v887_v29 = vrot.slane %v6851_v24, 1  ;;  %v1064_v36 = vrot.slane %v6851_v24, 2 }
  0x7d   : > { %941 = vrot.lane.b32.xlu1 %v870_v14, %s6408_s15  ;;  %939 = vrot.lane.b32.xlu0 %v868_v15, %s6408_s15  ;;  %v881_v14 = vrot.slane %v6836_v3, 1  ;;  %v1059_v15 = vrot.slane %v6832_v0, 2 }
  0x7e   : > { %v890_v44 = vsel %vm830_vm2, %v887_v29, %v889_v32  ;;  %v1067_v53 = vsel %vm1007_vm1, %v1064_v36, %v1066_v38 }
  0x7f   : > { %v883_v18 = vsel %vm830_vm2, %v881_v14, %v882_v8  ;;  %v1062_v30 = vsel %vm1007_vm1, %v1059_v15, %v1061_v16  ;;  %v1060_v31 = vsel %vm1007_vm1, %v1058_v23, %v1059_v15  ;;  %v794_v8 = vsel %vm663_vm0, %v703_v55, 0.0  ;;  %v624_v14 = vld [vmem:[%s6592_s26 + $0xd0] sm:$0xff]  ;;  %v625_v15 = vld [vmem:[%s6592_s26 + $0xd8] sm:$0xff] }
  0x80   : > { %v899_v23 = vrot.slane %v794_v8, 1 }
  0x81   : > { %1118 = vrot.lane.b32.xlu1 %v1047_v26, %s6407_s14  ;;  %1116 = vrot.lane.b32.xlu0 %v1045_v27, %s6407_s14  ;;  %v6855_v26 = vsel %vm663_vm0, 0.0, %v696_v5  ;;  %v620_v27 = vld [vmem:[%s6592_s26 + $0xb0] sm:$0xff] }
  0x82   : > { %v886_v33 = vrot.slane %v6855_v26, 1 }
  0x84   : > { %v888_v45 = vsel %vm830_vm2, %v886_v33, %v887_v29 }
  0x85   : > { %945 = vrot.lane.b32.xlu1 %v875_v34, %s6408_s15  ;;  %943 = vrot.lane.b32.xlu0 %v873_v35, %s6408_s15  ;;  %v699_v34 = vrot.slane %v620_v27, 7  ;;  %v700_v35 = vrot.slane %v621_v28, 7  ;;  %v705_v27 = vrot.slane %v624_v14, 7  ;;  %v706_v28 = vrot.slane %v625_v15, 7  ;;  %v496_v14 = vld [vmem:[%s8808_s2 + $0x40] sm:$0xff]  ;;  %v628_v15 = vld [vmem:[%s6592_s26 + $0xf0] sm:$0xff] }
  0x87   : > { %v6874_v50 = vsel %vm663_vm0, %v699_v34, %v700_v35  ;;  %v793_v51 = vsel %vm663_vm0, %v700_v35, 0.0  ;;  %v6878_v52 = vsel %vm663_vm0, 0.0, %v699_v34  ;;  %v626_v34 = vld [vmem:[%s6592_s26 + $0xe0] sm:$0xff]  ;;  %v627_v35 = vld [vmem:[%s6592_s26 + $0xe8] sm:$0xff]  ;;  %v795_v38 = vsel %vm663_vm0, %v706_v28, 0.0 }
  0x88   : > { %v894_v58 = vrot.slane %v793_v51, 1  ;;  %v891_v60 = vrot.slane %v6878_v52, 1  ;;  %v1069_v62 = vrot.slane %v6874_v50, 2  ;;  %v1071_v6 = vrot.slane %v793_v51, 2 }
  0x89   : > { %1122 = vrot.lane.b32.xlu1 %v1052_v46, %s6407_s14  ;;  %1120 = vrot.lane.b32.xlu0 %v1050_v48, %s6407_s14  ;;  %v1063_v46 = vrot.slane %v6855_v26, 2  ;;  %v622_v48 = vld [vmem:[%s6592_s26 + $0xc0] sm:$0xff]  ;;  %v709_v49 = vrot.slane %v627_v35, 7 }
  0x8a   : > { %v702_v54 = vrot.slane %v622_v48, 7  ;;  %v708_v48 = vrot.slane %v626_v34, 7 }
  0x8c   : > { %v6890_v2 = vsel %vm663_vm0, %v702_v54, %v703_v55  ;;  %v6897_v11 = vsel %vm663_vm0, 0.0, %v702_v54  ;;  %v904_v54 = vrot.slane %v795_v38, 1 }
  0x8d   : > { %949 = vrot.lane.b32.xlu1 %v880_v56, %s6408_s15  ;;  %947 = vrot.lane.b32.xlu0 %v878_v57, %s6408_s15  ;;  %v1065_v56 = vsel %vm1007_vm1, %v1063_v46, %v1064_v36  ;;  %v892_v57 = vrot.slane %v6874_v50, 1  ;;  %v897_v16 = vrot.slane %v6890_v2, 1  ;;  %v896_v25 = vrot.slane %v6897_v11, 1 }
  0x8e   : > { %v1074_v29 = vrot.slane %v6890_v2, 2  ;;  %v1073_v33 = vrot.slane %v6897_v11, 2  ;;  %v6916_v36 = vsel %vm663_vm0, %v705_v27, %v706_v28 }
  0x8f   : > { %v893_v5 = vsel %vm830_vm2, %v891_v60, %v892_v57  ;;  %v898_v32 = vsel %vm830_vm2, %v896_v25, %v897_v16  ;;  %v1081_v60 = vrot.slane %v795_v38, 2  ;;  %v495_v25 = vld [vmem:[%s8808_s2 + $0x38] sm:$0xff] }
  0x90   : > { %v1075_v51 = vsel %vm1007_vm1, %v1073_v33, %v1074_v29  ;;  %v494_v33 = vld [vmem:[%s8808_s2 + $0x30] sm:$0xff] }
  0x91   : > { %1126 = vrot.lane.b32.xlu1 %v1057_v4, %s6407_s14  ;;  %1124 = vrot.lane.b32.xlu0 %v1055_v7, %s6407_s14  ;;  %v895_v4 = vsel %vm830_vm2, %v892_v57, %v894_v58  ;;  %v1068_v7 = vrot.slane %v6878_v52, 2  ;;  %v497_v57 = vld [vmem:[%s8808_s2 + $0x48] sm:$0xff]  ;;  %v1079_v58 = vrot.slane %v6916_v36, 2 }
  0x95   : > { %953 = vrot.lane.b32.xlu1 %v885_v17, %s6408_s15  ;;  %951 = vrot.lane.b32.xlu0 %v883_v18, %s6408_s15  ;;  %v1072_v17 = vsel %vm1007_vm1, %v1069_v62, %v1071_v6  ;;  %v1070_v18 = vsel %vm1007_vm1, %v1068_v7, %v1069_v62  ;;  %v6944_v6 = vsel %vm663_vm0, %v708_v48, %v709_v49  ;;  %v796_v7 = vsel %vm663_vm0, %v709_v49, 0.0 }
  0x96   : > { %v1084_v34 = vrot.slane %v6944_v6, 2  ;;  %v1086_v35 = vrot.slane %v796_v7, 2 }
  0x99   : > { %1130 = vrot.lane.b32.xlu1 %v1062_v30, %s6407_s14  ;;  %1128 = vrot.lane.b32.xlu0 %v1060_v31, %s6407_s14  ;;  %v1076_v30 = vrot.slane %v794_v8, 2  ;;  %v900_v31 = vsel %vm830_vm2, %v897_v16, %v899_v23  ;;  %v6948_v8 = vsel %vm663_vm0, 0.0, %v708_v48  ;;  %v629_v16 = vld [vmem:[%s6592_s26 + $0xf8] sm:$0xff]  ;;  %s8893_s26 = sld [smem:[#allocation19_spill]] }
  0x9a   : > { %v1083_v49 = vrot.slane %v6948_v8, 2 }
  0x9b   : > { %v1077_v46 = vsel %vm1007_vm1, %v1074_v29, %v1076_v30  ;;  %v909_v29 = vrot.slane %v796_v7, 1  ;;  %v906_v30 = vrot.slane %v6948_v8, 1 }
  0x9d   : > { %957 = vrot.lane.b32.xlu1 %v890_v44, %s6408_s15  ;;  %955 = vrot.lane.b32.xlu0 %v888_v45, %s6408_s15  ;;  %v6920_v44 = vsel %vm663_vm0, 0.0, %v705_v27  ;;  %v499_v45 = vld [vmem:[%s8808_s2 + $0x58] sm:$0xff]  ;;  %v1082_v27 = vsel %vm1007_vm1, %v1079_v58, %v1081_v60  ;;  %v1087_v60 = vsel %vm1007_vm1, %v1084_v34, %v1086_v35 }
  0x9e   : > { %v901_v55 = vrot.slane %v6920_v44, 1  ;;  %6033 = vmatprep.subr.mxu1 %v499_v45 }
  0x9f   : > { %6034 = vmatpush3.msra.mxu1 %v499_v45  ;;  %s487_s13 = scalar_lea.vmem %s8893_s26, %s8900_s12 }
  0xa1   : > { %1134 = vrot.lane.b32.xlu1 %v1067_v53, %s6407_s14  ;;  %1132 = vrot.lane.b32.xlu0 %v1065_v56, %s6407_s14  ;;  %v902_v53 = vrot.slane %v6916_v36, 1  ;;  %v498_v56 = vld [vmem:[%s8808_s2 + $0x50] sm:$0xff] }
  0xa2   : > { %6035 = vmatprep.subr.mxu1 %v498_v56 }
  0xa3   : > { %v905_v62 = vsel %vm830_vm2, %v902_v53, %v904_v54  ;;  %6036 = vmatpush3.msra.mxu1 %v498_v56 }
  0xa4   : > { %6037 = vmatprep.subr.mxu1 %v497_v57 }
  0xa5   : > { %961 = vrot.lane.b32.xlu1 %v895_v4, %s6408_s15  ;;  %959 = vrot.lane.b32.xlu0 %v893_v5, %s6408_s15  ;;  %v903_v4 = vsel %vm830_vm2, %v901_v55, %v902_v53  ;;  %v1078_v5 = vrot.slane %v6920_v44, 2  ;;  %v493_v55 = vld [vmem:[%s8808_s2 + $0x28] sm:$0xff] }
  0xa6   : > { %6038 = vmatpush3.msra.mxu1 %v497_v57 }
  0xa7   : > { %v1080_v28 = vsel %vm1007_vm1, %v1078_v5, %v1079_v58  ;;  %6039 = vmatprep.subr.mxu1 %v496_v14 }
  0xa8   : > { %6040 = vmatpush3.msra.mxu1 %v496_v14 }
  0xa9   : > { %1138 = vrot.lane.b32.xlu1 %v1072_v17, %s6407_s14  ;;  %1136 = vrot.lane.b32.xlu0 %v1070_v18, %s6407_s14  ;;  %v907_v17 = vrot.slane %v6944_v6, 1  ;;  %v8834_v18 = vmov 0.0  }
  0xaa   : > { %v6959_v23 = vrot.slane %v8834_v18, 7  ;;  %6041 = vmatprep.subr.mxu1 %v495_v25 }
  0xab   : > { %v908_v48 = vsel %vm830_vm2, %v906_v30, %v907_v17  ;;  %6042 = vmatpush3.msra.mxu1 %v495_v25 }
  0xac   : > { %v6975_v38 = vsel %vm663_vm0, 0.0, %v6959_v23  ;;  %v6979_v45 = vsel %vm663_vm0, %v6959_v23, 0.0  ;;  %6043 = vmatprep.subr.mxu1 %v494_v33  ;;  %v832_v57 = vrot.slane %v6959_v23, 1  ;;  %v1009_v30 = vrot.slane %v6959_v23, 2 }
  0xad   : > { %965 = vrot.lane.b32.xlu1 %v900_v31, %s6408_s15  ;;  %963 = vrot.lane.b32.xlu0 %v898_v32, %s6408_s15  ;;  %v711_v31 = vrot.slane %v628_v15, 7  ;;  %v712_v32 = vrot.slane %v629_v16, 7  ;;  %8854 = vst [vmem:[#allocation11_spill] sm:$0xff] %v6975_v38  ;;  %8855 = vst [vmem:[#allocation12_spill] sm:$0xff] %v6979_v45  ;;  %v8828_v56 = vrot.slane %v6975_v38, 1  ;;  %v8829_v58 = vrot.slane %v6979_v45, 1 }
  0xae   : > { %6044 = vmatpush3.msra.mxu1 %v494_v33 }
  0xaf   : > { %v6988_v53 = vsel %vm663_vm0, %v712_v32, 0.0  ;;  %v6991_v54 = vsel %vm663_vm0, 0.0, %v711_v31  ;;  %6045 = vmatprep.subr.mxu1 %v493_v55  ;;  %v833_v25 = vsel %vm830_vm2, %v8828_v56, %v832_v57 }
  0xb0   : > { %v1255_v7 = vrot.slane %v6988_v53, 1  ;;  %v1252_v14 = vrot.slane %v6991_v54, 1  ;;  %6046 = vmatpush3.msra.mxu1 %v493_v55 }
  0xb1   : > { %1142 = vrot.lane.b32.xlu1 %v1077_v46, %s6407_s14  ;;  %1140 = vrot.lane.b32.xlu0 %v1075_v51, %s6407_s14  ;;  %v910_v46 = vsel %vm830_vm2, %v907_v17, %v909_v29  ;;  %v6985_v51 = vsel %vm663_vm0, %v711_v31, %v712_v32  ;;  %v8827_v31 = vrot.slane %v6979_v45, 2 }
  0xb2   : > { %v1253_v5 = vrot.slane %v6985_v51, 1  ;;  %v1264_v35 = vrot.slane %v6985_v51, 2 }
  0xb4   : > { %v1256_v32 = vsel %vm830_vm2, %v1253_v5, %v1255_v7  ;;  %v1254_v33 = vsel %vm830_vm2, %v1252_v14, %v1253_v5  ;;  %v1012_v7 = vsel %vm1007_vm1, %v1009_v30, %v8827_v31  ;;  %v1266_v14 = vrot.slane %v6988_v53, 2 }
  0xb5   : > { %969 = vrot.lane.b32.xlu1 %v905_v62, %s6408_s15  ;;  %967 = vrot.lane.b32.xlu0 %v903_v4, %s6408_s15  ;;  %v492_v62 = vld [vmem:[%s8808_s2 + $0x20] sm:$0xff]  ;;  %v1085_v4 = vsel %vm1007_vm1, %v1083_v49, %v1084_v34  ;;  %v1263_v34 = vrot.slane %v6991_v54, 2  ;;  %v490_v49 = vld [vmem:[%s8808_s2 + $0x10] sm:$0xff] }
  0xb6   : > { %6047 = vmatprep.subr.mxu1 %v492_v62 }
  0xb7   : > { %6048 = vmatpush3.msra.mxu1 %v492_v62  ;;  %v522_v62 = vld [vmem:[%s8808_s2 + $0x110] sm:$0xff] }
  0xb9   : > { %1146 = vrot.lane.b32.xlu1 %v1082_v27, %s6407_s14  ;;  %1144 = vrot.lane.b32.xlu0 %v1080_v28, %s6407_s14  ;;  %v835_v27 = vsel %vm830_vm2, %v832_v57, %v8829_v58  ;;  %v491_v28 = vld [vmem:[%s8808_s2 + $0x18] sm:$0xff] }
  0xba   : > { %6049 = vmatprep.subr.mxu1 %v491_v28 }
  0xbb   : > { %6050 = vmatpush3.msra.mxu1 %v491_v28 }
  0xbc   : > { %6051 = vmatprep.subr.mxu1 %v490_v49 }
  0xbd   : > { %973 = vrot.lane.b32.xlu1 %v910_v46, %s6408_s15  ;;  %971 = vrot.lane.b32.xlu0 %v908_v48, %s6408_s15 }
  0xbe   : > { %6052 = vmatpush3.msra.mxu1 %v490_v49  ;;  %v517_v49 = vld [vmem:[%s8808_s2 + $0xe8] sm:$0xff] }
  0xbf   : > { %v1093_v15 = vpop.permute.xlu1 %1092  ;;  %v916_v16 = vpop.permute.xlu0 %915 }
  0xc0   : > { %v1187_v17 = vsel %vm1184_vm3, %v6610_v10, %v916_v16  ;;  %v8826_v10 = vrot.slane %v6975_v38, 2 }
  0xc1   : > { %1150 = vrot.lane.b32.xlu1 %v1087_v60, %s6407_s14  ;;  %1148 = vrot.lane.b32.xlu0 %v1085_v4, %s6407_s14  ;;  %v7023_v29 = vsel %vm1217_vm4, %v1187_v17, %v1093_v15  ;;  %v6294_v60 = vpack.i.bf16 %v835_v27, %v833_v25  ;;  %v489_v4 = vld [vmem:[%s8808_s2 + $0x8] sm:$0xff]  ;;  %v488_v25 = vld [vmem:[%s8808_s2] sm:$0xff]  ;;  %v1267_v27 = vsel %vm1007_vm1, %v1264_v35, %v1266_v14 }
  0xc2   : > { %5985 = vmatprep.mubr.msk.f32.mxu0 %vm1278_vm5, %v7023_v29  ;;  %v1010_v5 = vsel %vm1007_vm1, %v8826_v10, %v1009_v30  ;;  %v521_v17 = vld [vmem:[%s8808_s2 + $0x108] sm:$0xff]  ;;  %6053 = vmatprep.subr.mxu1 %v489_v4  ;;  %v515_v14 = vld [vmem:[%s8808_s2 + $0xd8] sm:$0xff] }
  0xc3   : > { %v1095_v46 = vpop.permute.xlu1 %1094  ;;  %v918_v48 = vpop.permute.xlu0 %917  ;;  %v6299_v53 = vpack.i.bf16 %v1012_v7, %v1010_v5  ;;  %6054 = vmatpush3.msra.mxu1 %v489_v4 }
  0xc4   : > { %v1188_v55 = vsel %vm1184_vm3, %v6607_v9, %v918_v48  ;;  %v1265_v9 = vsel %vm1007_vm1, %v1263_v34, %v1264_v35  ;;  %6055 = vmatprep.subr.mxu1 %v488_v25  ;;  %v518_v48 = vld [vmem:[%s8808_s2 + $0xf0] sm:$0xff] }
  0xc5   : > { %1259 = vrot.lane.b32.xlu1 %v1256_v32, %s6408_s15  ;;  %1257 = vrot.lane.b32.xlu0 %v1254_v33, %s6408_s15  ;;  %v7042_v57 = vsel %vm1217_vm4, %v1188_v55, %v1095_v46  ;;  %v520_v33 = vld [vmem:[%s8808_s2 + $0x100] sm:$0xff] }
  0xc6   : > { %5986 = vmatmul.mubr.msk.f32.vlgmr.msra.gmra.mxu0 %vm1278_vm5, %v7042_v57  ;;  %6056 = vmatpush3.msra.mxu1 %v488_v25 }
  0xc7   : > { %v922_v15 = vpop.permute.xlu1 %921  ;;  %v920_v16 = vpop.permute.xlu0 %919  ;;  %6106 = vmatpush3.msra.mxu0 %v6817_v47  ;;  %3315 = vmatprep.subr.mxu1 %v8834_v18 }
  0xc8   : > { %6107 = vmatprep.subr.mxu0 %v522_v62  ;;  %v1190_v47 = vsel %vm1184_vm3, %v6622_v20, %v922_v15  ;;  %v1189_v28 = vsel %vm1184_vm3, %v6614_v12, %v920_v16  ;;  %v519_v12 = vld [vmem:[%s8808_s2 + $0xf8] sm:$0xff]  ;;  %v514_v15 = vld [vmem:[%s8808_s2 + $0xd0] sm:$0xff] }
  0xc9   : > { %6295 = vrot.lane.b32.xlu1 %v6294_v60, %s6408_s15  ;;  %1268 = vrot.lane.b32.xlu0 %v1265_v9, %s6407_s14 }
  0xca   : > { %6108 = vmatpush3.msra.mxu0 %v522_v62 }
  0xcb   : > { %v1099_v30 = vpop.permute.xlu1 %1098  ;;  %v1097_v32 = vpop.permute.xlu0 %1096  ;;  %6109 = vmatprep.subr.mxu0 %v521_v17 }
  0xcc   : > { %v7078_v34 = vsel %vm1217_vm4, %v1190_v47, %v1099_v30  ;;  %v7081_v35 = vsel %vm1217_vm4, %v1189_v28, %v1097_v32  ;;  %6110 = vmatpush3.msra.mxu0 %v521_v17 }
  0xcd   : > { %6300 = vrot.lane.b32.xlu1 %v6299_v53, %s6407_s14  ;;  %1270 = vrot.lane.b32.xlu0 %v1267_v27, %s6407_s14  ;;  %v513_v27 = vld [vmem:[%s8808_s2 + $0xc8] sm:$0xff] }
  0xce   : > { %5988 = vmatprep.mubr.msk.f32.mxu0 %vm1278_vm5, %v7081_v35  ;;  %6111 = vmatprep.subr.mxu0 %v520_v33 }
  0xcf   : > { %5989 = vmatmul.mubr.msk.f32.gmra.mxu0 %vm1278_vm5, %v7078_v34  ;;  %v926_v20 = vpop.permute.xlu1 %925  ;;  %v924_v46 = vpop.permute.xlu0 %923 }
  0xd0   : > { %6112 = vmatpush3.msra.mxu0 %v520_v33  ;;  %v1192_v55 = vsel %vm1184_vm3, %v6647_v39, %v926_v20  ;;  %v1191_v60 = vsel %vm1184_vm3, %v6651_v41, %v924_v46  ;;  %v516_v39 = vld [vmem:[%s8808_s2 + $0xe0] sm:$0xff] }
  0xd1   : > { %6113 = vmatprep.subr.mxu0 %v519_v12 }
  0xd2   : > { %6114 = vmatpush3.msra.mxu0 %v519_v12 }
  0xd3   : > { %v1103_v62 = vpop.permute.xlu1 %1102  ;;  %v1101_v4 = vpop.permute.xlu0 %1100  ;;  %6115 = vmatprep.subr.mxu0 %v518_v48 }
  0xd4   : > { %v7104_v9 = vsel %vm1217_vm4, %v1192_v55, %v1103_v62  ;;  %v7107_v5 = vsel %vm1217_vm4, %v1191_v60, %v1101_v4  ;;  %6116 = vmatpush3.msra.mxu0 %v518_v48 }
  0xd5   : > { %5991 = vmatprep.mubr.msk.f32.mxu0 %vm1278_vm5, %v7107_v5  ;;  %6117 = vmatprep.subr.mxu0 %v517_v49 }
  0xd6   : > { %5992 = vmatmul.mubr.msk.f32.gmra.mxu0 %vm1278_vm5, %v7104_v9 }
  0xd7   : > { %v930_v41 = vpop.permute.xlu1 %929  ;;  %v928_v7 = vpop.permute.xlu0 %927  ;;  %6118 = vmatpush3.msra.mxu0 %v517_v49 }
  0xd8   : > { %6119 = vmatprep.subr.mxu0 %v516_v39  ;;  %v1194_v16 = vsel %vm1184_vm3, %v6677_v59, %v930_v41  ;;  %v1193_v17 = vsel %vm1184_vm3, %v6681_v61, %v928_v7  ;;  %v512_v59 = vld [vmem:[%s8808_s2 + $0xc0] sm:$0xff] }
  0xd9   : > { %6120 = vmatpush3.msra.mxu0 %v516_v39 }
  0xda   : > { %6121 = vmatprep.subr.mxu0 %v515_v14 }
  0xdb   : > { %v1107_v25 = vpop.permute.xlu1 %1106  ;;  %v1105_v53 = vpop.permute.xlu0 %1104  ;;  %6122 = vmatpush3.msra.mxu0 %v515_v14 }
  0xdc   : > { %v7130_v47 = vsel %vm1217_vm4, %v1194_v16, %v1107_v25  ;;  %v7133_v28 = vsel %vm1217_vm4, %v1193_v17, %v1105_v53  ;;  %6123 = vmatprep.subr.mxu0 %v514_v15 }
  0xdd   : > { %5994 = vmatprep.mubr.msk.f32.mxu0 %vm1278_vm5, %v7133_v28  ;;  %6124 = vmatpush3.msra.mxu0 %v514_v15 }
  0xde   : > { %5995 = vmatmul.mubr.msk.f32.gmra.mxu0 %vm1278_vm5, %v7130_v47  ;;  %6125 = vmatprep.subr.mxu0 %v513_v27 }
  0xdf   : > { %v934_v61 = vpop.permute.xlu1 %933  ;;  %v932_v30 = vpop.permute.xlu0 %931  ;;  %6126 = vmatpush3.msra.mxu0 %v513_v27 }
  0xe0   : > { %6127 = vmatprep.subr.mxu0 %v512_v59  ;;  %v1196_v32 = vsel %vm1184_vm3, %v6708_v19, %v934_v61  ;;  %v1195_v33 = vsel %vm1184_vm3, %v6712_v22, %v932_v30 }
  0xe1   : > { %6128 = vmatpush3.msra.mxu0 %v512_v59 }
  0xe2   : > { %3527 = vmatprep.subr.mxu0 %v8834_v18 }
  0xe3   : > { %v1111_v12 = vpop.permute.xlu1 %1110  ;;  %v1109_v20 = vpop.permute.xlu0 %1108 }
  0xe4   : > { %v7148_v46 = vsel %vm1217_vm4, %v1196_v32, %v1111_v12  ;;  %v7151_v48 = vsel %vm1217_vm4, %v1195_v33, %v1109_v20 }
  0xe5   : > { %5997 = vmatprep.mubr.msk.f32.mxu0 %vm1278_vm5, %v7151_v48 }
  0xe6   : > { %5998 = vmatmul.mubr.msk.f32.gmra.mxu0 %vm1278_vm5, %v7148_v46 }
  0xe7   : > { %v938_v49 = vpop.permute.xlu1 %937  ;;  %v936_v55 = vpop.permute.xlu0 %935 }
  0xe8   : > { %v1198_v19 = vsel %vm1184_vm3, %v6740_v42, %v938_v49  ;;  %v1197_v22 = vsel %vm1184_vm3, %v6737_v40, %v936_v55 }
  0xeb   : > { %v1115_v60 = vpop.permute.xlu1 %1114  ;;  %v1113_v62 = vpop.permute.xlu0 %1112 }
  0xec   : > { %v7162_v4 = vsel %vm1217_vm4, %v1198_v19, %v1115_v60  ;;  %v7165_v39 = vsel %vm1217_vm4, %v1197_v22, %v1113_v62 }
  0xed   : > { %6000 = vmatprep.mubr.msk.f32.mxu0 %vm1278_vm5, %v7165_v39 }
  0xee   : > { %6001 = vmatmul.mubr.msk.f32.gmra.mxu0 %vm1278_vm5, %v7162_v4 }
  0xef   : > { %v942_v41 = vpop.permute.xlu1 %941  ;;  %v940_v7 = vpop.permute.xlu0 %939 }
  0xf0   : > { %v1200_v42 = vsel %vm1184_vm3, %v6763_v63, %v942_v41  ;;  %v1199_v40 = vsel %vm1184_vm3, %v6767_v1, %v940_v7 }
  0xf3   : > { %v1119_v14 = vpop.permute.xlu1 %1118  ;;  %v1117_v15 = vpop.permute.xlu0 %1116 }
  0xf4   : > { %v7176_v16 = vsel %vm1217_vm4, %v1200_v42, %v1119_v14  ;;  %v7179_v17 = vsel %vm1217_vm4, %v1199_v40, %v1117_v15 }
  0xf5   : > { %6003 = vmatprep.mubr.msk.f32.mxu0 %vm1278_vm5, %v7179_v17 }
  0xf6   : > { %6004 = vmatmul.mubr.msk.f32.gmra.mxu0 %vm1278_vm5, %v7176_v16 }
  0xf7   : > { %v946_v25 = vpop.permute.xlu1 %945  ;;  %v944_v53 = vpop.permute.xlu0 %943 }
  0xf8   : > { %v1202_v63 = vsel %vm1184_vm3, %v6779_v13, %v946_v25  ;;  %v1201_v1 = vsel %vm1184_vm3, %v6786_v21, %v944_v53 }
  0xfb   : > { %v1123_v27 = vpop.permute.xlu1 %1122  ;;  %v1121_v59 = vpop.permute.xlu0 %1120 }
  0xfc   : > { %v7190_v61 = vsel %vm1217_vm4, %v1202_v63, %v1123_v27  ;;  %v7193_v30 = vsel %vm1217_vm4, %v1201_v1, %v1121_v59 }
  0xfd   : > { %6006 = vmatprep.mubr.msk.f32.mxu0 %vm1278_vm5, %v7193_v30 }
  0xfe   : > { %6007 = vmatmul.mubr.msk.f32.gmra.mxu0 %vm1278_vm5, %v7190_v61 }
  0xff   : > { %v950_v32 = vpop.permute.xlu1 %949  ;;  %v948_v33 = vpop.permute.xlu0 %947 }
 0x100   : > { %v1204_v13 = vsel %vm1184_vm3, %v6803_v37, %v950_v32  ;;  %v1203_v21 = vsel %vm1184_vm3, %v6807_v43, %v948_v33 }
 0x103   : > { %v1127_v12 = vpop.permute.xlu1 %1126  ;;  %v1125_v20 = vpop.permute.xlu0 %1124 }
 0x104   : > { %v7204_v49 = vsel %vm1217_vm4, %v1204_v13, %v1127_v12  ;;  %v7207_v55 = vsel %vm1217_vm4, %v1203_v21, %v1125_v20 }
 0x105   : > { %6009 = vmatprep.mubr.msk.f32.mxu0 %vm1278_vm5, %v7207_v55 }
 0x106   : > { %6010 = vmatmul.mubr.msk.f32.gmra.mxu0 %vm1278_vm5, %v7204_v49 }
 0x107   : > { %v954_v19 = vpop.permute.xlu1 %953  ;;  %v952_v22 = vpop.permute.xlu0 %951 }
 0x108   : > { %v1206_v37 = vsel %vm1184_vm3, %v6832_v0, %v954_v19  ;;  %v1205_v43 = vsel %vm1184_vm3, %v6836_v3, %v952_v22 }
 0x10b   : > { %v1131_v60 = vpop.permute.xlu1 %1130  ;;  %v1129_v62 = vpop.permute.xlu0 %1128 }
 0x10c   : > { %v7218_v41 = vsel %vm1217_vm4, %v1206_v37, %v1131_v60  ;;  %v7221_v7 = vsel %vm1217_vm4, %v1205_v43, %v1129_v62 }
 0x10d   : > { %6012 = vmatprep.mubr.msk.f32.mxu0 %vm1278_vm5, %v7221_v7 }
 0x10e   : > { %6013 = vmatmul.mubr.msk.f32.gmra.mxu0 %vm1278_vm5, %v7218_v41 }
 0x10f   : > { %v958_v42 = vpop.permute.xlu1 %957  ;;  %v956_v40 = vpop.permute.xlu0 %955 }
 0x110   : > { %v1208_v0 = vsel %vm1184_vm3, %v6851_v24, %v958_v42  ;;  %v1207_v3 = vsel %vm1184_vm3, %v6855_v26, %v956_v40 }
 0x113   : > { %v1135_v14 = vpop.permute.xlu1 %1134  ;;  %v1133_v15 = vpop.permute.xlu0 %1132 }
 0x114   : > { %v7232_v25 = vsel %vm1217_vm4, %v1208_v0, %v1135_v14  ;;  %v7235_v53 = vsel %vm1217_vm4, %v1207_v3, %v1133_v15 }
 0x115   : > { %6015 = vmatprep.mubr.msk.f32.mxu0 %vm1278_vm5, %v7235_v53 }
 0x116   : > { %6016 = vmatmul.mubr.msk.f32.gmra.mxu0 %vm1278_vm5, %v7232_v25 }
 0x117   : > { %v962_v63 = vpop.permute.xlu1 %961  ;;  %v960_v1 = vpop.permute.xlu0 %959 }
 0x118   : > { %v1210_v24 = vsel %vm1184_vm3, %v6874_v50, %v962_v63  ;;  %v1209_v26 = vsel %vm1184_vm3, %v6878_v52, %v960_v1 }
 0x11b   : > { %v1139_v27 = vpop.permute.xlu1 %1138  ;;  %v1137_v59 = vpop.permute.xlu0 %1136 }
 0x11c   : > { %v7246_v32 = vsel %vm1217_vm4, %v1210_v24, %v1139_v27  ;;  %v7249_v33 = vsel %vm1217_vm4, %v1209_v26, %v1137_v59 }
 0x11d   : > { %6018 = vmatprep.mubr.msk.f32.mxu0 %vm1278_vm5, %v7249_v33 }
 0x11e   : > { %6019 = vmatmul.mubr.msk.f32.gmra.mxu0 %vm1278_vm5, %v7246_v32 }
 0x11f   : > { %v966_v13 = vpop.permute.xlu1 %965  ;;  %v964_v21 = vpop.permute.xlu0 %963 }
 0x120   : > { %v1212_v50 = vsel %vm1184_vm3, %v6890_v2, %v966_v13  ;;  %v1211_v52 = vsel %vm1184_vm3, %v6897_v11, %v964_v21 }
 0x123   : > { %v1143_v12 = vpop.permute.xlu1 %1142  ;;  %v1141_v20 = vpop.permute.xlu0 %1140 }
 0x124   : > { %v7260_v19 = vsel %vm1217_vm4, %v1212_v50, %v1143_v12  ;;  %v7263_v22 = vsel %vm1217_vm4, %v1211_v52, %v1141_v20 }
 0x125   : > { %6021 = vmatprep.mubr.msk.f32.mxu0 %vm1278_vm5, %v7263_v22 }
 0x126   : > { %6022 = vmatmul.mubr.msk.f32.gmra.mxu0 %vm1278_vm5, %v7260_v19 }
 0x127   : > { %v970_v37 = vpop.permute.xlu1 %969  ;;  %v968_v43 = vpop.permute.xlu0 %967 }
 0x128   : > { %v1214_v2 = vsel %vm1184_vm3, %v6916_v36, %v970_v37  ;;  %v1213_v11 = vsel %vm1184_vm3, %v6920_v44, %v968_v43 }
 0x12b   : > { %v1147_v60 = vpop.permute.xlu1 %1146  ;;  %v1145_v62 = vpop.permute.xlu0 %1144 }
 0x12c   : > { %v7274_v42 = vsel %vm1217_vm4, %v1214_v2, %v1147_v60  ;;  %v7277_v40 = vsel %vm1217_vm4, %v1213_v11, %v1145_v62 }
 0x12d   : > { %6024 = vmatprep.mubr.msk.f32.mxu0 %vm1278_vm5, %v7277_v40 }
 0x12e   : > { %6025 = vmatmul.mubr.msk.f32.gmra.mxu0 %vm1278_vm5, %v7274_v42 }
 0x12f   : > { %v974_v0 = vpop.permute.xlu1 %973  ;;  %v972_v3 = vpop.permute.xlu0 %971 }
 0x130   : > { %v1216_v36 = vsel %vm1184_vm3, %v6944_v6, %v974_v0  ;;  %v1215_v44 = vsel %vm1184_vm3, %v6948_v8, %v972_v3 }
 0x133   : > { %v1151_v14 = vpop.permute.xlu1 %1150  ;;  %v1149_v15 = vpop.permute.xlu0 %1148 }
 0x134   : > { %v7288_v63 = vsel %vm1217_vm4, %v1216_v36, %v1151_v14  ;;  %v7291_v1 = vsel %vm1217_vm4, %v1215_v44, %v1149_v15  ;;  %v6410_v15 = vmov 1983009808  }
 0x135   : > { %6027 = vmatprep.mubr.msk.f32.mxu0 %vm1278_vm5, %v7291_v1 }
 0x136   : > { %6028 = vmatmul.mubr.msk.f32.gmra.mxu0 %vm1278_vm5, %v7288_v63 }
 0x137   : > { %v1260_v24 = vpop.permute.xlu1 %1259  ;;  %v1258_v26 = vpop.permute.xlu0 %1257 }
 0x138   : > { %v1274_v6 = vsel %vm1184_vm3, %v6991_v54, %v1258_v26  ;;  %v1275_v50 = vsel %vm1184_vm3, %v6985_v51, %v1260_v24  ;;  %v7500_v24 = vld [vmem:[%s8809_s3] ss:$0 sm:$0xff] }
 0x13b   : > { %v6296_v8 = vpop.permute.xlu1 %6295  ;;  %v1269_v27 = vpop.permute.xlu0 %1268 }
 0x13c   : > { %v7300_v59 = vsel %vm1217_vm4, %v1274_v6, %v1269_v27  ;;  %v6298_v13 = vunpack.i.h.bf16 %v6296_v8  ;;  %v6297_v21 = vunpack.i.l.bf16 %v6296_v8 }
 0x13d   : > { %6030 = vmatprep.mubr.msk.f32.mxu0 %vm1278_vm5, %v7300_v59 }
 0x13e   : > { %v1185_v54 = vsel %vm1184_vm3, %v6975_v38, %v6297_v21  ;;  %v1186_v2 = vsel %vm1184_vm3, %v6959_v23, %v6298_v13  ;;  %v558_v38 = vld [vmem:[%s8810_s4 + $0x108] sm:$0xff] }
 0x13f   : > { %v6301_v52 = vpop.permute.xlu1 %6300  ;;  %v1271_v12 = vpop.permute.xlu0 %1270 }
 0x140   : > { %v6303_v20 = vunpack.i.h.bf16 %v6301_v52  ;;  %v6302_v37 = vunpack.i.l.bf16 %v6301_v52  ;;  %v7307_v43 = vsel %vm1217_vm4, %v1275_v50, %v1271_v12 }
 0x141   : > { %6031 = vmatmul.mubr.msk.f32.gmra.mxu0 %vm1278_vm5, %v7307_v43 }
 0x142   : > { %6129 = vmatprep.mubr.msk.f32.mxu0 %vm1278_vm5, %v7081_v35  ;;  %v1218_v51 = vsel %vm1217_vm4, %v1185_v54, %v6302_v37  ;;  %v7319_v11 = vsel %vm1217_vm4, %v1186_v2, %v6303_v20 }
 0x143   : > { %6057 = vmatprep.mubr.msk.f32.mxu1 %vm1278_vm5, %v1218_v51 }
 0x144   : > { %6058 = vmatmul.mubr.msk.f32.vlgmr.msra.gmra.mxu1 %vm1278_vm5, %v7319_v11 }
 0x145   : > { %6060 = vmatprep.mubr.msk.f32.mxu1 %vm1278_vm5, %v7023_v29  ;;  %6130 = vmatmul.mubr.msk.f32.vlgmr.msra.gmra.mxu0 %vm1278_vm5, %v7078_v34 }
 0x146   : > { %6132 = vmatprep.mubr.msk.f32.mxu0 %vm1278_vm5, %v7107_v5 }
 0x148   : > { %6061 = vmatmul.mubr.msk.f32.gmra.mxu1 %vm1278_vm5, %v7042_v57 }
 0x149   : > { %6063 = vmatprep.mubr.msk.f32.mxu1 %vm1278_vm5, %v7081_v35  ;;  %6133 = vmatmul.mubr.msk.f32.gmra.mxu0 %vm1278_vm5, %v7104_v9 }
 0x14a   : > { %6135 = vmatprep.mubr.msk.f32.mxu0 %vm1278_vm5, %v7133_v28 }
 0x14c   : > { %6064 = vmatmul.mubr.msk.f32.gmra.mxu1 %vm1278_vm5, %v7078_v34 }
 0x14d   : > { %6066 = vmatprep.mubr.msk.f32.mxu1 %vm1278_vm5, %v7107_v5  ;;  %6136 = vmatmul.mubr.msk.f32.gmra.mxu0 %vm1278_vm5, %v7130_v47 }
 0x14e   : > { %6138 = vmatprep.mubr.msk.f32.mxu0 %vm1278_vm5, %v7151_v48 }
 0x150   : > { %6067 = vmatmul.mubr.msk.f32.gmra.mxu1 %vm1278_vm5, %v7104_v9 }
 0x151   : > { %6069 = vmatprep.mubr.msk.f32.mxu1 %vm1278_vm5, %v7133_v28  ;;  %6139 = vmatmul.mubr.msk.f32.gmra.mxu0 %vm1278_vm5, %v7148_v46 }
 0x152   : > { %6141 = vmatprep.mubr.msk.f32.mxu0 %vm1278_vm5, %v7165_v39 }
 0x154   : > { %6070 = vmatmul.mubr.msk.f32.gmra.mxu1 %vm1278_vm5, %v7130_v47 }
 0x155   : > { %6072 = vmatprep.mubr.msk.f32.mxu1 %vm1278_vm5, %v7151_v48  ;;  %6142 = vmatmul.mubr.msk.f32.gmra.mxu0 %vm1278_vm5, %v7162_v4 }
 0x156   : > { %6144 = vmatprep.mubr.msk.f32.mxu0 %vm1278_vm5, %v7179_v17 }
 0x158   : > { %6073 = vmatmul.mubr.msk.f32.gmra.mxu1 %vm1278_vm5, %v7148_v46 }
 0x159   : > { %6075 = vmatprep.mubr.msk.f32.mxu1 %vm1278_vm5, %v7165_v39  ;;  %6145 = vmatmul.mubr.msk.f32.gmra.mxu0 %vm1278_vm5, %v7176_v16 }
 0x15a   : > { %6147 = vmatprep.mubr.msk.f32.mxu0 %vm1278_vm5, %v7193_v30 }
 0x15c   : > { %6076 = vmatmul.mubr.msk.f32.gmra.mxu1 %vm1278_vm5, %v7162_v4 }
 0x15d   : > { %6078 = vmatprep.mubr.msk.f32.mxu1 %vm1278_vm5, %v7179_v17  ;;  %6148 = vmatmul.mubr.msk.f32.gmra.mxu0 %vm1278_vm5, %v7190_v61 }
 0x15e   : > { %6150 = vmatprep.mubr.msk.f32.mxu0 %vm1278_vm5, %v7207_v55 }
 0x160   : > { %6079 = vmatmul.mubr.msk.f32.gmra.mxu1 %vm1278_vm5, %v7176_v16 }
 0x161   : > { %6081 = vmatprep.mubr.msk.f32.mxu1 %vm1278_vm5, %v7193_v30  ;;  %6151 = vmatmul.mubr.msk.f32.gmra.mxu0 %vm1278_vm5, %v7204_v49 }
 0x162   : > { %6153 = vmatprep.mubr.msk.f32.mxu0 %vm1278_vm5, %v7221_v7 }
 0x164   : > { %6082 = vmatmul.mubr.msk.f32.gmra.mxu1 %vm1278_vm5, %v7190_v61 }
 0x165   : > { %6084 = vmatprep.mubr.msk.f32.mxu1 %vm1278_vm5, %v7207_v55  ;;  %6154 = vmatmul.mubr.msk.f32.gmra.mxu0 %vm1278_vm5, %v7218_v41 }
 0x166   : > { %6156 = vmatprep.mubr.msk.f32.mxu0 %vm1278_vm5, %v7235_v53 }
 0x168   : > { %6085 = vmatmul.mubr.msk.f32.gmra.mxu1 %vm1278_vm5, %v7204_v49 }
 0x169   : > { %6087 = vmatprep.mubr.msk.f32.mxu1 %vm1278_vm5, %v7221_v7  ;;  %6157 = vmatmul.mubr.msk.f32.gmra.mxu0 %vm1278_vm5, %v7232_v25 }
 0x16a   : > { %6159 = vmatprep.mubr.msk.f32.mxu0 %vm1278_vm5, %v7249_v33 }
 0x16c   : > { %6088 = vmatmul.mubr.msk.f32.gmra.mxu1 %vm1278_vm5, %v7218_v41 }
 0x16d   : > { %6090 = vmatprep.mubr.msk.f32.mxu1 %vm1278_vm5, %v7235_v53  ;;  %6160 = vmatmul.mubr.msk.f32.gmra.mxu0 %vm1278_vm5, %v7246_v32 }
 0x16e   : > { %6162 = vmatprep.mubr.msk.f32.mxu0 %vm1278_vm5, %v7263_v22 }
 0x170   : > { %6091 = vmatmul.mubr.msk.f32.gmra.mxu1 %vm1278_vm5, %v7232_v25 }
 0x171   : > { %6093 = vmatprep.mubr.msk.f32.mxu1 %vm1278_vm5, %v7249_v33  ;;  %6163 = vmatmul.mubr.msk.f32.gmra.mxu0 %vm1278_vm5, %v7260_v19 }
 0x172   : > { %6165 = vmatprep.mubr.msk.f32.mxu0 %vm1278_vm5, %v7277_v40 }
 0x174   : > { %6094 = vmatmul.mubr.msk.f32.gmra.mxu1 %vm1278_vm5, %v7246_v32 }
 0x175   : > { %6096 = vmatprep.mubr.msk.f32.mxu1 %vm1278_vm5, %v7263_v22  ;;  %6166 = vmatmul.mubr.msk.f32.gmra.mxu0 %vm1278_vm5, %v7274_v42 }
 0x176   : > { %6168 = vmatprep.mubr.msk.f32.mxu0 %vm1278_vm5, %v7291_v1 }
 0x178   : > { %6097 = vmatmul.mubr.msk.f32.gmra.mxu1 %vm1278_vm5, %v7260_v19 }
 0x179   : > { %6099 = vmatprep.mubr.msk.f32.mxu1 %vm1278_vm5, %v7277_v40  ;;  %6169 = vmatmul.mubr.msk.f32.gmra.mxu0 %vm1278_vm5, %v7288_v63 }
 0x17a   : > { %6171 = vmatprep.mubr.msk.f32.mxu0 %vm1278_vm5, %v7300_v59 }
 0x17c   : > { %6100 = vmatmul.mubr.msk.f32.gmra.mxu1 %vm1278_vm5, %v7274_v42 }
 0x17d   : > { %6102 = vmatprep.mubr.msk.f32.mxu1 %vm1278_vm5, %v7291_v1  ;;  %6172 = vmatmul.mubr.msk.f32.gmra.mxu0 %vm1278_vm5, %v7307_v43  ;;  %v2194_v1 = vlaneseq }
 0x17e   : > { %6174 = vmatprep.mubr.msk.f32.mxu0 %vm1278_vm5, %v1218_v51 }
 0x17f   : > { %v7503_v12 = vshrl.u32 %v2194_v1, 7 }
 0x180   : > { %6103 = vmatmul.mubr.msk.f32.gmra.mxu1 %vm1278_vm5, %v7288_v63  ;;  %v2192_v63 = vunpack.c.l.s4 %v6410_v15 }
 0x181   : > { %6175 = vmatmul.mubr.msk.f32.gmra.mxu0 %vm1278_vm5, %v7319_v11  ;;  %8856 = vst [vmem:[#allocation13_spill] sm:$0xff] %v7503_v12 }
 0x182   : > { %v2193_v52 = vunpack.c.0.s8 %v2192_v63 }
 0x186   : > { %v5987_v23 = vpop.f32.mrf.mxu0 }
 0x188   : > { %v1441_v29 = vpop.f32.mrf.mxu0 }
 0x18f   : > { %v5990_v57 = vpop.f32.mrf.mxu0 }
 0x191   : > { %v1451_v34 = vpop.f32.mrf.mxu0 }
 0x196   : > { %v5993_v35 = vpop.f32.mrf.mxu0 }
 0x198   : > { %v1461_v9 = vpop.f32.mrf.mxu0 }
 0x19e   : > { %v7445_v5 = vpop.f32.mrf.mxu0 }
 0x1a0   : > { %v7447_v47 = vpop.f32.mrf.mxu0 }
 0x1a6   : > { %v7449_v28 = vpop.f32.mrf.mxu0 }
 0x1a8   : > { %v7451_v46 = vpop.f32.mrf.mxu0 }
 0x1ae   : > { %v7453_v48 = vpop.f32.mrf.mxu0 }
 0x1b0   : > { %v7455_v4 = vpop.f32.mrf.mxu0 }
 0x1b6   : > { %v7457_v39 = vpop.f32.mrf.mxu0 }
 0x1b8   : > { %v7459_v16 = vpop.f32.mrf.mxu0 }
 0x1be   : > { %v7461_v17 = vpop.f32.mrf.mxu0 }
 0x1c0   : > { %v7463_v61 = vpop.f32.mrf.mxu0 }
 0x1c6   : > { %v7465_v30 = vpop.f32.mrf.mxu0 }
 0x1c8   : > { %v7467_v49 = vpop.f32.mrf.mxu0 }
 0x1ce   : > { %v7469_v55 = vpop.f32.mrf.mxu0 }
 0x1d0   : > { %v7471_v41 = vpop.f32.mrf.mxu0 }
 0x1d6   : > { %v7473_v7 = vpop.f32.mrf.mxu0 }
 0x1d8   : > { %v7475_v25 = vpop.f32.mrf.mxu0 }
 0x1de   : > { %v7477_v53 = vpop.f32.mrf.mxu0 }
 0x1e0   : > { %v7479_v32 = vpop.f32.mrf.mxu0 }
 0x1e6   : > { %v7481_v33 = vpop.f32.mrf.mxu0 }
 0x1e8   : > { %v7483_v19 = vpop.f32.mrf.mxu0 }
 0x1ee   : > { %v7485_v22 = vpop.f32.mrf.mxu0 }
 0x1f0   : > { %v7487_v60 = vpop.f32.mrf.mxu0 }
 0x1f6   : > { %v7489_v62 = vpop.f32.mrf.mxu0 }
 0x1f8   : > { %v7491_v42 = vpop.f32.mrf.mxu0 }
 0x201   : > { %v7493_v40 = vpop.f32.mrf.mxu0 }
 0x203   : > { %v7495_v0 = vpop.f32.mrf.mxu0 }
 0x204   : > { %v6059_v3 = vpop.f32.mrf.mxu1 }
 0x205   : > { %v1678_v36 = vadd.f32 %v6059_v3, %v5987_v23  ;;  %v6131_v44 = vpop.f32.mrf.mxu0 }
 0x206   : > { %v1672_v14 = vpop.f32.mrf.mxu1 }
 0x207   : > { %v2057_v26 = vadd.f32 %v6131_v44, %v1678_v36  ;;  %v1673_v6 = vadd.f32 %v1672_v14, %v1441_v29  ;;  %v1897_v8 = vpop.f32.mrf.mxu0 }
 0x208   : > { %v6062_v27 = vpop.f32.mrf.mxu1 }
 0x209   : > { %v2056_v59 = vadd.f32 %v1897_v8, %v1673_v6  ;;  %v1688_v13 = vadd.f32 %v6062_v27, %v5990_v57  ;;  %v6134_v21 = vpop.f32.mrf.mxu0  ;;  %v2095_v50 = vadd.f32 %v7500_v24, %v2057_v26  ;;  %v7508_v57 = vsub.s32 %v2193_v52, %v7503_v12 }
 0x20a   : > { %v1682_v20 = vpop.f32.mrf.mxu1 }
 0x20b   : > { %v2059_v37 = vadd.f32 %v6134_v21, %v1688_v13  ;;  %v1683_v43 = vadd.f32 %v1682_v20, %v1451_v34  ;;  %v1907_v54 = vpop.f32.mrf.mxu0  ;;  %v2094_v51 = vadd.f32 %v7500_v24, %v2056_v59  ;;  %v2127_v36 = vmax.f32 %v2095_v50, 0.0 }
 0x20c   : > { %v6065_v2 = vpop.f32.mrf.mxu1 }
 0x20d   : > { %v2097_v11 = vadd.f32 %v7500_v24, %v2059_v37  ;;  %v2058_v23 = vadd.f32 %v1907_v54, %v1683_v43  ;;  %v1698_v29 = vadd.f32 %v6065_v2, %v5993_v35  ;;  %v6137_v3 = vpop.f32.mrf.mxu0  ;;  %v2126_v6 = vmax.f32 %v2094_v51, 0.0 }
 0x20e   : > { %v1692_v44 = vpop.f32.mrf.mxu1  ;;  %v7515_v54 = vsub.s32 0, %v7503_v12 }
 0x20f   : > { %v2129_v14 = vmax.f32 %v2097_v11, 0.0  ;;  %v2096_v15 = vadd.f32 %v7500_v24, %v2058_v23  ;;  %v2061_v63 = vadd.f32 %v6137_v3, %v1698_v29  ;;  %v1693_v1 = vadd.f32 %v1692_v44, %v1461_v9  ;;  %v1917_v34 = vpop.f32.mrf.mxu0 }
 0x210   : > { %v6068_v26 = vpop.f32.mrf.mxu1 }
 0x211   : > { %v2159_v8 = vmax.f32 %v2127_v36, %v2129_v14  ;;  %v2128_v27 = vmax.f32 %v2096_v15, 0.0  ;;  %v2060_v59 = vadd.f32 %v1917_v34, %v1693_v1  ;;  %v6140_v13 = vpop.f32.mrf.mxu0  ;;  %v2099_v35 = vadd.f32 %v7500_v24, %v2061_v63 }
 0x212   : > { %v1708_v21 = vadd.f32 %v6068_v26, %v7445_v5  ;;  %v1702_v50 = vpop.f32.mrf.mxu1 }
 0x213   : > { %v2207_v52 = vcombine.high %v2159_v8, %v2159_v8  ;;  %v2214_v20 = vrot.slane %v2159_v8, %v7508_v57  ;;  %v2158_v37 = vmax.f32 %v2126_v6, %v2128_v27  ;;  %v1927_v43 = vpop.f32.mrf.mxu0  ;;  %v7518_v9 = vadd.f32 %v7500_v24, %v2060_v59  ;;  %v564_v27 = vld [vmem:[%s8810_s4 + $0x138] sm:$0xff]  ;;  %v563_v59 = vld [vmem:[%s8810_s4 + $0x130] sm:$0xff] }
 0x214   : > { %v2063_v2 = vadd.f32 %v6140_v13, %v1708_v21  ;;  %v1703_v51 = vadd.f32 %v1702_v50, %v7447_v47  ;;  %v6071_v11 = vpop.f32.mrf.mxu1  ;;  %v2131_v14 = vmax.f32 %v2099_v35, 0.0  ;;  %3316 = vmatpush1.msra.mxu1 %v564_v27 }
 0x215   : > { %v2221_v23 = vrot.slane %v2207_v52, %v7508_v57  ;;  %v2222_v29 = vcombine.high %v2214_v20, %v2214_v20  ;;  %v5414_v5 = vrot.slane %v2214_v20, 9  ;;  %v2190_v3 = vcombine.high %v2158_v37, %v2158_v37  ;;  %v7522_v36 = vpop.f32.mrf.mxu0  ;;  %3317 = vmatprep.subr.mxu1 %v8834_v18 }
 0x216   : > { %v2197_v44 = vrot.slane %v2158_v37, %v7508_v57  ;;  %v2101_v63 = vadd.f32 %v7500_v24, %v2063_v2  ;;  %v1712_v1 = vpop.f32.mrf.mxu1  ;;  %v2062_v10 = vadd.f32 %v1927_v43, %v1703_v51  ;;  %3318 = vmatpush1.msra.mxu1 %v563_v59 }
 0x217   : > { %v2223_v34 = vcombine.high %v2221_v23, %v2221_v23  ;;  %v5415_v26 = vrot.slane %v2222_v29, 9  ;;  %v5416_v47 = vrot.slane %v2221_v23, 9  ;;  %v7527_v6 = vmax.f32 %v2214_v20, %v5414_v5  ;;  %v7529_v8 = vpop.f32.mrf.mxu0  ;;  %v588_v20 = vld [vmem:[%s8810_s4 + $0x1f8] sm:$0xff]  ;;  %3319 = vmatprep.subr.mxu1 %v8834_v18 }
 0x218   : > { %v2204_v13 = vrot.slane %v2190_v3, %v7508_v57  ;;  %v2205_v35 = vcombine.high %v2197_v44, %v2197_v44  ;;  %v5410_v21 = vrot.slane %v2197_v44, 9  ;;  %v2133_v50 = vmax.f32 %v2101_v63, 0.0  ;;  %v7538_v52 = vpop.f32.mrf.mxu1  ;;  %v562_v3 = vld [vmem:[%s8810_s4 + $0x128] sm:$0xff]  ;;  %3528 = vmatpush1.msra.mxu0 %v588_v20  ;;  %v587_v63 = vld [vmem:[%s8810_s4 + $0x1f0] sm:$0xff] }
 0x219   : > { %v5417_v37 = vrot.slane %v2223_v34, 9  ;;  %v7543_v2 = vmax.f32 %v2222_v29, %v5415_v26  ;;  %v7545_v5 = vmax.f32 %v2221_v23, %v5416_v47  ;;  %v7547_v31 = vpop.f32.mrf.mxu0  ;;  %3529 = vmatprep.subr.mxu0 %v8834_v18  ;;  %3320 = vmatpush1.msra.mxu1 %v562_v3  ;;  %v1718_v47 = vadd.f32 %v6071_v11, %v7449_v28 }
 0x21a   : > { %v2206_v27 = vcombine.high %v2204_v13, %v2204_v13  ;;  %v5411_v56 = vrot.slane %v2205_v35, 9  ;;  %v5412_v29 = vrot.slane %v2204_v13, 9  ;;  %v2718_v26 = vmax.f32 %v2197_v44, %v5410_v21  ;;  %v7556_v23 = vpop.f32.mrf.mxu1  ;;  %v561_v44 = vld [vmem:[%s8810_s4 + $0x120] sm:$0xff]  ;;  %3530 = vmatpush1.msra.mxu0 %v587_v63  ;;  %3321 = vmatprep.subr.mxu1 %v8834_v18 }
 0x21b   : > { %v7559_v43 = vmax.f32 %v2223_v34, %v5417_v37  ;;  %v2161_v20 = vmax.f32 %v2131_v14, %v2133_v50  ;;  %v7565_v58 = vpop.f32.mrf.mxu0  ;;  %v2100_v50 = vadd.f32 %v7500_v24, %v2062_v10  ;;  %v1713_v63 = vadd.f32 %v1712_v1, %v7451_v46  ;;  %3322 = vmatpush1.msra.mxu1 %v561_v44  ;;  %v586_v10 = vld [vmem:[%s8810_s4 + $0x1e8] sm:$0xff] }
 0x21c   : > { %v5413_v59 = vrot.slane %v2206_v27, 9  ;;  %v2719_v21 = vmax.f32 %v2205_v35, %v5411_v56  ;;  %v2720_v15 = vmax.f32 %v2204_v13, %v5412_v29  ;;  %v2849_v34 = vrot.slane %v2718_v26, %v7515_v54  ;;  %v7572_v37 = vpop.f32.mrf.mxu1  ;;  %v560_v56 = vld [vmem:[%s8810_s4 + $0x118] sm:$0xff]  ;;  %3323 = vmatprep.subr.mxu1 %v8834_v18  ;;  %3531 = vmatprep.subr.mxu0 %v8834_v18 }
 0x21d   : > { %v2241_v51 = vcombine.high %v2161_v20, %v2161_v20  ;;  %v2248_v14 = vrot.slane %v2161_v20, %v7508_v57  ;;  %v7586_v29 = vpop.f32.mrf.mxu0  ;;  %v2065_v44 = vadd.f32 %v7522_v36, %v1718_v47  ;;  %3324 = vmatpush1.msra.mxu1 %v560_v56  ;;  %3532 = vmatpush1.msra.mxu0 %v586_v10  ;;  %v585_v36 = vld [vmem:[%s8810_s4 + $0x1e0] sm:$0xff] }
 0x21e   : > { %v7581_v13 = vmax.f32 %v2206_v27, %v5413_v59  ;;  %v2853_v35 = vrot.slane %v2719_v21, %v7515_v54  ;;  %v2857_v3 = vrot.slane %v2720_v15, %v7515_v54  ;;  %v1732_v26 = vpop.f32.mrf.mxu1  ;;  %v2132_v27 = vmax.f32 %v2100_v50, 0.0  ;;  %v559_v15 = vld [vmem:[%s8810_s4 + $0x110] sm:$0xff]  ;;  %3325 = vmatprep.subr.mxu1 %v8834_v18 }
 0x21f   : > { %v2255_v28 = vrot.slane %v2241_v51, %v7508_v57  ;;  %v2256_v11 = vcombine.high %v2248_v14, %v2248_v14  ;;  %v5422_v20 = vrot.slane %v2248_v14, 9  ;;  %v2064_v51 = vadd.f32 %v7529_v8, %v1713_v63  ;;  %v1957_v63 = vpop.f32.mrf.mxu0  ;;  %3326 = vmatpush1.msra.mxu1 %v559_v15 }
 0x220   : > { %v3103_v1 = vsel %vm3102_vm6, %v2853_v35, %v2849_v34  ;;  %v8857_v34 = vmax.f32 %v7518_v9, 0.0  ;;  %v7619_v35 = vadd.f32 %v7500_v24, %v2065_v44  ;;  %v6080_v46 = vpop.f32.mrf.mxu1  ;;  %v557_v9 = vld [vmem:[%s8810_s4 + $0x100] sm:$0xff] }
 0x221   : > { %v2257_v21 = vcombine.high %v2255_v28, %v2255_v28  ;;  %v5423_v50 = vrot.slane %v2256_v11, 9  ;;  %v5424_v12 = vrot.slane %v2255_v28, 9  ;;  %v7612_v8 = vsel %vm3104_vm7, %v2857_v3, %v3103_v1 }
 0x222   : > { %v7614_v47 = vmax.f32 %v2248_v14, %v5422_v20  ;;  %v2160_v56 = vmax.f32 %v8857_v34, %v2132_v27  ;;  %v7624_v18 = vadd.f32 %v7500_v24, %v2064_v51  ;;  %v1728_v3 = vadd.f32 %v7538_v52, %v7453_v48  ;;  %v584_v20 = vld [vmem:[%s8810_s4 + $0x1d8] sm:$0xff] }
 0x223   : > { %v5425_v59 = vrot.slane %v2257_v21, 9  ;;  %v7621_v10 = vmax.f32 %v2256_v11, %v5423_v50  ;;  %v8858_v14 = vmov 0.0   ;;  %v7636_v11 = vmax.f32 %v2255_v28, %v5424_v12  ;;  %v556_v12 = vld [vmem:[%s8810_s4 + $0xf8] sm:$0xff]  ;;  %v1742_v50 = vpop.f32.mrf.mxu1 }
 0x224   : > { %3327 = vmatprep.subr.mxu1 %v8858_v14  ;;  %3533 = vmatprep.subr.mxu0 %v8858_v14  ;;  %v2224_v27 = vcombine.high %v2160_v56, %v2160_v56  ;;  %v2231_v15 = vrot.slane %v2160_v56, %v7508_v57  ;;  %v2135_v44 = vmax.f32 %v7619_v35, 0.0  ;;  %v1738_v34 = vadd.f32 %v7572_v37, %v7457_v39 }
 0x225   : > { %3328 = vmatpush1.msra.mxu1 %v558_v38  ;;  %3534 = vmatpush1.msra.mxu0 %v585_v36  ;;  %v7639_v48 = vmax.f32 %v2257_v21, %v5425_v59  ;;  %v2067_v59 = vadd.f32 %v7547_v31, %v1728_v3  ;;  %v6152_v21 = vpop.f32.mrf.mxu0  ;;  %v1723_v36 = vadd.f32 %v7556_v23, %v7455_v4  ;;  %v555_v31 = vld [vmem:[%s8810_s4 + $0xf0] sm:$0xff]  ;;  %v6083_v1 = vpop.f32.mrf.mxu1 }
 0x226   : > { %3329 = vmatprep.subr.mxu1 %v8858_v14  ;;  %3535 = vmatprep.subr.mxu0 %v8858_v14  ;;  %v2238_v38 = vrot.slane %v2224_v27, %v7508_v57  ;;  %v2239_v28 = vcombine.high %v2231_v15, %v2231_v15  ;;  %v5418_v51 = vrot.slane %v2231_v15, 9  ;;  %v1733_v56 = vadd.f32 %v1732_v26, %v7459_v16  ;;  %v583_v3 = vld [vmem:[%s8810_s4 + $0x1d0] sm:$0xff]  ;;  %v554_v26 = vld [vmem:[%s8810_s4 + $0xe8] sm:$0xff] }
 0x227   : > { %3330 = vmatpush1.msra.mxu1 %v557_v9  ;;  %3536 = vmatpush1.msra.mxu0 %v584_v20  ;;  %v1748_v35 = vadd.f32 %v6080_v46, %v7461_v17  ;;  %v2105_v39 = vadd.f32 %v7500_v24, %v2067_v59  ;;  %v2066_v16 = vadd.f32 %v7565_v58, %v1723_v36  ;;  %v582_v58 = vld [vmem:[%s8810_s4 + $0x1c8] sm:$0xff] }
 0x228   : > { %3331 = vmatprep.subr.mxu1 %v8858_v14  ;;  %v2240_v9 = vcombine.high %v2238_v38, %v2238_v38  ;;  %v5419_v20 = vrot.slane %v2239_v28, 9  ;;  %v5420_v4 = vrot.slane %v2238_v38, 9  ;;  %v2726_v23 = vmax.f32 %v2231_v15, %v5418_v51  ;;  %3537 = vmatprep.subr.mxu0 %v8858_v14  ;;  %v1967_v51 = vpop.f32.mrf.mxu0 }
 0x229   : > { %3332 = vmatpush1.msra.mxu1 %v556_v12  ;;  %v2069_v17 = vadd.f32 %v7586_v29, %v1738_v34  ;;  %v2068_v37 = vadd.f32 %v1957_v63, %v1733_v56  ;;  %3538 = vmatpush1.msra.mxu0 %v583_v3  ;;  %v2137_v29 = vmax.f32 %v2105_v39, 0.0  ;;  %v2104_v63 = vadd.f32 %v7500_v24, %v2066_v16 }
 0x22a   : > { %3333 = vmatprep.subr.mxu1 %v8858_v14  ;;  %v5421_v27 = vrot.slane %v2240_v9, 9  ;;  %v2727_v15 = vmax.f32 %v2239_v28, %v5419_v20  ;;  %v2728_v12 = vmax.f32 %v2238_v38, %v5420_v4  ;;  %3539 = vmatprep.subr.mxu0 %v8858_v14  ;;  %v2134_v34 = vmax.f32 %v7624_v18, 0.0 }
 0x22b   : > { %3334 = vmatpush1.msra.mxu1 %v555_v31  ;;  %v2107_v59 = vadd.f32 %v7500_v24, %v2069_v17  ;;  %v7682_v36 = vadd.f32 %v7500_v24, %v2068_v37  ;;  %v2071_v56 = vadd.f32 %v6152_v21, %v1748_v35  ;;  %v553_v31 = vld [vmem:[%s8810_s4 + $0xe0] sm:$0xff]  ;;  %v2881_v3 = vrot.slane %v2726_v23, %v7515_v54  ;;  %v6155_v17 = vpop.f32.mrf.mxu0  ;;  %v1752_v23 = vpop.f32.mrf.mxu1 }
 0x22c   : > { %3335 = vmatprep.subr.mxu1 %v8858_v14  ;;  %v7686_v38 = vmax.f32 %v2240_v9, %v5421_v27  ;;  %v2885_v28 = vrot.slane %v2727_v15, %v7515_v54  ;;  %v2889_v20 = vrot.slane %v2728_v12, %v7515_v54  ;;  %v2163_v4 = vmax.f32 %v2135_v44, %v2137_v29  ;;  %v581_v9 = vld [vmem:[%s8810_s4 + $0x1c0] sm:$0xff]  ;;  %v552_v44 = vld [vmem:[%s8810_s4 + $0xd8] sm:$0xff] }
 0x22d   : > { %3336 = vmatpush1.msra.mxu1 %v554_v26  ;;  %v2136_v39 = vmax.f32 %v2104_v63, 0.0  ;;  %3540 = vmatpush1.msra.mxu0 %v582_v58  ;;  %v2139_v18 = vmax.f32 %v2107_v59, 0.0  ;;  %v2138_v21 = vmax.f32 %v7682_v36, 0.0  ;;  %v2109_v35 = vadd.f32 %v7500_v24, %v2071_v56  ;;  %v580_v12 = vld [vmem:[%s8810_s4 + $0x1b8] sm:$0xff]  ;;  %v551_v56 = vld [vmem:[%s8810_s4 + $0xd0] sm:$0xff]  ;;  %v570_v36 = vld [vmem:[%s8810_s4 + $0x168] sm:$0xff] }
 0x22e   : > { %3337 = vmatprep.subr.mxu1 %v8858_v14  ;;  %v1743_v16 = vadd.f32 %v1742_v50, %v7463_v61  ;;  %3541 = vmatprep.subr.mxu0 %v8858_v14  ;;  %v3116_v37 = vsel %vm3102_vm6, %v2885_v28, %v2881_v3  ;;  %v2275_v26 = vcombine.high %v2163_v4, %v2163_v4 }
 0x22f   : > { %v2282_v27 = vrot.slane %v2163_v4, %v7508_v57  ;;  %v2162_v15 = vmax.f32 %v2134_v34, %v2136_v39  ;;  %3338 = vmatpush1.msra.mxu1 %v553_v31  ;;  %v2141_v50 = vmax.f32 %v2109_v35, 0.0  ;;  %v1758_v29 = vadd.f32 %v6083_v1, %v7465_v30  ;;  %3542 = vmatpush1.msra.mxu0 %v581_v9  ;;  %v7730_v4 = vpop.f32.mrf.mxu0  ;;  %v7732_v39 = vpop.f32.mrf.mxu1 }
 0x230   : > { %v2070_v58 = vadd.f32 %v1967_v51, %v1743_v16  ;;  %3339 = vmatprep.subr.mxu1 %v8858_v14  ;;  %v2289_v63 = vrot.slane %v2275_v26, %v7508_v57  ;;  %3543 = vmatprep.subr.mxu0 %v8858_v14  ;;  %v579_v51 = vld [vmem:[%s8810_s4 + $0x1b0] sm:$0xff]  ;;  %v7724_v30 = vsel %vm3104_vm7, %v2889_v20, %v3116_v37  ;;  %v550_v20 = vld [vmem:[%s8810_s4 + $0xc8] sm:$0xff] }
 0x231   : > { %v2290_v59 = vcombine.high %v2282_v27, %v2282_v27  ;;  %v5430_v28 = vrot.slane %v2282_v27, 9  ;;  %v2258_v34 = vcombine.high %v2162_v15, %v2162_v15  ;;  %3340 = vmatpush1.msra.mxu1 %v552_v44  ;;  %v2265_v1 = vrot.slane %v2162_v15, %v7508_v57  ;;  %3544 = vmatpush1.msra.mxu0 %v580_v12 }
 0x232   : > { %v2165_v31 = vmax.f32 %v2139_v18, %v2141_v50  ;;  %v7728_v3 = vadd.f32 %v1752_v23, %v7467_v49  ;;  %v2291_v9 = vcombine.high %v2289_v63, %v2289_v63  ;;  %v5432_v16 = vrot.slane %v2289_v63, 9  ;;  %3341 = vmatprep.subr.mxu1 %v8858_v14  ;;  %3545 = vmatprep.subr.mxu0 %v8858_v14  ;;  %v578_v49 = vld [vmem:[%s8810_s4 + $0x1a8] sm:$0xff] }
 0x233   : > { %v5431_v35 = vrot.slane %v2290_v59, 9  ;;  %v7734_v44 = vmax.f32 %v2282_v27, %v5430_v28  ;;  %v2272_v18 = vrot.slane %v2258_v34, %v7508_v57  ;;  %v2273_v23 = vcombine.high %v2265_v1, %v2265_v1  ;;  %3342 = vmatpush1.msra.mxu1 %v551_v56  ;;  %3546 = vmatpush1.msra.mxu0 %v579_v51  ;;  %v549_v28 = vld [vmem:[%s8810_s4 + $0xc0] sm:$0xff]  ;;  %v7755_v56 = vpop.f32.mrf.mxu1 }
 0x234   : > { %v5426_v37 = vrot.slane %v2265_v1, 9  ;;  %v2108_v26 = vadd.f32 %v7500_v24, %v2070_v58  ;;  %v5433_v27 = vrot.slane %v2291_v9, 9  ;;  %v2309_v12 = vcombine.high %v2165_v31, %v2165_v31  ;;  %3343 = vmatprep.subr.mxu1 %v8858_v14  ;;  %3547 = vmatprep.subr.mxu0 %v8858_v14  ;;  %v7753_v58 = vpop.f32.mrf.mxu0 }
 0x235   : > { %v7746_v15 = vmax.f32 %v2290_v59, %v5431_v35  ;;  %v2073_v50 = vadd.f32 %v6155_v17, %v1758_v29  ;;  %v2274_v34 = vcombine.high %v2272_v18, %v2272_v18  ;;  %v5427_v46 = vrot.slane %v2273_v23, 9  ;;  %3344 = vmatpush1.msra.mxu1 %v550_v20  ;;  %3548 = vmatpush1.msra.mxu0 %v578_v49  ;;  %v577_v17 = vld [vmem:[%s8810_s4 + $0x1a0] sm:$0xff]  ;;  %v6089_v51 = vpop.f32.mrf.mxu1 }
 0x236   : > { %v5428_v52 = vrot.slane %v2272_v18, 9  ;;  %v2734_v61 = vmax.f32 %v2265_v1, %v5426_v37  ;;  %v7760_v29 = vmax.f32 %v2289_v63, %v5432_v16  ;;  %v7762_v59 = vmax.f32 %v2291_v9, %v5433_v27  ;;  %3345 = vmatprep.subr.mxu1 %v8858_v14  ;;  %3549 = vmatprep.subr.mxu0 %v8858_v14  ;;  %v572_v63 = vld [vmem:[%s8810_s4 + $0x178] sm:$0xff] }
 0x237   : > { %v2316_v35 = vrot.slane %v2165_v31, %v7508_v57  ;;  %v5429_v20 = vrot.slane %v2274_v34, 9  ;;  %v2735_v49 = vmax.f32 %v2273_v23, %v5427_v46  ;;  %3346 = vmatpush1.msra.mxu1 %v549_v28  ;;  %v576_v31 = vld [vmem:[%s8810_s4 + $0x198] sm:$0xff]  ;;  %v2323_v9 = vrot.slane %v2309_v12, %v7508_v57  ;;  %3550 = vmatpush1.msra.mxu0 %v577_v17  ;;  %v7784_v28 = vpop.f32.mrf.mxu0  ;;  %v575_v12 = vld [vmem:[%s8810_s4 + $0x190] sm:$0xff] }
 0x238   : > { %v2736_v37 = vmax.f32 %v2272_v18, %v5428_v52  ;;  %v2140_v1 = vmax.f32 %v2108_v26, 0.0  ;;  %3363 = vmatprep.subr.mxu1 %v8858_v14  ;;  %v2913_v46 = vrot.slane %v2734_v61, %v7515_v54  ;;  %3551 = vmatprep.subr.mxu0 %v8858_v14  ;;  %v571_v26 = vld [vmem:[%s8810_s4 + $0x170] sm:$0xff] }
 0x239   : > { %v2324_v16 = vcombine.high %v2316_v35, %v2316_v35  ;;  %v5438_v27 = vrot.slane %v2316_v35, 9  ;;  %v7779_v52 = vmax.f32 %v2274_v34, %v5429_v20  ;;  %v2917_v18 = vrot.slane %v2735_v49, %v7515_v54  ;;  %3364 = vmatpush2.msra.mxu1 %v572_v63  ;;  %3552 = vmatpush1.msra.mxu0 %v576_v31 }
 0x23a   : > { %v2921_v23 = vrot.slane %v2736_v37, %v7515_v54  ;;  %v2325_v34 = vcombine.high %v2323_v9, %v2323_v9  ;;  %v5440_v17 = vrot.slane %v2323_v9, 9  ;;  %v2164_v45 = vmax.f32 %v2138_v21, %v2140_v1  ;;  %3365 = vmatprep.subr.mxu1 %v8858_v14  ;;  %3553 = vmatprep.subr.mxu0 %v8858_v14  ;;  %v574_v21 = vld [vmem:[%s8810_s4 + $0x188] sm:$0xff] }
 0x23b   : > { %v5439_v61 = vrot.slane %v2324_v16, 9  ;;  %v7793_v20 = vmax.f32 %v2316_v35, %v5438_v27  ;;  %v3123_v37 = vsel %vm3102_vm6, %v2917_v18, %v2913_v46  ;;  %v7808_v31 = vadd.f32 %v7500_v24, %v2073_v50  ;;  %3366 = vmatpush2.msra.mxu1 %v571_v26  ;;  %3554 = vmatpush1.msra.mxu0 %v575_v12 }
 0x23c   : > { %v7805_v27 = vsel %vm3104_vm7, %v2921_v23, %v3123_v37  ;;  %v5441_v63 = vrot.slane %v2325_v34, 9  ;;  %v2292_v46 = vcombine.high %v2164_v45, %v2164_v45  ;;  %v2299_v18 = vrot.slane %v2164_v45, %v7508_v57  ;;  %v6161_v23 = vpop.f32.mrf.mxu0  ;;  %v7821_v37 = vpop.f32.mrf.mxu1  ;;  %3367 = vmatprep.subr.mxu1 %v8858_v14  ;;  %3555 = vmatprep.subr.mxu0 %v8858_v14  ;;  %v569_v45 = vld [vmem:[%s8810_s4 + $0x160] sm:$0xff] }
 0x23d   : > { %8859 = vst [vmem:[#allocation14_spill] sm:$0xff] %v7793_v20  ;;  %v7816_v1 = vmax.f32 %v2324_v16, %v5439_v61  ;;  %v2072_v50 = vadd.f32 %v7730_v4, %v7728_v3  ;;  %v7824_v26 = vmax.f32 %v2323_v9, %v5440_v17  ;;  %v1768_v16 = vadd.f32 %v7732_v39, %v7469_v55 }
 0x23e   : > { %v7826_v12 = vmax.f32 %v2325_v34, %v5441_v63  ;;  %v2306_v3 = vrot.slane %v2292_v46, %v7508_v57  ;;  %v2307_v4 = vcombine.high %v2299_v18, %v2299_v18  ;;  %v5434_v61 = vrot.slane %v2299_v18, 9  ;;  %3368 = vmatpush2.msra.mxu1 %v570_v36  ;;  %3556 = vmatpush1.msra.mxu0 %v574_v21  ;;  %v573_v34 = vld [vmem:[%s8810_s4 + $0x180] sm:$0xff]  ;;  %v568_v36 = vld [vmem:[%s8810_s4 + $0x158] sm:$0xff]  ;;  %v7853_v35 = vpop.f32.mrf.mxu0 }
 0x23f   : > { %8860 = vst [vmem:[#allocation15_spill] sm:$0xff] %v7816_v1  ;;  %8861 = vst [vmem:[#allocation16_spill] sm:$0xff] %v7824_v26  ;;  %v7838_v9 = vadd.f32 %v7500_v24, %v2072_v50  ;;  %v2075_v55 = vadd.f32 %v7753_v58, %v1768_v16  ;;  %v1763_v39 = vadd.f32 %v7755_v56, %v7471_v41  ;;  %3369 = vmatprep.subr.mxu1 %v8858_v14  ;;  %v7855_v58 = vpop.f32.mrf.mxu1  ;;  %v596_v41 = vld [vmem:[%s8810_s4 + $0x238] sm:$0xff] }
 0x240   : > { %v1778_v17 = vadd.f32 %v6089_v51, %v7473_v7  ;;  %v2877_v63 = vrot.slane %v7559_v43, %v7515_v54  ;;  %v2308_v21 = vcombine.high %v2306_v3, %v2306_v3  ;;  %v5435_v46 = vrot.slane %v2307_v4, 9  ;;  %3557 = vmatprep.subr.mxu0 %v8858_v14  ;;  %3370 = vmatpush2.msra.mxu1 %v569_v45 }
 0x241   : > { %v5436_v50 = vrot.slane %v2306_v3, 9  ;;  %v2742_v49 = vmax.f32 %v2299_v18, %v5434_v61  ;;  %v2143_v7 = vmax.f32 %v7808_v31, 0.0  ;;  %v2113_v43 = vadd.f32 %v7500_v24, %v2075_v55  ;;  %3558 = vmatpush1.msra.mxu0 %v573_v34  ;;  %3371 = vmatprep.subr.mxu1 %v8858_v14 }
 0x242   : > { %v2074_v56 = vadd.f32 %v7784_v28, %v1763_v39  ;;  %v8862_v51 = vrot.slane %v7581_v13, %v7515_v54  ;;  %v5437_v16 = vrot.slane %v2308_v21, 9  ;;  %v2743_v45 = vmax.f32 %v2307_v4, %v5435_v46  ;;  %3575 = vmatprep.subr.mxu0 %v8858_v14  ;;  %3372 = vmatpush2.msra.mxu1 %v568_v36  ;;  %v567_v28 = vld [vmem:[%s8810_s4 + $0x150] sm:$0xff] }
 0x243   : > { %v2744_v61 = vmax.f32 %v2306_v3, %v5436_v50  ;;  %v2945_v20 = vrot.slane %v2742_v49, %v7515_v54  ;;  %v595_v13 = vld [vmem:[%s8810_s4 + $0x230] sm:$0xff]  ;;  %v8863_v4 = vrot.slane %v7527_v6, %v7515_v54  ;;  %v2077_v49 = vadd.f32 %v6161_v23, %v1778_v17  ;;  %3576 = vmatpush2.msra.mxu0 %v596_v41  ;;  %v7892_v50 = vpop.f32.mrf.mxu0  ;;  %v7894_v6 = vpop.f32.mrf.mxu1 }
 0x244   : > { %v3107_v18 = vsel %vm3106_vm8, %v8862_v51, %v7612_v8  ;;  %v2145_v8 = vmax.f32 %v2113_v43, 0.0  ;;  %v2112_v31 = vadd.f32 %v7500_v24, %v2074_v56  ;;  %3373 = vmatprep.subr.mxu1 %v8858_v14  ;;  %v7884_v34 = vmax.f32 %v2308_v21, %v5437_v16  ;;  %3577 = vmatprep.subr.mxu0 %v8858_v14  ;;  %v594_v56 = vld [vmem:[%s8810_s4 + $0x228] sm:$0xff] }
 0x245   : > { %v3109_v3 = vsel %vm3108_vm9, %v8863_v4, %v3107_v18  ;;  %v2949_v55 = vrot.slane %v2743_v45, %v7515_v54  ;;  %v2953_v39 = vrot.slane %v2744_v61, %v7515_v54  ;;  %v8865_v36 = vrot.slane %v7543_v2, %v7515_v54  ;;  %3374 = vmatpush2.msra.mxu1 %v567_v28  ;;  %v566_v2 = vld [vmem:[%s8810_s4 + $0x148] sm:$0xff] }
 0x246   : > { %8864 = vst [vmem:[#allocation17_spill] sm:$0xff] %v7884_v34  ;;  %v2142_v23 = vmax.f32 %v7838_v9, 0.0  ;;  %v2167_v17 = vmax.f32 %v2143_v7, %v2145_v8  ;;  %v2144_v21 = vmax.f32 %v2112_v31, 0.0  ;;  %v8866_v41 = vrot.slane %v7545_v5, %v7515_v54  ;;  %3578 = vmatpush2.msra.mxu0 %v595_v13  ;;  %3375 = vmatprep.subr.mxu1 %v8858_v14  ;;  %v7933_v8 = vpop.f32.mrf.mxu0  ;;  %v7935_v31 = vpop.f32.mrf.mxu1 }
 0x247   : > { %v3111_v46 = vsel %vm3110_vm10, %v8865_v36, %v3109_v3  ;;  %v3130_v7 = vsel %vm3102_vm6, %v2949_v55, %v2945_v20  ;;  %v1773_v5 = vadd.f32 %v7821_v37, %v7475_v25  ;;  %3579 = vmatprep.subr.mxu0 %v8858_v14  ;;  %v565_v20 = vld [vmem:[%s8810_s4 + $0x140] sm:$0xff]  ;;  %v7931_v13 = vadd.f32 %v7500_v24, %v2077_v49  ;;  %v592_v49 = vld [vmem:[%s8810_s4 + $0x218] sm:$0xff] }
 0x248   : > { %v3113_v43 = vsel %vm3112_vm11, %v8866_v41, %v3111_v46  ;;  %v2343_v16 = vcombine.high %v2167_v17, %v2167_v17  ;;  %v2350_v45 = vrot.slane %v2167_v17, %v7508_v57  ;;  %v2166_v61 = vmax.f32 %v2142_v23, %v2144_v21  ;;  %3376 = vmatpush2.msra.mxu1 %v566_v2 }
 0x249   : > { %v3115_v51 = vsel %vm3114_vm12, %v2877_v63, %v3113_v43  ;;  %v593_v63 = vld [vmem:[%s8810_s4 + $0x220] sm:$0xff]  ;;  %v7928_v37 = vsel %vm3104_vm7, %v2953_v39, %v3130_v7  ;;  %3580 = vmatpush2.msra.mxu0 %v594_v56  ;;  %3377 = vmatprep.subr.mxu1 %v8858_v14  ;;  %v2076_v23 = vadd.f32 %v7853_v35, %v1773_v5  ;;  %v591_v56 = vld [vmem:[%s8810_s4 + $0x210] sm:$0xff]  ;;  %v1792_v5 = vpop.f32.mrf.mxu1 }
 0x24a   : > { %v3165_v28 = vrot.slane %v3115_v51, 7  ;;  %v2357_v4 = vrot.slane %v2343_v16, %v7508_v57  ;;  %v2358_v3 = vcombine.high %v2350_v45, %v2350_v45  ;;  %v5446_v55 = vrot.slane %v2350_v45, 9  ;;  %3581 = vmatprep.subr.mxu0 %v8858_v14  ;;  %3378 = vmatpush2.msra.mxu1 %v565_v20 }
 0x24b   : > { %v2326_v36 = vcombine.high %v2166_v61, %v2166_v61  ;;  %v2333_v39 = vrot.slane %v2166_v61, %v7508_v57  ;;  %v1788_v17 = vadd.f32 %v7855_v58, %v7477_v53  ;;  %3582 = vmatpush2.msra.mxu0 %v593_v63  ;;  %3422 = vmatprep.subr.mxu1 %v8858_v14  ;;  %v6167_v58 = vpop.f32.mrf.mxu0  ;;  %v590_v63 = vld [vmem:[%s8810_s4 + $0x208] sm:$0xff]  ;;  %v6098_v34 = vpop.f32.mrf.mxu1 }
 0x24c   : > { %v7945_v46 = vsel %vm663_vm0, 0.0, %v3165_v28  ;;  %v2359_v21 = vcombine.high %v2357_v4, %v2357_v4  ;;  %v5447_v41 = vrot.slane %v2358_v3, 9  ;;  %v5448_v43 = vrot.slane %v2357_v4, 9  ;;  %3583 = vmatprep.subr.mxu0 %v8858_v14 }
 0x24d   : > { %v7950_v2 = vmax.f32 %v2350_v45, %v5446_v55  ;;  %v2340_v35 = vrot.slane %v2326_v36, %v7508_v57  ;;  %v2341_v7 = vcombine.high %v2333_v39, %v2333_v39  ;;  %v5442_v51 = vrot.slane %v2333_v39, 9  ;;  %3584 = vmatpush2.msra.mxu0 %v592_v49  ;;  %v2017_v1 = vpop.f32.mrf.mxu0 }
 0x24e   : > { %v3189_v53 = vsel %vm663_vm0, %v3165_v28, 0.0  ;;  %v5449_v16 = vrot.slane %v2359_v21, 9  ;;  %v7959_v45 = vmax.f32 %v2358_v3, %v5447_v41  ;;  %v7961_v61 = vmax.f32 %v2357_v4, %v5448_v43  ;;  %3585 = vmatprep.subr.mxu0 %v8858_v14 }
 0x24f   : > { %v3258_v20 = vrot.slane %v7945_v46, 2  ;;  %v2342_v55 = vcombine.high %v2340_v35, %v2340_v35  ;;  %v5443_v36 = vrot.slane %v2341_v7, 9  ;;  %v5444_v18 = vrot.slane %v2340_v35, 9  ;;  %3586 = vmatpush2.msra.mxu0 %v591_v56 }
 0x250   : > { %v2750_v28 = vmax.f32 %v2333_v39, %v5442_v51  ;;  %v2993_v49 = vrot.slane %v7950_v2, %v7515_v54  ;;  %v3259_v3 = vrot.slane %v3189_v53, 2  ;;  %v2147_v4 = vmax.f32 %v7931_v13, 0.0  ;;  %3587 = vmatprep.subr.mxu0 %v8858_v14 }
 0x251   : > { %v2114_v41 = vadd.f32 %v7500_v24, %v2076_v23  ;;  %v7973_v43 = vmax.f32 %v2359_v21, %v5449_v16  ;;  %v5445_v9 = vrot.slane %v2342_v55, 9  ;;  %v2751_v25 = vmax.f32 %v2341_v7, %v5443_v36  ;;  %3588 = vmatpush2.msra.mxu0 %v590_v63 }
 0x252   : > { %v2752_v26 = vmax.f32 %v2340_v35, %v5444_v18  ;;  %v2997_v39 = vrot.slane %v7959_v45, %v7515_v54  ;;  %v7978_v56 = vsel %vm1007_vm1, %v3258_v20, %v3259_v3  ;;  %v3212_v13 = vrot.slane %v7945_v46, 1  ;;  %3589 = vmatprep.subr.mxu0 %v8858_v14 }
 0x253   : > { %v3213_v51 = vrot.slane %v3189_v53, 1  ;;  %v3001_v23 = vrot.slane %v7961_v61, %v7515_v54  ;;  %v2977_v21 = vrot.slane %v2750_v28, %v7515_v54  ;;  %v2981_v18 = vrot.slane %v2751_v25, %v7515_v54  ;;  %5474 = vmatprep.mubr.msk.f32.mxu1 %vm1217_vm4, %v7978_v56 }
 0x254   : > { %v2079_v35 = vadd.f32 %v7892_v50, %v1788_v17  ;;  %v7989_v7 = vmax.f32 %v2342_v55, %v5445_v9  ;;  %v1783_v53 = vadd.f32 %v7894_v6, %v7479_v32  ;;  %v1798_v20 = vadd.f32 %v7935_v31, %v7481_v33  ;;  %v6170_v17 = vpop.f32.mrf.mxu0  ;;  %v1802_v32 = vpop.f32.mrf.mxu1 }
 0x255   : > { %v3214_v16 = vsel %vm830_vm2, %v3212_v13, %v3213_v51  ;;  %v2985_v63 = vrot.slane %v2752_v26, %v7515_v54  ;;  %v2909_v36 = vrot.slane %v7639_v48, %v7515_v54  ;;  %v8867_v50 = vrot.slane %v7686_v38, %v7515_v54 }
 0x256   : > { %3235 = vrot.lane.b32.xlu0 %v3214_v16, %s6407_s14  ;;  %v2117_v25 = vadd.f32 %v7500_v24, %v2079_v35  ;;  %v3137_v6 = vsel %vm3102_vm6, %v2981_v18, %v2977_v21  ;;  %v2078_v33 = vadd.f32 %v7933_v8, %v1783_v53  ;;  %v8868_v26 = vrot.slane %v7614_v47, %v7515_v54  ;;  %v2027_v21 = vpop.f32.mrf.mxu0 }
 0x257   : > { %v3118_v9 = vsel %vm3106_vm8, %v8867_v50, %v7724_v30  ;;  %v2081_v55 = vadd.f32 %v6167_v58, %v1798_v20  ;;  %v8869_v48 = vrot.slane %v7621_v10, %v7515_v54  ;;  %v1793_v30 = vadd.f32 %v1792_v5, %v7483_v19  ;;  %v589_v10 = vld [vmem:[%s8810_s4 + $0x200] sm:$0xff] }
 0x258   : > { %v3119_v31 = vsel %vm3108_vm9, %v8868_v26, %v3118_v9  ;;  %v2149_v28 = vmax.f32 %v2117_v25, 0.0  ;;  %v1808_v3 = vadd.f32 %v6098_v34, %v7485_v22  ;;  %v2116_v13 = vadd.f32 %v7500_v24, %v2078_v33  ;;  %3590 = vmatpush2.msra.mxu0 %v589_v10 }
 0x259   : > { %v3120_v38 = vsel %vm3110_vm10, %v8869_v48, %v3119_v31  ;;  %v8870_v8 = vrot.slane %v7636_v11, %v7515_v54  ;;  %v8024_v51 = vadd.f32 %v7500_v24, %v2081_v55  ;;  %v1803_v58 = vadd.f32 %v1802_v32, %v7487_v60 }
 0x25a   : > { %v2989_v19 = vrot.slane %v7989_v7, %v7515_v54  ;;  %v2146_v22 = vmax.f32 %v2114_v41, 0.0  ;;  %v2169_v34 = vmax.f32 %v2147_v4, %v2149_v28  ;;  %v8034_v11 = vsel %vm3104_vm7, %v2985_v63, %v3137_v6  ;;  %v8881_v7 = vld [vmem:[#allocation16_spill] sm:$0xff] }
 0x25b   : > { %v3121_v47 = vsel %vm3112_vm11, %v8870_v8, %v3120_v38  ;;  %v2148_v24 = vmax.f32 %v2116_v13, 0.0  ;;  %v2080_v35 = vadd.f32 %v2017_v1, %v1793_v30  ;;  %v2151_v53 = vmax.f32 %v8024_v51, 0.0 }
 0x25c   : > { %v3122_v5 = vsel %vm3114_vm12, %v2909_v36, %v3121_v47  ;;  %v2377_v60 = vcombine.high %v2169_v34, %v2169_v34  ;;  %v2384_v16 = vrot.slane %v2169_v34, %v7508_v57  ;;  %v2083_v20 = vadd.f32 %v6170_v17, %v1808_v3  ;;  %v8048_v17 = vld [vmem:[%s8809_s3] ss:$0 sm:$0xff] }
 0x25d   : > { %v3166_v18 = vrot.slane %v3122_v5, 7  ;;  %v2168_v25 = vmax.f32 %v2146_v22, %v2148_v24  ;;  %v2082_v36 = vadd.f32 %v2027_v21, %v1803_v58  ;;  %v2118_v26 = vadd.f32 %v8048_v17, %v2080_v35 }
 0x25e   : > { %v2391_v50 = vrot.slane %v2377_v60, %v7508_v57  ;;  %v2392_v63 = vcombine.high %v2384_v16, %v2384_v16  ;;  %v5454_v9 = vrot.slane %v2384_v16, 9  ;;  %v2121_v51 = vadd.f32 %v8048_v17, %v2083_v20  ;;  %v6101_v60 = vpop.f32.mrf.mxu1 }
 0x25f   : > { %v8039_v41 = vsel %vm663_vm0, 0.0, %v3166_v18  ;;  %v3190_v4 = vsel %vm663_vm0, %v3166_v18, 0.0  ;;  %v2360_v1 = vcombine.high %v2168_v25, %v2168_v25  ;;  %v2367_v6 = vrot.slane %v2168_v25, %v7508_v57 }
 0x260   : > { %v3261_v32 = vrot.slane %v8039_v41, 2  ;;  %v3262_v33 = vrot.slane %v3190_v4, 2  ;;  %v2393_v31 = vcombine.high %v2391_v50, %v2391_v50  ;;  %v5455_v55 = vrot.slane %v2392_v63, 9 }
 0x261   : > { %v5456_v28 = vrot.slane %v2391_v50, 9  ;;  %v8051_v48 = vmax.f32 %v2384_v16, %v5454_v9  ;;  %v2374_v38 = vrot.slane %v2360_v1, %v7508_v57  ;;  %v2375_v30 = vcombine.high %v2367_v6, %v2367_v6 }
 0x262   : > { %v5450_v3 = vrot.slane %v2367_v6, 9  ;;  %v8055_v13 = vsel %vm1007_vm1, %v3261_v32, %v3262_v33  ;;  %v5457_v8 = vrot.slane %v2393_v31, 9  ;;  %v3215_v47 = vrot.slane %v8039_v41, 1  ;;  %v6173_v33 = vpop.f32.mrf.mxu0 }
 0x263   : > { %5490 = vmatprep.mubr.msk.f32.mxu0 %vm1217_vm4, %v8055_v13  ;;  %v2120_v58 = vadd.f32 %v8048_v17, %v2082_v36  ;;  %v8062_v10 = vmax.f32 %v2392_v63, %v5455_v55  ;;  %v2376_v22 = vcombine.high %v2374_v38, %v2374_v38  ;;  %v5451_v34 = vrot.slane %v2375_v30, 9 }
 0x264   : > { %v5452_v5 = vrot.slane %v2374_v38, 9  ;;  %v8064_v21 = vmax.f32 %v2391_v50, %v5456_v28  ;;  %v3025_v24 = vrot.slane %v8051_v48, %v7515_v54  ;;  %v2758_v18 = vmax.f32 %v2367_v6, %v5450_v3 }
 0x265   : > { %v3216_v35 = vrot.slane %v3190_v4, 1  ;;  %v8068_v16 = vmax.f32 %v2393_v31, %v5457_v8  ;;  %v5453_v25 = vrot.slane %v2376_v22, 9  ;;  %v2759_v9 = vmax.f32 %v2375_v30, %v5451_v34 }
 0x266   : > { %v2760_v20 = vmax.f32 %v2374_v38, %v5452_v5  ;;  %v2150_v63 = vmax.f32 %v2118_v26, 0.0  ;;  %v2153_v32 = vmax.f32 %v2121_v51, 0.0  ;;  %v2152_v1 = vmax.f32 %v2120_v58, 0.0  ;;  %v1812_v58 = vpop.f32.mrf.mxu1 }
 0x267   : > { %v3217_v36 = vsel %vm830_vm2, %v3215_v47, %v3216_v35  ;;  %v8073_v55 = vmax.f32 %v2376_v22, %v5453_v25  ;;  %v3013_v6 = vrot.slane %v2759_v9, %v7515_v54  ;;  %v1818_v4 = vadd.f32 %v6101_v60, %v7489_v62 }
 0x268   : > { %3237 = vrot.lane.b32.xlu1 %v3217_v36, %s6407_s14  ;;  %v2171_v28 = vmax.f32 %v2151_v53, %v2153_v32  ;;  %v2170_v38 = vmax.f32 %v2150_v63, %v2152_v1  ;;  %v8871_v26 = vrot.slane %v7779_v52, %v7515_v54  ;;  %v3009_v3 = vrot.slane %v2758_v18, %v7515_v54  ;;  %v2037_v36 = vpop.f32.mrf.mxu0 }
 0x269   : > { %v3017_v8 = vrot.slane %v2760_v20, %v7515_v54  ;;  %v8872_v47 = vrot.slane %v7734_v44, %v7515_v54  ;;  %v2085_v51 = vadd.f32 %v6173_v33, %v1818_v4  ;;  %v2941_v52 = vrot.slane %v7762_v59, %v7515_v54 }
 0x26a   : > { %v3125_v30 = vsel %vm3106_vm8, %v8871_v26, %v7805_v27  ;;  %v2411_v22 = vcombine.high %v2171_v28, %v2171_v28  ;;  %v2418_v53 = vrot.slane %v2171_v28, %v7508_v57  ;;  %v2394_v34 = vcombine.high %v2170_v38, %v2170_v38 }
 0x26b   : > { %v3126_v62 = vsel %vm3108_vm9, %v8872_v47, %v3125_v30  ;;  %v3021_v27 = vrot.slane %v8073_v55, %v7515_v54  ;;  %v3144_v5 = vsel %vm3102_vm6, %v3013_v6, %v3009_v3  ;;  %v2401_v18 = vrot.slane %v2170_v38, %v7508_v57 }
 0x26c   : > { %v8873_v44 = vrot.slane %v7746_v15, %v7515_v54  ;;  %v2425_v60 = vrot.slane %v2411_v22, %v7508_v57  ;;  %v2426_v25 = vcombine.high %v2418_v53, %v2418_v53  ;;  %v5462_v9 = vrot.slane %v2418_v53, 9  ;;  %v6104_v15 = vpop.f32.mrf.mxu1 }
 0x26d   : > { %v2408_v20 = vrot.slane %v2394_v34, %v7508_v57  ;;  %v2409_v59 = vcombine.high %v2401_v18, %v2401_v18  ;;  %v5458_v63 = vrot.slane %v2401_v18, 9  ;;  %v8874_v32 = vrot.slane %v7760_v29, %v7515_v54 }
 0x26e   : > { %v3127_v35 = vsel %vm3110_vm10, %v8873_v44, %v3126_v62  ;;  %v8109_v33 = vadd.f32 %v8048_v17, %v2085_v51  ;;  %v2427_v6 = vcombine.high %v2425_v60, %v2425_v60  ;;  %v5463_v4 = vrot.slane %v2426_v25, 9  ;;  %v6176_v44 = vpop.f32.mrf.mxu0  ;;  %v1822_v50 = vpop.f32.mrf.mxu1 }
 0x26f   : > { %v3128_v1 = vsel %vm3112_vm11, %v8874_v32, %v3127_v35  ;;  %v5464_v28 = vrot.slane %v2425_v60, 9  ;;  %v8111_v38 = vmax.f32 %v2418_v53, %v5462_v9  ;;  %v2410_v26 = vcombine.high %v2408_v20, %v2408_v20 }
 0x270   : > { %v5459_v30 = vrot.slane %v2409_v59, 9  ;;  %v5460_v3 = vrot.slane %v2408_v20, 9  ;;  %v2766_v47 = vmax.f32 %v2401_v18, %v5458_v63  ;;  %v5465_v62 = vrot.slane %v2427_v6, 9 }
 0x271   : > { %v8113_v22 = vmax.f32 %v2426_v25, %v5463_v4  ;;  %v8115_v34 = vmax.f32 %v2425_v60, %v5464_v28  ;;  %v1813_v29 = vadd.f32 %v1812_v58, %v7491_v42  ;;  %v3145_v51 = vsel %vm3104_vm7, %v3017_v8, %v3144_v5  ;;  %v2047_v4 = vpop.f32.mrf.mxu0 }
 0x272   : > { %v5461_v35 = vrot.slane %v2410_v26, 9  ;;  %v2767_v32 = vmax.f32 %v2409_v59, %v5459_v30  ;;  %v2768_v31 = vmax.f32 %v2408_v20, %v5460_v3  ;;  %v3057_v53 = vrot.slane %v8111_v38, %v7515_v54 }
 0x273   : > { %v3041_v9 = vrot.slane %v2766_v47, %v7515_v54  ;;  %v3129_v18 = vsel %vm3114_vm12, %v2941_v52, %v3128_v1  ;;  %v2155_v25 = vmax.f32 %v8109_v33, 0.0  ;;  %v8124_v60 = vmax.f32 %v2427_v6, %v5465_v62  ;;  %v8877_v62 = vld [vmem:[#allocation14_spill] sm:$0xff] }
 0x274   : > { %v3061_v42 = vrot.slane %v8113_v22, %v7515_v54  ;;  %v3045_v8 = vrot.slane %v2767_v32, %v7515_v54  ;;  %v3167_v58 = vrot.slane %v3129_v18, 7  ;;  %v3065_v5 = vrot.slane %v8115_v34, %v7515_v54 }
 0x275   : > { %v2084_v20 = vadd.f32 %v2037_v36, %v1813_v29  ;;  %v1828_v59 = vadd.f32 %v6104_v15, %v7493_v40  ;;  %v1823_v63 = vadd.f32 %v1822_v50, %v7495_v0  ;;  %v8133_v52 = vmax.f32 %v2410_v26, %v5461_v35 }
 0x276   : > { %v3049_v1 = vrot.slane %v2768_v31, %v7515_v54  ;;  %v8137_v33 = vsel %vm663_vm0, 0.0, %v3167_v58  ;;  %v8140_v6 = vsel %vm663_vm0, %v3167_v58, 0.0  ;;  %v2973_v40 = vrot.slane %v7826_v12, %v7515_v54  ;;  %v8875_v31 = vld [vmem:[#allocation17_spill] sm:$0xff] }
 0x277   : > { %v3218_v28 = vrot.slane %v8137_v33, 1  ;;  %v3219_v30 = vrot.slane %v8140_v6, 1  ;;  %v2122_v36 = vadd.f32 %v8048_v17, %v2084_v20  ;;  %v3151_v0 = vsel %vm3102_vm6, %v3045_v8, %v3041_v9  ;;  %v8879_v9 = vld [vmem:[#allocation15_spill] sm:$0xff] }
 0x278   : > { %v2087_v50 = vadd.f32 %v6176_v44, %v1828_v59  ;;  %v2086_v15 = vadd.f32 %v2047_v4, %v1823_v63  ;;  %v8876_v26 = vrot.slane %v8875_v31, %v7515_v54  ;;  %v8878_v29 = vrot.slane %v8877_v62, %v7515_v54 }
 0x279   : > { %v3220_v47 = vsel %vm830_vm2, %v3218_v28, %v3219_v30  ;;  %v3005_v12 = vrot.slane %v7973_v43, %v7515_v54  ;;  %v3139_v44 = vsel %vm3106_vm8, %v2989_v19, %v8034_v11  ;;  %v8880_v18 = vrot.slane %v8879_v9, %v7515_v54 }
 0x27a   : > { %v3132_v3 = vsel %vm3106_vm8, %v8876_v26, %v7928_v37  ;;  %3239 = vrot.lane.b32.xlu0 %v3220_v47, %s6407_s14  ;;  %v2125_v37 = vadd.f32 %v8048_v17, %v2087_v50  ;;  %v2124_v32 = vadd.f32 %v8048_v17, %v2086_v15  ;;  %v3140_v43 = vsel %vm3108_vm9, %v2993_v49, %v3139_v44 }
 0x27b   : > { %v3133_v35 = vsel %vm3108_vm9, %v8878_v29, %v3132_v3  ;;  %v2154_v58 = vmax.f32 %v2122_v36, 0.0  ;;  %v8882_v19 = vrot.slane %v8881_v7, %v7515_v54  ;;  %v3141_v17 = vsel %vm3110_vm10, %v2997_v39, %v3140_v43 }
 0x27c   : > { %v3134_v8 = vsel %vm3110_vm10, %v8880_v18, %v3133_v35  ;;  %v3146_v20 = vsel %vm3106_vm8, %v3021_v27, %v3145_v51  ;;  %v2157_v59 = vmax.f32 %v2125_v37, 0.0  ;;  %v2156_v2 = vmax.f32 %v2124_v32, 0.0 }
 0x27d   : > { %v3135_v11 = vsel %vm3112_vm11, %v8882_v19, %v3134_v8  ;;  %v3142_v63 = vsel %vm3112_vm11, %v3001_v23, %v3141_v17  ;;  %v3053_v4 = vrot.slane %v8133_v52, %v7515_v54  ;;  %v3152_v45 = vsel %vm3104_vm7, %v3049_v1, %v3151_v0 }
 0x27e   : > { %v3136_v49 = vsel %vm3114_vm12, %v2973_v40, %v3135_v11  ;;  %v3143_v28 = vsel %vm3114_vm12, %v3005_v12, %v3142_v63  ;;  %v2173_v55 = vmax.f32 %v2155_v25, %v2157_v59  ;;  %v2172_v30 = vmax.f32 %v2154_v58, %v2156_v2 }
 0x27f   : > { %v3168_v39 = vrot.slane %v3136_v49, 7  ;;  %v3169_v27 = vrot.slane %v3143_v28, 7  ;;  %v3147_v51 = vsel %vm3108_vm9, %v3025_v24, %v3146_v20  ;;  %v3037_v52 = vrot.slane %v8068_v16, %v7515_v54 }
 0x280   : > { %v3069_v1 = vrot.slane %v8124_v60, %v7515_v54  ;;  %v2445_v25 = vcombine.high %v2173_v55, %v2173_v55  ;;  %v2452_v36 = vrot.slane %v2173_v55, %v7508_v57  ;;  %v2428_v40 = vcombine.high %v2172_v30, %v2172_v30 }
 0x281   : > { %v8202_v61 = vsel %vm663_vm0, 0.0, %v3168_v39  ;;  %v8205_v23 = vsel %vm663_vm0, %v3168_v39, 0.0  ;;  %v2435_v48 = vrot.slane %v2172_v30, %v7508_v57  ;;  %v8216_v50 = vsel %vm663_vm0, 0.0, %v3169_v27 }
 0x282   : > { %v3221_v24 = vrot.slane %v8202_v61, 1  ;;  %v3222_v0 = vrot.slane %v8205_v23, 1  ;;  %v8883_v15 = vrot.slane %v8062_v10, %v7515_v54  ;;  %v2459_v60 = vrot.slane %v2445_v25, %v7508_v57 }
 0x283   : > { %v2460_v31 = vcombine.high %v2452_v36, %v2452_v36  ;;  %v5470_v26 = vrot.slane %v2452_v36, 9  ;;  %v2442_v3 = vrot.slane %v2428_v40, %v7508_v57  ;;  %v2443_v47 = vcombine.high %v2435_v48, %v2435_v48 }
 0x284   : > { %v3148_v16 = vsel %vm3110_vm10, %v8883_v15, %v3147_v51  ;;  %v5466_v62 = vrot.slane %v2435_v48, 9  ;;  %v3223_v29 = vsel %vm830_vm2, %v3221_v24, %v3222_v0  ;;  %v8226_v35 = vsel %vm663_vm0, %v3169_v27, 0.0 }
 0x285   : > { %v2461_v12 = vcombine.high %v2459_v60, %v2459_v60  ;;  %v5471_v44 = vrot.slane %v2460_v31, 9  ;;  %v5472_v37 = vrot.slane %v2459_v60, 9  ;;  %v2778_v32 = vmax.f32 %v2452_v36, %v5470_v26  ;;  %3241 = vrot.lane.b32.xlu1 %v3223_v29, %s6407_s14 }
 0x286   : > { %v2444_v10 = vcombine.high %v2442_v3, %v2442_v3  ;;  %v5467_v9 = vrot.slane %v2443_v47, 9  ;;  %v5468_v18 = vrot.slane %v2442_v3, 9  ;;  %v2774_v8 = vmax.f32 %v2435_v48, %v5466_v62 }
 0x287   : > { %v5473_v43 = vrot.slane %v2461_v12, 9  ;;  %v3224_v58 = vrot.slane %v8216_v50, 1  ;;  %v8884_v7 = vrot.slane %v8064_v21, %v7515_v54  ;;  %v3153_v11 = vsel %vm3106_vm8, %v3053_v4, %v3152_v45 }
 0x288   : > { %v2779_v17 = vmax.f32 %v2460_v31, %v5471_v44  ;;  %v5469_v20 = vrot.slane %v2444_v10, 9  ;;  %v2775_v59 = vmax.f32 %v2443_v47, %v5467_v9  ;;  %v2776_v2 = vmax.f32 %v2442_v3, %v5468_v18 }
 0x289   : > { %v3149_v19 = vsel %vm3112_vm11, %v8884_v7, %v3148_v16  ;;  %v2780_v49 = vmax.f32 %v2459_v60, %v5472_v37  ;;  %v3089_v63 = vrot.slane %v2778_v32, %v7515_v54  ;;  %v3073_v39 = vrot.slane %v2774_v8, %v7515_v54  ;;  %v8887_v7 = vld [vmem:[#allocation11_spill] sm:$0xff] }
 0x28a   : > { %v3225_v28 = vrot.slane %v8226_v35, 1  ;;  %v2777_v55 = vmax.f32 %v2444_v10, %v5469_v20  ;;  %v3077_v30 = vrot.slane %v2775_v59, %v7515_v54  ;;  %v3081_v21 = vrot.slane %v2776_v2, %v7515_v54  ;;  %v540_v59 = vld [vmem:[%s8810_s4 + $0x78] sm:$0xff] }
 0x28b   : > { %v3150_v27 = vsel %vm3114_vm12, %v3037_v52, %v3149_v19  ;;  %v2781_v51 = vmax.f32 %v2461_v12, %v5473_v43  ;;  %v3154_v25 = vsel %vm3108_vm9, %v3057_v53, %v3153_v11  ;;  %v3093_v36 = vrot.slane %v2779_v17, %v7515_v54  ;;  %v8885_v43 = vld [vmem:[#allocation12_spill] sm:$0xff] }
 0x28c   : > { %v3226_v4 = vsel %vm830_vm2, %v3224_v58, %v3225_v28  ;;  %v3170_v45 = vrot.slane %v3150_v27, 7  ;;  %v3085_v40 = vrot.slane %v2777_v55, %v7515_v54  ;;  %v3158_v48 = vsel %vm3102_vm6, %v3077_v30, %v3073_v39  ;;  %v536_v39 = vld [vmem:[%s8810_s4 + $0x58] sm:$0xff]  ;;  %v535_v28 = vld [vmem:[%s8810_s4 + $0x50] sm:$0xff]  ;;  %v534_v55 = vld [vmem:[%s8810_s4 + $0x48] sm:$0xff] }
 0x28d   : > { %3243 = vrot.lane.b32.xlu0 %v3226_v4, %s6407_s14  ;;  %v3155_v52 = vsel %vm3110_vm10, %v3061_v42, %v3154_v25  ;;  %v3159_v24 = vsel %vm3104_vm7, %v3081_v21, %v3158_v48  ;;  %v3097_v60 = vrot.slane %v2780_v49, %v7515_v54  ;;  %v3101_v47 = vrot.slane %v2781_v51, %v7515_v54  ;;  %v539_v49 = vld [vmem:[%s8810_s4 + $0x70] sm:$0xff]  ;;  %v533_v30 = vld [vmem:[%s8810_s4 + $0x40] sm:$0xff]  ;;  %v530_v25 = vld [vmem:[%s8810_s4 + $0x28] sm:$0xff] }
 0x28e   : > { %v8256_v0 = vsel %vm663_vm0, 0.0, %v3170_v45  ;;  %v8259_v38 = vsel %vm663_vm0, %v3170_v45, 0.0  ;;  %v3156_v53 = vsel %vm3112_vm11, %v3065_v5, %v3155_v52  ;;  %v3160_v42 = vsel %vm3106_vm8, %v3085_v40, %v3159_v24  ;;  %v532_v45 = vld [vmem:[%s8810_s4 + $0x38] sm:$0xff]  ;;  %v527_v48 = vld [vmem:[%s8810_s4 + $0x10] sm:$0xff]  ;;  %v526_v52 = vld [vmem:[%s8810_s4 + $0x8] sm:$0xff] }
 0x28f   : > { %v3227_v15 = vrot.slane %v8256_v0, 1  ;;  %v3228_v16 = vrot.slane %v8259_v38, 1  ;;  %v3157_v22 = vsel %vm3114_vm12, %v3069_v1, %v3156_v53  ;;  %v3161_v26 = vsel %vm3108_vm9, %v3089_v63, %v3160_v42  ;;  %v538_v63 = vld [vmem:[%s8810_s4 + $0x68] sm:$0xff]  ;;  %v528_v40 = vld [vmem:[%s8810_s4 + $0x18] sm:$0xff]  ;;  %v525_v24 = vld [vmem:[%s8810_s4] sm:$0xff] }
 0x290   : > { %v3171_v31 = vrot.slane %v3157_v22, 7  ;;  %v3162_v34 = vsel %vm3110_vm10, %v3093_v36, %v3161_v26  ;;  %v8886_v58 = vrot.slane %v8885_v43, 1  ;;  %v8888_v19 = vrot.slane %v8887_v7, 1  ;;  %v529_v36 = vld [vmem:[%s8810_s4 + $0x20] sm:$0xff]  ;;  %v548_v42 = vld [vmem:[%s8810_s4 + $0xb8] sm:$0xff] }
 0x291   : > { %v3229_v3 = vsel %vm830_vm2, %v3227_v15, %v3228_v16  ;;  %v3163_v62 = vsel %vm3112_vm11, %v3097_v60, %v3162_v34  ;;  %v3264_v21 = vrot.slane %v8137_v33, 2  ;;  %v3265_v27 = vrot.slane %v8140_v6, 2  ;;  %v546_v60 = vld [vmem:[%s8810_s4 + $0xa8] sm:$0xff] }
 0x292   : > { %3245 = vrot.lane.b32.xlu1 %v3229_v3, %s6407_s14  ;;  %v8276_v5 = vsel %vm663_vm0, 0.0, %v3171_v31  ;;  %v8279_v1 = vsel %vm663_vm0, %v3171_v31, 0.0  ;;  %v3164_v44 = vsel %vm3114_vm12, %v3101_v47, %v3163_v62  ;;  %v3211_v11 = vsel %vm830_vm2, %v8888_v19, %v8886_v58  ;;  %v545_v31 = vld [vmem:[%s8810_s4 + $0xa0] sm:$0xff]  ;;  %v544_v62 = vld [vmem:[%s8810_s4 + $0x98] sm:$0xff] }
 0x293   : > { %v3230_v29 = vrot.slane %v8276_v5, 1  ;;  %v3231_v12 = vrot.slane %v8279_v1, 1  ;;  %v3172_v37 = vrot.slane %v3164_v44, 7  ;;  %v8354_v6 = vsel %vm1007_vm1, %v3264_v21, %v3265_v27  ;;  %v542_v44 = vld [vmem:[%s8810_s4 + $0x88] sm:$0xff]  ;;  %v4077_v21 = vld [vmem:[#allocation6 + $0x70] sm:$0xff] }
 0x294   : > { %v3267_v53 = vrot.slane %v8202_v61, 2  ;;  %v3268_v15 = vrot.slane %v8205_v23, 2  ;;  %v3270_v26 = vrot.slane %v8216_v50, 2  ;;  %v3271_v3 = vrot.slane %v8226_v35, 2  ;;  %v4109_v27 = vld [vmem:[#allocation6 + $0x170] sm:$0xff] }
 0x295   : > { %v3232_v32 = vsel %vm830_vm2, %v3230_v29, %v3231_v12  ;;  %v8288_v10 = vsel %vm663_vm0, 0.0, %v3172_v37  ;;  %v8291_v9 = vsel %vm663_vm0, %v3172_v37, 0.0  ;;  %v3273_v29 = vrot.slane %v8256_v0, 2 }
 0x296   : > { %3247 = vrot.lane.b32.xlu0 %v3232_v32, %s6407_s14  ;;  %v3289_v18 = vrot.slane %v8288_v10, 1  ;;  %v3290_v8 = vrot.slane %v8291_v9, 1  ;;  %v8401_v23 = vsel %vm1007_vm1, %v3267_v53, %v3268_v15  ;;  %v3272_v35 = vsel %vm1007_vm1, %v3270_v26, %v3271_v3  ;;  %v4074_v53 = vld [vmem:[#allocation6 + $0x58] sm:$0xff]  ;;  %v4072_v26 = vld [vmem:[#allocation6 + $0x48] sm:$0xff] }
 0x297   : > { %v3274_v12 = vrot.slane %v8259_v38, 2  ;;  %v541_v38 = vld [vmem:[%s8810_s4 + $0x80] sm:$0xff]  ;;  %v3277_v58 = vrot.slane %v8279_v1, 2  ;;  %v4104_v3 = vld [vmem:[#allocation6 + $0x148] sm:$0xff] }
 0x298   : > { %v3291_v17 = vsel %vm830_vm2, %v3289_v18, %v3290_v8  ;;  %v3276_v8 = vrot.slane %v8276_v5, 2  ;;  %v4106_v15 = vld [vmem:[#allocation6 + $0x158] sm:$0xff] }
 0x299   : > { %3292 = vrot.lane.b32.xlu1 %v3291_v17, %s6407_s14  ;;  %v3275_v18 = vsel %vm1007_vm1, %v3273_v29, %v3274_v12  ;;  %v3295_v17 = vrot.slane %v8288_v10, 2  ;;  %v4118_v29 = vld [vmem:[#allocation6 + $0x1b8] sm:$0xff] }
 0x29a   : > { %3233 = vrot.lane.b32.xlu0 %v3211_v11, %s6407_s14  ;;  %v3278_v11 = vsel %vm1007_vm1, %v3276_v8, %v3277_v58  ;;  %s484_s14 = scalar_lea.vmem %s8807_s1, %s8900_s12  ;;  %v4070_v12 = vld [vmem:[#allocation6 + $0x38] sm:$0xff]  ;;  %v4084_v8 = vld [vmem:[#allocation6 + $0xa8] sm:$0xff] }
 0x29b   : > { %v4116_v58 = vld [vmem:[#allocation6 + $0x1a8] sm:$0xff] }
 0x2c8   : > { %v3236_v20 = vpop.permute.xlu0 %3235 }
 0x2c9   : > { %v8308_v2 = vsel %vm1217_vm4, %v7945_v46, %v3236_v20  ;;  %v537_v46 = vld [vmem:[%s8810_s4 + $0x60] sm:$0xff]  ;;  %v3296_v20 = vrot.slane %v8291_v9, 2  ;;  %v8889_v9 = vrot.slane %v8885_v43, 2 }
 0x2ca   : > { %3380 = vmatmul.mubr.f32.vlgmr.msra.gmra.mxu1 %v8308_v2  ;;  %v4060_v43 = vld [vmem:[%s484_s14] sm:$0x1] }
 0x2cb   : > { %5475 = vmatprep.mubr.msk.f32.mxu1 %vm1217_vm4, %v8055_v13  ;;  %3423 = vmatpush1.msra.mxu1 %v540_v59 }
 0x2cc   : > { %3424 = vmatprep.subr.mxu1 %v8858_v14 }
 0x2cd   : > { %3425 = vmatpush1.msra.mxu1 %v539_v49 }
 0x2ce   : > { %3426 = vmatprep.subr.mxu1 %v8858_v14 }
 0x2cf   : > { %3427 = vmatpush1.msra.mxu1 %v538_v63 }
 0x2d0   : > { %3428 = vmatprep.subr.mxu1 %v8858_v14 }
 0x2d1   : > { %3429 = vmatpush1.msra.mxu1 %v537_v46  ;;  %v8890_v46 = vrot.slane %v8887_v7, 2 }
 0x2d2   : > { %3430 = vmatprep.subr.mxu1 %v8858_v14 }
 0x2d3   : > { %3431 = vmatpush1.msra.mxu1 %v536_v39  ;;  %v3257_v39 = vsel %vm1007_vm1, %v8890_v46, %v8889_v9  ;;  %v4081_v9 = vld [vmem:[#allocation6 + $0x90] sm:$0xff] }
 0x2d4   : > { %3432 = vmatprep.subr.mxu1 %v8858_v14 }
 0x2d5   : > { %3433 = vmatpush1.msra.mxu1 %v535_v28 }
 0x2d6   : > { %3434 = vmatprep.subr.mxu1 %v8858_v14 }
 0x2d7   : > { %3435 = vmatpush1.msra.mxu1 %v534_v55  ;;  %v4093_v55 = vld [vmem:[#allocation6 + $0xf0] sm:$0xff] }
 0x2d8   : > { %3436 = vmatprep.subr.mxu1 %v8858_v14 }
 0x2d9   : > { %3437 = vmatpush1.msra.mxu1 %v533_v30  ;;  %v4125_v30 = vld [vmem:[#allocation6 + $0x1f0] sm:$0xff] }
 0x2da   : > { %v3238_v51 = vpop.permute.xlu1 %3237  ;;  %3438 = vmatprep.subr.mxu1 %v8858_v14 }
 0x2db   : > { %v8345_v4 = vsel %vm1217_vm4, %v8039_v41, %v3238_v51  ;;  %v531_v41 = vld [vmem:[%s8810_s4 + $0x30] sm:$0xff]  ;;  %3439 = vmatpush1.msra.mxu1 %v532_v45 }
 0x2dc   : > { %3385 = vmatmul.mubr.f32.gmra.mxu1 %v8345_v4  ;;  %3592 = vmatmul.mubr.f32.vlgmr.msra.gmra.mxu0 %v8345_v4  ;;  %v4092_v51 = vld [vmem:[#allocation6 + $0xe8] sm:$0xff] }
 0x2dd   : > { %5476 = vmatprep.mubr.msk.f32.mxu1 %vm1217_vm4, %v8354_v6  ;;  %5491 = vmatprep.mubr.msk.f32.mxu0 %vm1217_vm4, %v8354_v6  ;;  %v4076_v45 = vld [vmem:[#allocation6 + $0x68] sm:$0xff] }
 0x2de   : > { %3440 = vmatprep.subr.mxu1 %v8858_v14 }
 0x2df   : > { %3441 = vmatpush1.msra.mxu1 %v531_v41  ;;  %v4091_v41 = vld [vmem:[#allocation6 + $0xe0] sm:$0xff] }
 0x2e0   : > { %3442 = vmatprep.subr.mxu1 %v8858_v14 }
 0x2e1   : > { %3443 = vmatpush1.msra.mxu1 %v530_v25  ;;  %v4123_v25 = vld [vmem:[#allocation6 + $0x1e0] sm:$0xff] }
 0x2e2   : > { %3444 = vmatprep.subr.mxu1 %v8858_v14 }
 0x2e3   : > { %3445 = vmatpush1.msra.mxu1 %v529_v36  ;;  %v4075_v36 = vld [vmem:[#allocation6 + $0x60] sm:$0xff] }
 0x2e4   : > { %3446 = vmatprep.subr.mxu1 %v8858_v14 }
 0x2e5   : > { %3447 = vmatpush1.msra.mxu1 %v528_v40  ;;  %v4107_v40 = vld [vmem:[#allocation6 + $0x160] sm:$0xff] }
 0x2e6   : > { %3448 = vmatprep.subr.mxu1 %v8858_v14 }
 0x2e7   : > { %3449 = vmatpush1.msra.mxu1 %v527_v48  ;;  %v4090_v48 = vld [vmem:[#allocation6 + $0xd8] sm:$0xff] }
 0x2e8   : > { %3450 = vmatprep.subr.mxu1 %v8858_v14 }
 0x2e9   : > { %3451 = vmatpush1.msra.mxu1 %v526_v52  ;;  %v4122_v52 = vld [vmem:[#allocation6 + $0x1d8] sm:$0xff] }
 0x2ea   : > { %3452 = vmatprep.subr.mxu1 %v8858_v14 }
 0x2eb   : > { %3453 = vmatpush1.msra.mxu1 %v525_v24 }
 0x2ec   : > { %v3240_v16 = vpop.permute.xlu0 %3239  ;;  %3470 = vmatprep.subr.mxu1 %v8858_v14 }
 0x2ed   : > { %v8392_v22 = vsel %vm1217_vm4, %v8137_v33, %v3240_v16  ;;  %v547_v33 = vld [vmem:[%s8810_s4 + $0xb0] sm:$0xff]  ;;  %3471 = vmatpush2.msra.mxu1 %v548_v42 }
 0x2ee   : > { %3390 = vmatmul.mubr.f32.gmra.mxu1 %v8392_v22  ;;  %3597 = vmatmul.mubr.f32.gmra.mxu0 %v8392_v22  ;;  %v4121_v42 = vld [vmem:[#allocation6 + $0x1d0] sm:$0xff] }
 0x2ef   : > { %5477 = vmatprep.mubr.msk.f32.mxu1 %vm1217_vm4, %v8401_v23  ;;  %5492 = vmatprep.mubr.msk.f32.mxu0 %vm1217_vm4, %v8401_v23 }
 0x2f0   : > { %3472 = vmatprep.subr.mxu1 %v8858_v14 }
 0x2f1   : > { %3473 = vmatpush2.msra.mxu1 %v547_v33  ;;  %v4105_v33 = vld [vmem:[#allocation6 + $0x150] sm:$0xff] }
 0x2f2   : > { %3474 = vmatprep.subr.mxu1 %v8858_v14 }
 0x2f3   : > { %3475 = vmatpush2.msra.mxu1 %v546_v60  ;;  %v4088_v60 = vld [vmem:[#allocation6 + $0xc8] sm:$0xff] }
 0x2f4   : > { %3476 = vmatprep.subr.mxu1 %v8858_v14 }
 0x2f5   : > { %3477 = vmatpush2.msra.mxu1 %v545_v31  ;;  %v4120_v31 = vld [vmem:[#allocation6 + $0x1c8] sm:$0xff] }
 0x2f6   : > { %3478 = vmatprep.subr.mxu1 %v8858_v14 }
 0x2f7   : > { %v3242_v47 = vpop.permute.xlu1 %3241  ;;  %3479 = vmatpush2.msra.mxu1 %v544_v62  ;;  %v4071_v62 = vld [vmem:[#allocation6 + $0x40] sm:$0xff] }
 0x2f8   : > { %v8423_v34 = vsel %vm1217_vm4, %v8202_v61, %v3242_v47  ;;  %v543_v61 = vld [vmem:[%s8810_s4 + $0x90] sm:$0xff]  ;;  %3480 = vmatprep.subr.mxu1 %v8858_v14  ;;  %v4087_v47 = vld [vmem:[#allocation6 + $0xc0] sm:$0xff] }
 0x2f9   : > { %3395 = vmatmul.mubr.f32.gmra.mxu1 %v8423_v34  ;;  %3602 = vmatmul.mubr.f32.gmra.mxu0 %v8423_v34 }
 0x2fa   : > { %5478 = vmatprep.mubr.msk.f32.mxu1 %vm1217_vm4, %v3272_v35  ;;  %5493 = vmatprep.mubr.msk.f32.mxu0 %vm1217_vm4, %v3272_v35 }
 0x2fb   : > { %3481 = vmatpush2.msra.mxu1 %v543_v61  ;;  %v4086_v61 = vld [vmem:[#allocation6 + $0xb8] sm:$0xff] }
 0x2fc   : > { %3482 = vmatprep.subr.mxu1 %v8858_v14 }
 0x2fd   : > { %3483 = vmatpush2.msra.mxu1 %v542_v44  ;;  %v4102_v44 = vld [vmem:[#allocation6 + $0x138] sm:$0xff] }
 0x2fe   : > { %3484 = vmatprep.subr.mxu1 %v8858_v14 }
 0x2ff   : > { %v3244_v37 = vpop.permute.xlu0 %3243  ;;  %3485 = vmatpush2.msra.mxu1 %v541_v38  ;;  %v4101_v38 = vld [vmem:[#allocation6 + $0x130] sm:$0xff] }
 0x300   : > { %v3284_v32 = vsel %vm1217_vm4, %v8216_v50, %v3244_v37  ;;  %6177 = vmatprep.subr.mxu1 %v8858_v14  ;;  %v4085_v37 = vld [vmem:[#allocation6 + $0xb0] sm:$0xff] }
 0x301   : > { %3400 = vmatmul.mubr.f32.gmra.mxu1 %v3284_v32  ;;  %3607 = vmatmul.mubr.f32.gmra.mxu0 %v3284_v32 }
 0x302   : > { %5479 = vmatprep.mubr.msk.f32.mxu1 %vm1217_vm4, %v3275_v18  ;;  %5494 = vmatprep.mubr.msk.f32.mxu0 %vm1217_vm4, %v3275_v18 }
 0x304   : > { %v3246_v50 = vpop.permute.xlu1 %3245 }
 0x305   : > { %v3285_v19 = vsel %vm1217_vm4, %v8256_v0, %v3246_v50  ;;  %v3297_v0 = vsel %vm1007_vm1, %v3295_v17, %v3296_v20  ;;  %v4068_v50 = vld [vmem:[#allocation6 + $0x28] sm:$0xff]  ;;  %v4115_v17 = vld [vmem:[#allocation6 + $0x1a0] sm:$0xff] }
 0x306   : > { %3405 = vmatmul.mubr.f32.gmra.mxu1 %v3285_v19  ;;  %3612 = vmatmul.mubr.f32.gmra.mxu0 %v3285_v19  ;;  %v4067_v20 = vld [vmem:[#allocation6 + $0x20] sm:$0xff] }
 0x307   : > { %5480 = vmatprep.mubr.msk.f32.mxu1 %vm1217_vm4, %v3278_v11  ;;  %5495 = vmatprep.mubr.msk.f32.mxu0 %vm1217_vm4, %v3278_v11 }
 0x308   : > { %v3248_v1 = vpop.permute.xlu0 %3247 }
 0x309   : > { %v3286_v59 = vsel %vm1217_vm4, %v8276_v5, %v3248_v1  ;;  %v4099_v1 = vld [vmem:[#allocation6 + $0x120] sm:$0xff] }
 0x30a   : > { %3410 = vmatmul.mubr.f32.gmra.mxu1 %v3286_v59  ;;  %3617 = vmatmul.mubr.f32.gmra.mxu0 %v3286_v59 }
 0x30b   : > { %5481 = vmatprep.mubr.msk.f32.mxu1 %vm1217_vm4, %v3297_v0  ;;  %5496 = vmatprep.mubr.msk.f32.mxu0 %vm1217_vm4, %v3297_v0  ;;  %v3293_v49 = vpop.permute.xlu1 %3292  ;;  %v4114_v0 = vld [vmem:[#allocation6 + $0x198] sm:$0xff] }
 0x30c   : > { %v3234_v63 = vpop.permute.xlu0 %3233  ;;  %v3298_v28 = vsel %vm1217_vm4, %v8288_v10, %v3293_v49  ;;  %v4126_v10 = vld [vmem:[#allocation6 + $0x1f8] sm:$0xff] }
 0x30d   : > { %v3279_v5 = vsel %vm1217_vm4, %v8887_v7, %v3234_v63  ;;  %v4078_v7 = vld [vmem:[#allocation6 + $0x78] sm:$0xff] }
 0x30e   : > { %3415 = vmatmul.mubr.f32.gmra.mxu1 %v3298_v28  ;;  %3622 = vmatmul.mubr.f32.gmra.mxu0 %v3298_v28  ;;  %v4066_v49 = vld [vmem:[#allocation6 + $0x18] sm:$0xff]  ;;  %v4113_v28 = vld [vmem:[#allocation6 + $0x190] sm:$0xff] }
 0x30f   : > { %5482 = vmatprep.mubr.msk.f32.mxu1 %vm1217_vm4, %v3257_v39  ;;  %5497 = vmatprep.mubr.msk.f32.mxu0 %vm1217_vm4, %v3257_v39  ;;  %v4098_v63 = vld [vmem:[#allocation6 + $0x118] sm:$0xff] }
 0x312   : > { %3487 = vmatmul.mubr.f32.vlgmr.msra.gmra.mxu1 %v3279_v5  ;;  %3627 = vmatmul.mubr.f32.gmra.mxu0 %v3279_v5  ;;  %v4065_v5 = vld [vmem:[#allocation6 + $0x10] sm:$0xff] }
 0x313   : > { %5483 = vmatprep.mubr.msk.f32.mxu1 %vm1217_vm4, %v7978_v56  ;;  %v4319_v56 = vld [vmem:[%s8813_s7] sm:$0xf] }
 0x314   : > { %6178 = vmatpush3.msk.msra.mxu1 %vm4324_vm13, %v4319_v56  ;;  %v4097_v56 = vld [vmem:[#allocation6 + $0x110] sm:$0xff] }
 0x315   : > { %5690 = vmatprep.subr.mxu1 %v4126_v10 }
 0x316   : > { %3492 = vmatmul.mubr.f32.gmra.mxu1 %v8308_v2  ;;  %v4110_v2 = vld [vmem:[#allocation6 + $0x178] sm:$0xff] }
 0x317   : > { %5484 = vmatprep.mubr.msk.f32.mxu1 %vm1217_vm4, %v8055_v13  ;;  %v4094_v13 = vld [vmem:[#allocation6 + $0xf8] sm:$0xff] }
 0x318   : > { %5655 = vmatprep.subr.mxu0 %v4094_v13  ;;  %v4080_v13 = vld [vmem:[#allocation6 + $0x88] sm:$0xff] }
 0x319   : > { %5656 = vmatpush3.msra.mxu0 %v4078_v7  ;;  %v4112_v7 = vld [vmem:[#allocation6 + $0x188] sm:$0xff] }
 0x31a   : > { %3497 = vmatmul.mubr.f32.gmra.mxu1 %v8345_v4  ;;  %5657 = vmatprep.subr.mxu0 %v4093_v55  ;;  %v4124_v4 = vld [vmem:[#allocation6 + $0x1e8] sm:$0xff] }
 0x31b   : > { %5485 = vmatprep.mubr.msk.f32.mxu1 %vm1217_vm4, %v8354_v6  ;;  %5658 = vmatpush3.msra.mxu0 %v4077_v21  ;;  %v4108_v6 = vld [vmem:[#allocation6 + $0x168] sm:$0xff]  ;;  %v4111_v21 = vld [vmem:[#allocation6 + $0x180] sm:$0xff] }
 0x31c   : > { %5659 = vmatprep.subr.mxu0 %v4092_v51  ;;  %v4096_v55 = vld [vmem:[#allocation6 + $0x108] sm:$0xff]  ;;  %v4095_v51 = vld [vmem:[#allocation6 + $0x100] sm:$0xff] }
 0x31d   : > { %5660 = vmatpush3.msra.mxu0 %v4076_v45  ;;  %v4190_v45 = vld [vmem:[#allocation6 + $0x3f8] sm:$0xff] }
 0x31e   : > { %3502 = vmatmul.mubr.f32.gmra.mxu1 %v8392_v22  ;;  %5661 = vmatprep.subr.mxu0 %v4091_v41  ;;  %v4089_v22 = vld [vmem:[#allocation6 + $0xd0] sm:$0xff] }
 0x31f   : > { %5486 = vmatprep.mubr.msk.f32.mxu1 %vm1217_vm4, %v8401_v23  ;;  %5662 = vmatpush3.msra.mxu0 %v4075_v36  ;;  %v4073_v23 = vld [vmem:[#allocation6 + $0x50] sm:$0xff] }
 0x320   : > { %5663 = vmatprep.subr.mxu0 %v4090_v48 }
 0x321   : > { %5664 = vmatpush3.msra.mxu0 %v4074_v53 }
 0x322   : > { %3507 = vmatmul.mubr.f32.gmra.mxu1 %v8423_v34  ;;  %5665 = vmatprep.subr.mxu0 %v4089_v22  ;;  %v4119_v34 = vld [vmem:[#allocation6 + $0x1c0] sm:$0xff] }
 0x323   : > { %5487 = vmatprep.mubr.msk.f32.mxu1 %vm1217_vm4, %v3272_v35  ;;  %5666 = vmatpush3.msra.mxu0 %v4073_v23  ;;  %v4103_v35 = vld [vmem:[#allocation6 + $0x140] sm:$0xff] }
 0x324   : > { %5667 = vmatprep.subr.mxu0 %v4088_v60 }
 0x325   : > { %5668 = vmatpush3.msra.mxu0 %v4072_v26 }
 0x326   : > { %3512 = vmatmul.mubr.f32.gmra.mxu1 %v3284_v32  ;;  %5669 = vmatprep.subr.mxu0 %v4087_v47  ;;  %v4117_v32 = vld [vmem:[#allocation6 + $0x1b0] sm:$0xff] }
 0x327   : > { %5488 = vmatprep.mubr.msk.f32.mxu1 %vm1217_vm4, %v3275_v18  ;;  %5670 = vmatpush3.msra.mxu0 %v4071_v62  ;;  %v4069_v18 = vld [vmem:[#allocation6 + $0x30] sm:$0xff] }
 0x328   : > { %5671 = vmatprep.subr.mxu0 %v4086_v61 }
 0x329   : > { %5672 = vmatpush3.msra.mxu0 %v4070_v12 }
 0x32a   : > { %3517 = vmatmul.mubr.f32.gmra.mxu1 %v3285_v19  ;;  %5673 = vmatprep.subr.mxu0 %v4085_v37  ;;  %v4100_v19 = vld [vmem:[#allocation6 + $0x128] sm:$0xff] }
 0x32b   : > { %5489 = vmatprep.mubr.msk.f32.mxu1 %vm1217_vm4, %v3278_v11  ;;  %5674 = vmatpush3.msra.mxu0 %v4069_v18  ;;  %v4083_v11 = vld [vmem:[#allocation6 + $0xa0] sm:$0xff] }
 0x32c   : > { %5675 = vmatprep.subr.mxu0 %v4084_v8  ;;  %v8528_v8 = vld [vmem:[%s8811_s5] ss:$0 sm:$0xff] }
 0x32d   : > { %5676 = vmatpush3.msra.mxu0 %v4068_v50 }
 0x32e   : > { %3522 = vmatmul.mubr.f32.gmra.mxu1 %v3286_v59  ;;  %v4082_v59 = vld [vmem:[#allocation6 + $0x98] sm:$0xff]  ;;  %5677 = vmatprep.subr.mxu0 %v4083_v11 }
 0x32f   : > { %6179 = vmatprep.mubr.msk.f32.mxu1 %vm6411_vm14, %v8858_v14  ;;  %5678 = vmatpush3.msra.mxu0 %v4067_v20 }
 0x330   : > { %5679 = vmatprep.subr.mxu0 %v4082_v59 }
 0x331   : > { %5680 = vmatpush3.msra.mxu0 %v4066_v49 }
 0x332   : > { %6180 = vmatmul.mubr.msk.f32.vlgmr.msra.gmra.mxu1 %vm4320_vm15, %v4060_v43  ;;  %5681 = vmatprep.subr.mxu0 %v4081_v9 }
 0x333   : > { %5691 = vmatpush3.msra.mxu1 %v4110_v2  ;;  %v4064_v2 = vld [vmem:[#allocation6 + $0x8] sm:$0xff]  ;;  %5682 = vmatpush3.msra.mxu0 %v4065_v5 }
 0x334   : > { %5692 = vmatprep.subr.mxu1 %v4125_v30  ;;  %v4079_v30 = vld [vmem:[#allocation6 + $0x80] sm:$0xff]  ;;  %5683 = vmatprep.subr.mxu0 %v4080_v13 }
 0x335   : > { %5693 = vmatpush3.msra.mxu1 %v4109_v27  ;;  %v4063_v27 = vld [vmem:[#allocation6] sm:$0xff]  ;;  %5684 = vmatpush3.msra.mxu0 %v4064_v2 }
 0x336   : > { %5694 = vmatprep.subr.mxu1 %v4124_v4  ;;  %v4158_v4 = vld [vmem:[#allocation6 + $0x2f8] sm:$0xff]  ;;  %5685 = vmatprep.subr.mxu0 %v4079_v30 }
 0x337   : > { %5695 = vmatpush3.msra.mxu1 %v4108_v6  ;;  %5686 = vmatpush3.msra.mxu0 %v4063_v27 }
 0x338   : > { %5696 = vmatprep.subr.mxu1 %v4123_v25  ;;  %5725 = vmatprep.subr.mxu0 %v4158_v4 }
 0x339   : > { %5697 = vmatpush3.msra.mxu1 %v4107_v40 }
 0x33a   : > { %5698 = vmatprep.subr.mxu1 %v4122_v52 }
 0x33b   : > { %5699 = vmatpush3.msra.mxu1 %v4106_v15 }
 0x33c   : > { %5700 = vmatprep.subr.mxu1 %v4121_v42 }
 0x33d   : > { %5701 = vmatpush3.msra.mxu1 %v4105_v33 }
 0x33e   : > { %5702 = vmatprep.subr.mxu1 %v4120_v31 }
 0x33f   : > { %5703 = vmatpush3.msra.mxu1 %v4104_v3 }
 0x340   : > { %5704 = vmatprep.subr.mxu1 %v4119_v34 }
 0x341   : > { %5705 = vmatpush3.msra.mxu1 %v4103_v35 }
 0x342   : > { %5706 = vmatprep.subr.mxu1 %v4118_v29 }
 0x343   : > { %5707 = vmatpush3.msra.mxu1 %v4102_v44 }
 0x344   : > { %5708 = vmatprep.subr.mxu1 %v4117_v32 }
 0x345   : > { %5709 = vmatpush3.msra.mxu1 %v4101_v38 }
 0x346   : > { %5710 = vmatprep.subr.mxu1 %v4116_v58 }
 0x347   : > { %5711 = vmatpush3.msra.mxu1 %v4100_v19 }
 0x348   : > { %5712 = vmatprep.subr.mxu1 %v4115_v17 }
 0x349   : > { %5713 = vmatpush3.msra.mxu1 %v4099_v1 }
 0x34a   : > { %5714 = vmatprep.subr.mxu1 %v4114_v0 }
 0x34b   : > { %5715 = vmatpush3.msra.mxu1 %v4098_v63 }
 0x34c   : > { %5716 = vmatprep.subr.mxu1 %v4113_v28 }
 0x34d   : > { %5717 = vmatpush3.msra.mxu1 %v4097_v56 }
 0x34e   : > { %5718 = vmatprep.subr.mxu1 %v4112_v7 }
 0x34f   : > { %5719 = vmatpush3.msra.mxu1 %v4096_v55 }
 0x350   : > { %5720 = vmatprep.subr.mxu1 %v4111_v21 }
 0x351   : > { %5721 = vmatpush3.msra.mxu1 %v4095_v51 }
 0x352   : > { %5760 = vmatprep.subr.mxu1 %v4190_v45 }
 0x38a   : > { %v8507_v24 = vpop.f32.mrf.mxu1 }
 0x38c   : > { %v3383_v16 = vpop.f32.mrf.mxu1 }
 0x39c   : > { %v8509_v46 = vpop.f32.mrf.mxu1  ;;  %v8511_v39 = vpop.f32.mrf.mxu0 }
 0x39e   : > { %v3388_v10 = vpop.f32.mrf.mxu1  ;;  %v3595_v43 = vpop.f32.mrf.mxu0 }
 0x3ae   : > { %v3391_v6 = vpop.f32.mrf.mxu1  ;;  %v3598_v41 = vpop.f32.mrf.mxu0 }
 0x3b0   : > { %v3393_v25 = vpop.f32.mrf.mxu1  ;;  %v3600_v36 = vpop.f32.mrf.mxu0 }
 0x3b9   : > { %v3396_v40 = vpop.f32.mrf.mxu1  ;;  %v3603_v48 = vpop.f32.mrf.mxu0 }
 0x3bb   : > { %v3398_v52 = vpop.f32.mrf.mxu1  ;;  %v3605_v53 = vpop.f32.mrf.mxu0 }
 0x3c1   : > { %v3401_v15 = vpop.f32.mrf.mxu1  ;;  %v3608_v16 = vpop.f32.mrf.mxu0 }
 0x3c3   : > { %v3403_v22 = vpop.f32.mrf.mxu1  ;;  %v3610_v42 = vpop.f32.mrf.mxu0 }
 0x3c6   : > { %v3406_v23 = vpop.f32.mrf.mxu1  ;;  %v3613_v33 = vpop.f32.mrf.mxu0 }
 0x3c8   : > { %v3408_v60 = vpop.f32.mrf.mxu1  ;;  %v3615_v31 = vpop.f32.mrf.mxu0 }
 0x3ca   : > { %v8513_v26 = vpop.f32.mrf.mxu1  ;;  %v8515_v3 = vpop.f32.mrf.mxu0 }
 0x3cc   : > { %v3413_v47 = vpop.f32.mrf.mxu1  ;;  %v3620_v34 = vpop.f32.mrf.mxu0 }
 0x3ce   : > { %v8517_v62 = vpop.f32.mrf.mxu1  ;;  %v8519_v35 = vpop.f32.mrf.mxu0 }
 0x3d0   : > { %v3418_v61 = vpop.f32.mrf.mxu1  ;;  %v3625_v29 = vpop.f32.mrf.mxu0 }
 0x3d2   : > { %v3488_v12 = vpop.f32.mrf.mxu1  ;;  %v8521_v44 = vpop.f32.mrf.mxu0 }
 0x3d3   : > { %v3489_v37 = vadd.f32 %v3488_v12, %v8507_v24 }
 0x3d4   : > { %v3490_v32 = vpop.f32.mrf.mxu1  ;;  %v3630_v18 = vpop.f32.mrf.mxu0 }
 0x3d5   : > { %v3632_v38 = vadd.f32 %v8511_v39, %v3489_v37 }
 0x3d6   : > { %v3493_v58 = vpop.f32.mrf.mxu1 }
 0x3d7   : > { %v3494_v50 = vadd.f32 %v3493_v58, %v8509_v46  ;;  %v3646_v11 = vadd.f32 %v8528_v8, %v3632_v38 }
 0x3d8   : > { %v3495_v19 = vpop.f32.mrf.mxu1 }
 0x3d9   : > { %v3633_v17 = vadd.f32 %v3598_v41, %v3494_v50  ;;  %v3654_v0 = vmax.f32 %v3646_v11, 0.0 }
 0x3da   : > { %v3498_v20 = vpop.f32.mrf.mxu1 }
 0x3db   : > { %v3647_v1 = vadd.f32 %v8528_v8, %v3633_v17  ;;  %v3499_v24 = vadd.f32 %v3498_v20, %v3391_v6 }
 0x3dc   : > { %v3500_v59 = vpop.f32.mrf.mxu1 }
 0x3dd   : > { %v3655_v49 = vmax.f32 %v3647_v1, 0.0  ;;  %v3634_v63 = vadd.f32 %v3603_v48, %v3499_v24 }
 0x3de   : > { %v3503_v9 = vpop.f32.mrf.mxu1 }
 0x3df   : > { %v3662_v39 = vmax.f32 %v3654_v0, %v3655_v49  ;;  %v3504_v28 = vadd.f32 %v3503_v9, %v3396_v40  ;;  %v3648_v10 = vadd.f32 %v8528_v8, %v3634_v63 }
 0x3e0   : > { %v3505_v5 = vpop.f32.mrf.mxu1 }
 0x3e1   : > { %v3670_v56 = vcombine.high %v3662_v39, %v3662_v39  ;;  %v3677_v13 = vrot.slane %v3662_v39, %v7508_v57  ;;  %v3635_v46 = vadd.f32 %v3608_v16, %v3504_v28  ;;  %v3656_v41 = vmax.f32 %v3648_v10, 0.0 }
 0x3e2   : > { %v3508_v43 = vpop.f32.mrf.mxu1  ;;  %v6412_v16 = vmov 1966171168  }
 0x3e3   : > { %v3684_v7 = vrot.slane %v3670_v56, %v7508_v57  ;;  %v3685_v2 = vcombine.high %v3677_v13, %v3677_v13  ;;  %v5499_v55 = vrot.slane %v3677_v13, 9  ;;  %v3649_v30 = vadd.f32 %v8528_v8, %v3635_v46 }
 0x3e4   : > { %v3509_v21 = vadd.f32 %v3508_v43, %v3401_v15  ;;  %v3510_v27 = vpop.f32.mrf.mxu1  ;;  %v3963_v22 = vunpack.c.l.s4 %v6412_v16 }
 0x3e5   : > { %v3686_v51 = vcombine.high %v3684_v7, %v3684_v7  ;;  %v5500_v4 = vrot.slane %v3685_v2, 9  ;;  %v5501_v45 = vrot.slane %v3684_v7, 9  ;;  %v3802_v6 = vmax.f32 %v3677_v13, %v5499_v55 }
 0x3e6   : > { %v3657_v25 = vmax.f32 %v3649_v30, 0.0  ;;  %v3636_v36 = vadd.f32 %v3613_v33, %v3509_v21  ;;  %v3513_v40 = vpop.f32.mrf.mxu1  ;;  %v3964_v58 = vunpack.c.0.s8 %v3963_v22 }
 0x3e7   : > { %v5502_v48 = vrot.slane %v3686_v51, 9  ;;  %v3803_v52 = vmax.f32 %v3685_v2, %v5500_v4  ;;  %v3804_v53 = vmax.f32 %v3684_v7, %v5501_v45  ;;  %v3837_v42 = vrot.slane %v3802_v6, %v7515_v54 }
 0x3e8   : > { %v3663_v60 = vmax.f32 %v3656_v41, %v3657_v25  ;;  %v3514_v31 = vadd.f32 %v3513_v40, %v3406_v23  ;;  %v3515_v47 = vpop.f32.mrf.mxu1  ;;  %v3650_v29 = vadd.f32 %v8528_v8, %v3636_v36 }
 0x3e9   : > { %v3805_v15 = vmax.f32 %v3686_v51, %v5502_v48  ;;  %v3841_v34 = vrot.slane %v3803_v52, %v7515_v54  ;;  %v3845_v61 = vrot.slane %v3804_v53, %v7515_v54 }
 0x3ea   : > { %v3687_v12 = vcombine.high %v3663_v60, %v3663_v60  ;;  %v3694_v33 = vrot.slane %v3663_v60, %v7508_v57  ;;  %v3637_v37 = vadd.f32 %v8515_v3, %v3514_v31  ;;  %v3518_v32 = vpop.f32.mrf.mxu1  ;;  %v3658_v24 = vmax.f32 %v3650_v29, 0.0 }
 0x3eb   : > { %v3849_v18 = vrot.slane %v3805_v15, %v7515_v54  ;;  %v3898_v38 = vsel %vm3102_vm6, %v3841_v34, %v3837_v42  ;;  %v3519_v23 = vadd.f32 %v3518_v32, %v8513_v26 }
 0x3ec   : > { %v3899_v50 = vsel %vm3104_vm7, %v3845_v61, %v3898_v38  ;;  %v3701_v19 = vrot.slane %v3687_v12, %v7508_v57  ;;  %v3702_v11 = vcombine.high %v3694_v33, %v3694_v33  ;;  %v5503_v17 = vrot.slane %v3694_v33, 9  ;;  %v3520_v20 = vpop.f32.mrf.mxu1 }
 0x3ed   : > { %v3900_v1 = vsel %vm3106_vm8, %v3849_v18, %v3899_v50  ;;  %v3651_v3 = vadd.f32 %v8528_v8, %v3637_v37  ;;  %v3638_v59 = vadd.f32 %v8519_v35, %v3519_v23  ;;  %v8891_v35 = vld [vmem:[#allocation13_spill] sm:$0xff] }
 0x3ee   : > { %v3914_v0 = vsel %vm663_vm0, %v3900_v1, 0.0  ;;  %v3915_v49 = vrot.slane %v3900_v1, 1  ;;  %v3917_v63 = vrot.slane %v3900_v1, 2  ;;  %v3919_v9 = vrot.slane %v3900_v1, 3  ;;  %v3523_v26 = vpop.f32.mrf.mxu1 }
 0x3ef   : > { %v3703_v39 = vcombine.high %v3701_v19, %v3701_v19  ;;  %v5504_v28 = vrot.slane %v3702_v11, 9  ;;  %v5505_v5 = vrot.slane %v3701_v19, 9  ;;  %v3806_v56 = vmax.f32 %v3694_v33, %v5503_v17 }
 0x3f0   : > { %v3916_v13 = vsel %vm663_vm0, %v3915_v49, 0.0  ;;  %v3918_v46 = vsel %vm663_vm0, %v3917_v63, 0.0  ;;  %v3920_v10 = vsel %vm663_vm0, %v3919_v9, 0.0  ;;  %v3659_v43 = vmax.f32 %v3651_v3, 0.0  ;;  %v3525_v7 = vpop.f32.mrf.mxu1 }
 0x3f1   : > { %v3958_v2 = vcombine.low %v3914_v0, %v3916_v13  ;;  %v8556_v55 = vsub.s32 %v3964_v58, %v8891_v35  ;;  %v5506_v30 = vrot.slane %v3703_v39, 9  ;;  %v3807_v21 = vmax.f32 %v3702_v11, %v5504_v28 }
 0x3f2   : > { %v3959_v27 = vcombine.low %v3918_v46, %v3920_v10  ;;  %v3808_v51 = vmax.f32 %v3701_v19, %v5505_v5  ;;  %v3664_v4 = vmax.f32 %v3658_v24, %v3659_v43  ;;  %v3853_v6 = vrot.slane %v3806_v56, %v7515_v54 }
 0x3f3   : > { %v3809_v45 = vmax.f32 %v3703_v39, %v5506_v30  ;;  %v3857_v41 = vrot.slane %v3807_v21, %v7515_v54  ;;  %v3652_v25 = vadd.f32 %v8528_v8, %v3638_v59  ;;  %v3968_v52 = vrot.slane %v3958_v2, %v8556_v55 }
 0x3f4   : > { %v3861_v36 = vrot.slane %v3808_v51, %v7515_v54  ;;  %v3704_v40 = vcombine.high %v3664_v4, %v3664_v4  ;;  %v3711_v48 = vrot.slane %v3664_v4, %v7508_v57  ;;  %v3524_v22 = vadd.f32 %v3523_v26, %v8517_v62 }
 0x3f5   : > { %v3865_v53 = vrot.slane %v3809_v45, %v7515_v54  ;;  %v3901_v16 = vsel %vm3102_vm6, %v3857_v41, %v3853_v6  ;;  %v3975_v15 = vrot.slane %v3959_v27, %v8556_v55  ;;  %v3660_v61 = vmax.f32 %v3652_v25, 0.0 }
 0x3f6   : > { %v3902_v42 = vsel %vm3104_vm7, %v3861_v36, %v3901_v16  ;;  %v3718_v60 = vrot.slane %v3704_v40, %v7508_v57  ;;  %v3719_v31 = vcombine.high %v3711_v48, %v3711_v48  ;;  %v5507_v47 = vrot.slane %v3711_v48, 9 }
 0x3f7   : > { %v3903_v34 = vsel %vm3106_vm8, %v3865_v53, %v3902_v42  ;;  %v3639_v29 = vadd.f32 %v8521_v44, %v3524_v22  ;;  %v3990_v24 = vcombine.low %v3968_v52, %v3975_v15  ;;  %v4406_v30 = vsub.s32 1, %v8891_v35 }
 0x3f8   : > { %v3921_v12 = vsel %vm663_vm0, %v3903_v34, 0.0  ;;  %v3922_v33 = vrot.slane %v3903_v34, 1  ;;  %v3924_v37 = vrot.slane %v3903_v34, 2  ;;  %v3926_v32 = vrot.slane %v3903_v34, 3 }
 0x3f9   : > { %v3720_v18 = vcombine.high %v3718_v60, %v3718_v60  ;;  %v5508_v62 = vrot.slane %v3719_v31, 9  ;;  %v5509_v38 = vrot.slane %v3718_v60, 9  ;;  %v3810_v58 = vmax.f32 %v3711_v48, %v5507_v47 }
 0x3fa   : > { %v3923_v23 = vsel %vm663_vm0, %v3922_v33, 0.0  ;;  %v3925_v50 = vsel %vm663_vm0, %v3924_v37, 0.0  ;;  %v3927_v19 = vsel %vm663_vm0, %v3926_v32, 0.0  ;;  %v3653_v11 = vadd.f32 %v8528_v8, %v3639_v29 }
 0x3fb   : > { %v3960_v17 = vcombine.low %v3921_v12, %v3923_v23  ;;  %v3961_v20 = vcombine.low %v3925_v50, %v3927_v19  ;;  %v5510_v44 = vrot.slane %v3720_v18, 9  ;;  %v3811_v1 = vmax.f32 %v3719_v31, %v5508_v62  ;;  %v4142_v12 = vld [vmem:[#allocation6 + $0x278] sm:$0xff] }
 0x3fc   : > { %v3812_v3 = vmax.f32 %v3718_v60, %v5509_v38  ;;  %v3869_v59 = vrot.slane %v3810_v58, %v7515_v54  ;;  %v3661_v0 = vmax.f32 %v3653_v11, 0.0  ;;  %v3998_v43 = vrot.slane %v3990_v24, %v8556_v55  ;;  %v4174_v38 = vld [vmem:[#allocation6 + $0x378] sm:$0xff]  ;;  %v4157_v58 = vld [vmem:[#allocation6 + $0x2f0] sm:$0xff] }
 0x3fd   : > { %v3982_v49 = vrot.slane %v3960_v17, %v8556_v55  ;;  %v3989_v63 = vrot.slane %v3961_v20, %v8556_v55  ;;  %v3813_v9 = vmax.f32 %v3720_v18, %v5510_v44  ;;  %v3873_v26 = vrot.slane %v3811_v1, %v7515_v54  ;;  %v4189_v11 = vld [vmem:[#allocation6 + $0x3f0] sm:$0xff] }
 0x3fe   : > { %v3877_v39 = vrot.slane %v3812_v3, %v7515_v54  ;;  %v3665_v28 = vmax.f32 %v3660_v61, %v3661_v0  ;;  %v4414_v4 = vsub.s32 3, %v8891_v35  ;;  %v4410_v36 = vsub.s32 2, %v8891_v35  ;;  %v4141_v1 = vld [vmem:[#allocation6 + $0x270] sm:$0xff]  ;;  %v4156_v0 = vld [vmem:[#allocation6 + $0x2e8] sm:$0xff] }
 0x3ff   : > { %v3991_v8 = vcombine.low %v3982_v49, %v3989_v63  ;;  %v3881_v5 = vrot.slane %v3813_v9, %v7515_v54  ;;  %v3904_v56 = vsel %vm3102_vm6, %v3873_v26, %v3869_v59  ;;  %v4422_v53 = vsub.s32 5, %v8891_v35  ;;  %v4173_v59 = vld [vmem:[#allocation6 + $0x370] sm:$0xff]  ;;  %v4188_v63 = vld [vmem:[#allocation6 + $0x3e8] sm:$0xff] }
 0x400   : > { %v3905_v13 = vsel %vm3104_vm7, %v3877_v39, %v3904_v56  ;;  %v3721_v46 = vcombine.high %v3665_v28, %v3665_v28  ;;  %v3728_v10 = vrot.slane %v3665_v28, %v7508_v57  ;;  %v4430_v33 = vsub.s32 7, %v8891_v35  ;;  %v4140_v9 = vld [vmem:[#allocation6 + $0x268] sm:$0xff] }
 0x401   : > { %v4005_v7 = vrot.slane %v3991_v8, %v8556_v55  ;;  %v3906_v2 = vsel %vm3106_vm8, %v3881_v5, %v3905_v13  ;;  %v4172_v8 = vld [vmem:[#allocation6 + $0x368] sm:$0xff]  ;;  %v4155_v5 = vld [vmem:[#allocation6 + $0x2e0] sm:$0xff] }
 0x402   : > { %v3929_v21 = vrot.slane %v3906_v2, 1  ;;  %v3931_v27 = vrot.slane %v3906_v2, 2  ;;  %v3933_v51 = vrot.slane %v3906_v2, 3  ;;  %v3735_v45 = vrot.slane %v3721_v46, %v7508_v57  ;;  %v4187_v46 = vld [vmem:[#allocation6 + $0x3e0] sm:$0xff] }
 0x403   : > { %v3736_v6 = vcombine.high %v3728_v10, %v3728_v10  ;;  %v5511_v41 = vrot.slane %v3728_v10, 9  ;;  %v8592_v25 = vcombine.low %v3998_v43, %v4005_v7  ;;  %v3928_v34 = vsel %vm663_vm0, %v3906_v2, 0.0 }
 0x404   : > { %v3930_v40 = vsel %vm663_vm0, %v3929_v21, 0.0  ;;  %v3737_v48 = vcombine.high %v3735_v45, %v3735_v45  ;;  %v5513_v16 = vrot.slane %v3735_v45, 9  ;;  %v3932_v60 = vsel %vm663_vm0, %v3931_v27, 0.0  ;;  %v4171_v27 = vld [vmem:[#allocation6 + $0x360] sm:$0xff] }
 0x405   : > { %v5512_v52 = vrot.slane %v3736_v6, 9  ;;  %v3814_v22 = vmax.f32 %v3728_v10, %v5511_v41  ;;  %v4407_v42 = vrot.slane %v8592_v25, %v4406_v30  ;;  %v4415_v57 = vrot.slane %v8592_v25, %v4414_v4  ;;  %v4139_v10 = vld [vmem:[#allocation6 + $0x260] sm:$0xff]  ;;  %v4186_v41 = vld [vmem:[#allocation6 + $0x3d8] sm:$0xff] }
 0x406   : > { %v3934_v31 = vsel %vm663_vm0, %v3933_v51, 0.0  ;;  %v5514_v47 = vrot.slane %v3737_v48, 9  ;;  %v3816_v61 = vmax.f32 %v3735_v45, %v5513_v16  ;;  %v4403_v29 = vrot.slane %v8592_v25, %v7515_v54  ;;  %v4154_v51 = vld [vmem:[#allocation6 + $0x2d8] sm:$0xff] }
 0x407   : > { %v3815_v15 = vmax.f32 %v3736_v6, %v5512_v52  ;;  %4544 = vmatprep.mubr.f32.mxu0 %v4407_v42  ;;  %4614 = vmatprep.mubr.f32.mxu1 %v4415_v57  ;;  %v3885_v32 = vrot.slane %v3814_v22, %v7515_v54  ;;  %v4411_v62 = vrot.slane %v8592_v25, %v4410_v36  ;;  %v4153_v52 = vld [vmem:[#allocation6 + $0x2d0] sm:$0xff] }
 0x408   : > { %v3817_v37 = vmax.f32 %v3737_v48, %v5514_v47  ;;  %v4007_v23 = vcombine.low %v3928_v34, %v3930_v40  ;;  %v4008_v50 = vcombine.low %v3932_v60, %v3934_v31  ;;  %v3893_v19 = vrot.slane %v3816_v61, %v7515_v54  ;;  %4545 = vmatmul.mubr.f32.vlgmr.msra.gmra.mxu0 %v4403_v29  ;;  %v4138_v40 = vld [vmem:[#allocation6 + $0x258] sm:$0xff]  ;;  %v4185_v57 = vld [vmem:[#allocation6 + $0x3d0] sm:$0xff]  ;;  %v4152_v47 = vld [vmem:[#allocation6 + $0x2c8] sm:$0xff] }
 0x409   : > { %v3889_v18 = vrot.slane %v3815_v15, %v7515_v54  ;;  %4615 = vmatmul.mubr.f32.vlgmr.msra.gmra.mxu1 %v4411_v62  ;;  %5726 = vmatpush3.msra.mxu0 %v4142_v12  ;;  %v4423_v44 = vrot.slane %v8592_v25, %v4422_v53  ;;  %v4431_v3 = vrot.slane %v8592_v25, %v4430_v33  ;;  %v4170_v48 = vld [vmem:[#allocation6 + $0x358] sm:$0xff]  ;;  %v4137_v60 = vld [vmem:[#allocation6 + $0x250] sm:$0xff]  ;;  %v4184_v34 = vld [vmem:[#allocation6 + $0x3c8] sm:$0xff] }
 0x40a   : > { %v3897_v17 = vrot.slane %v3817_v37, %v7515_v54  ;;  %5761 = vmatpush3.msra.mxu1 %v4174_v38  ;;  %5727 = vmatprep.subr.mxu0 %v4157_v58  ;;  %v4017_v56 = vrot.slane %v4007_v23, %v8556_v55  ;;  %v4024_v13 = vrot.slane %v4008_v50, %v8556_v55  ;;  %v4169_v31 = vld [vmem:[#allocation6 + $0x350] sm:$0xff]  ;;  %v4136_v61 = vld [vmem:[#allocation6 + $0x248] sm:$0xff]  ;;  %v4151_v12 = vld [vmem:[#allocation6 + $0x2c0] sm:$0xff] }
 0x40b   : > { %v3907_v20 = vsel %vm3102_vm6, %v3889_v18, %v3885_v32  ;;  %4684 = vmatprep.mubr.f32.mxu0 %v4423_v44  ;;  %5762 = vmatprep.subr.mxu1 %v4189_v11  ;;  %v4168_v29 = vld [vmem:[#allocation6 + $0x348] sm:$0xff]  ;;  %v4183_v18 = vld [vmem:[#allocation6 + $0x3c0] sm:$0xff]  ;;  %v4150_v58 = vld [vmem:[#allocation6 + $0x2b8] sm:$0xff]  ;;  %v4418_v44 = vsub.s32 4, %v8891_v35 }
 0x40c   : > { %v3908_v24 = vsel %vm3104_vm7, %v3893_v19, %v3907_v20  ;;  %4754 = vmatprep.mubr.f32.mxu1 %v4431_v3  ;;  %5728 = vmatpush3.msra.mxu0 %v4141_v1  ;;  %v4039_v16 = vcombine.low %v4017_v56, %v4024_v13  ;;  %v4135_v62 = vld [vmem:[#allocation6 + $0x240] sm:$0xff]  ;;  %v4182_v23 = vld [vmem:[#allocation6 + $0x3b8] sm:$0xff]  ;;  %v4133_v20 = vld [vmem:[#allocation6 + $0x230] sm:$0xff]  ;;  %v4426_v1 = vsub.s32 6, %v8891_v35 }
 0x40d   : > { %v3909_v49 = vsel %vm3106_vm8, %v3897_v17, %v3908_v24  ;;  %5763 = vmatpush3.msra.mxu1 %v4173_v59  ;;  %5729 = vmatprep.subr.mxu0 %v4156_v0  ;;  %v4167_v38 = vld [vmem:[#allocation6 + $0x340] sm:$0xff]  ;;  %v4134_v50 = vld [vmem:[#allocation6 + $0x238] sm:$0xff]  ;;  %v4149_v17 = vld [vmem:[#allocation6 + $0x2b0] sm:$0xff] }
 0x40e   : > { %v3936_v26 = vrot.slane %v3909_v49, 1  ;;  %v3938_v39 = vrot.slane %v3909_v49, 2  ;;  %v3940_v28 = vrot.slane %v3909_v49, 3  ;;  %v3935_v43 = vsel %vm663_vm0, %v3909_v49, 0.0  ;;  %5764 = vmatprep.subr.mxu1 %v4188_v63  ;;  %5730 = vmatpush3.msra.mxu0 %v4140_v9  ;;  %v4166_v11 = vld [vmem:[#allocation6 + $0x338] sm:$0xff]  ;;  %v4165_v24 = vld [vmem:[#allocation6 + $0x330] sm:$0xff] }
 0x40f   : > { %5765 = vmatpush3.msra.mxu1 %v4172_v8  ;;  %5731 = vmatprep.subr.mxu0 %v4155_v5  ;;  %v4047_v37 = vrot.slane %v4039_v16, %v8556_v55  ;;  %v4148_v3 = vld [vmem:[#allocation6 + $0x2a8] sm:$0xff]  ;;  %v4163_v8 = vld [vmem:[#allocation6 + $0x320] sm:$0xff]  ;;  %v4146_v5 = vld [vmem:[#allocation6 + $0x298] sm:$0xff] }
 0x410   : > { %v3937_v7 = vsel %vm663_vm0, %v3936_v26, 0.0  ;;  %v3939_v2 = vsel %vm663_vm0, %v3938_v39, 0.0  ;;  %v3941_v21 = vsel %vm663_vm0, %v3940_v28, 0.0  ;;  %5766 = vmatprep.subr.mxu1 %v4187_v46  ;;  %5732 = vmatpush3.msra.mxu0 %v4139_v10  ;;  %v4180_v63 = vld [vmem:[#allocation6 + $0x3a8] sm:$0xff]  ;;  %v4147_v39 = vld [vmem:[#allocation6 + $0x2a0] sm:$0xff]  ;;  %v4178_v56 = vld [vmem:[#allocation6 + $0x398] sm:$0xff] }
 0x411   : > { %v4009_v45 = vcombine.low %v3935_v43, %v3937_v7  ;;  %v4010_v6 = vcombine.low %v3939_v2, %v3941_v21  ;;  %5767 = vmatpush3.msra.mxu1 %v4171_v27  ;;  %5733 = vmatprep.subr.mxu0 %v4154_v51  ;;  %v4132_v9 = vld [vmem:[#allocation6 + $0x228] sm:$0xff]  ;;  %v4131_v28 = vld [vmem:[#allocation6 + $0x220] sm:$0xff]  ;;  %v4130_v13 = vld [vmem:[#allocation6 + $0x218] sm:$0xff]  ;;  %vm5223_vm0 = vcmask 0  }
 0x412   : > { %5768 = vmatprep.subr.mxu1 %v4186_v41  ;;  %5734 = vmatpush3.msra.mxu0 %v4138_v40  ;;  %v4162_v46 = vld [vmem:[#allocation6 + $0x318] sm:$0xff]  ;;  %v4145_v10 = vld [vmem:[#allocation6 + $0x290] sm:$0xff]  ;;  %v4144_v21 = vld [vmem:[#allocation6 + $0x288] sm:$0xff] }
 0x413   : > { %v4031_v22 = vrot.slane %v4009_v45, %v8556_v55  ;;  %v4038_v42 = vrot.slane %v4010_v6, %v8556_v55  ;;  %5769 = vmatpush3.msra.mxu1 %v4170_v48  ;;  %5735 = vmatprep.subr.mxu0 %v4153_v52  ;;  %v4177_v43 = vld [vmem:[#allocation6 + $0x390] sm:$0xff]  ;;  %v4176_v27 = vld [vmem:[#allocation6 + $0x388] sm:$0xff]  ;;  %v4143_v6 = vld [vmem:[#allocation6 + $0x280] sm:$0xff]  ;;  %v4419_v52 = vrot.slane %v8592_v25, %v4418_v44 }
 0x414   : > { %5770 = vmatprep.subr.mxu1 %v4185_v57  ;;  %5736 = vmatpush3.msra.mxu0 %v4137_v60  ;;  %v4129_v7 = vld [vmem:[#allocation6 + $0x210] sm:$0xff]  ;;  %v4128_v51 = vld [vmem:[#allocation6 + $0x208] sm:$0xff]  ;;  %v4175_v41 = vld [vmem:[#allocation6 + $0x380] sm:$0xff] }
 0x415   : > { %v4040_v15 = vcombine.low %v4031_v22, %v4038_v42  ;;  %5771 = vmatpush3.msra.mxu1 %v4169_v31  ;;  %5737 = vmatprep.subr.mxu0 %v4152_v47  ;;  %v4161_v2 = vld [vmem:[#allocation6 + $0x310] sm:$0xff]  ;;  %v4160_v45 = vld [vmem:[#allocation6 + $0x308] sm:$0xff]  ;;  %v4127_v40 = vld [vmem:[#allocation6 + $0x200] sm:$0xff]  ;;  %v4427_v22 = vrot.slane %v8592_v25, %v4426_v1 }
 0x416   : > { %5772 = vmatprep.subr.mxu1 %v4184_v34  ;;  %5738 = vmatpush3.msra.mxu0 %v4136_v61  ;;  %v4159_v48 = vld [vmem:[#allocation6 + $0x300] sm:$0xff]  ;;  %v4222_v16 = vld [vmem:[#allocation6 + $0x4f8] sm:$0xff]  ;;  %v4221_v47 = vld [vmem:[#allocation6 + $0x4f0] sm:$0xff] }
 0x417   : > { %v4054_v32 = vrot.slane %v4040_v15, %v8556_v55  ;;  %5773 = vmatpush3.msra.mxu1 %v4168_v29  ;;  %5739 = vmatprep.subr.mxu0 %v4151_v12  ;;  %v4181_v55 = vld [vmem:[#allocation6 + $0x3b0] sm:$0xff]  ;;  %v4254_v42 = vld [vmem:[#allocation6 + $0x5f8] sm:$0xff]  ;;  %v4220_v29 = vld [vmem:[#allocation6 + $0x4e8] sm:$0xff] }
 0x418   : > { %5774 = vmatprep.subr.mxu1 %v4183_v18  ;;  %5740 = vmatpush3.msra.mxu0 %v4135_v62  ;;  %v4206_v57 = vld [vmem:[#allocation6 + $0x478] sm:$0xff]  ;;  %v4253_v34 = vld [vmem:[#allocation6 + $0x5f0] sm:$0xff]  ;;  %v4252_v12 = vld [vmem:[#allocation6 + $0x5e8] sm:$0xff] }
 0x419   : > { %v8635_v19 = vcombine.low %v4047_v37, %v4054_v32  ;;  %5775 = vmatpush3.msra.mxu1 %v4167_v38  ;;  %5741 = vmatprep.subr.mxu0 %v4150_v58  ;;  %v4238_v60 = vld [vmem:[#allocation6 + $0x578] sm:$0xff]  ;;  %v4205_v25 = vld [vmem:[#allocation6 + $0x470] sm:$0xff]  ;;  %v4204_v37 = vld [vmem:[#allocation6 + $0x468] sm:$0xff] }
 0x41a   : > { %5776 = vmatprep.subr.mxu1 %v4182_v23  ;;  %5742 = vmatpush3.msra.mxu0 %v4134_v50  ;;  %v4237_v61 = vld [vmem:[#allocation6 + $0x570] sm:$0xff]  ;;  %v4219_v32 = vld [vmem:[#allocation6 + $0x4e0] sm:$0xff]  ;;  %v4218_v62 = vld [vmem:[#allocation6 + $0x4d8] sm:$0xff] }
 0x41b   : > { %v8642_v59 = vrot.slane %v8635_v19, %v4410_v36  ;;  %v8647_v0 = vrot.slane %v8635_v19, %v4422_v53  ;;  %v8652_v49 = vrot.slane %v8635_v19, %v4430_v33  ;;  %5777 = vmatpush3.msra.mxu1 %v4166_v11  ;;  %5743 = vmatprep.subr.mxu0 %v4149_v17  ;;  %v4164_v53 = vld [vmem:[#allocation6 + $0x328] sm:$0xff]  ;;  %v4179_v33 = vld [vmem:[#allocation6 + $0x3a0] sm:$0xff]  ;;  %v4250_v38 = vld [vmem:[#allocation6 + $0x5d8] sm:$0xff] }
 0x41c   : > { %v8655_v26 = vrot.slane %v8635_v19, %v4418_v44  ;;  %v8660_v36 = vrot.slane %v8635_v19, %v4426_v1  ;;  %5778 = vmatprep.subr.mxu1 %v4181_v55  ;;  %5744 = vmatpush3.msra.mxu0 %v4133_v20  ;;  %v4439_v31 = vrot.slane %v8635_v19, %v4406_v30  ;;  %v4236_v30 = vld [vmem:[#allocation6 + $0x568] sm:$0xff]  ;;  %v4251_v18 = vld [vmem:[#allocation6 + $0x5e0] sm:$0xff]  ;;  %v4202_v58 = vld [vmem:[#allocation6 + $0x458] sm:$0xff] }
 0x41d   : > { %5779 = vmatpush3.msra.mxu1 %v4165_v24  ;;  %5745 = vmatprep.subr.mxu0 %v4148_v3  ;;  %v4447_v15 = vrot.slane %v8635_v19, %v4414_v4  ;;  %v4203_v35 = vld [vmem:[#allocation6 + $0x460] sm:$0xff]  ;;  %v4234_v23 = vld [vmem:[#allocation6 + $0x558] sm:$0xff]  ;;  %v4217_v50 = vld [vmem:[#allocation6 + $0x4d0] sm:$0xff] }
 0x41e   : > { %5780 = vmatprep.subr.mxu1 %v4180_v63  ;;  %5746 = vmatpush3.msra.mxu0 %v4132_v9  ;;  %v4235_v4 = vld [vmem:[#allocation6 + $0x560] sm:$0xff]  ;;  %v4249_v11 = vld [vmem:[#allocation6 + $0x5d0] sm:$0xff]  ;;  %v4216_v20 = vld [vmem:[#allocation6 + $0x4c8] sm:$0xff] }
 0x41f   : > { %5781 = vmatpush3.msra.mxu1 %v4164_v53  ;;  %5747 = vmatprep.subr.mxu0 %v4147_v39  ;;  %v4201_v17 = vld [vmem:[#allocation6 + $0x450] sm:$0xff]  ;;  %v4248_v44 = vld [vmem:[#allocation6 + $0x5c8] sm:$0xff]  ;;  %v4215_v3 = vld [vmem:[#allocation6 + $0x4c0] sm:$0xff] }
 0x420   : > { %5782 = vmatprep.subr.mxu1 %v4179_v33  ;;  %5748 = vmatpush3.msra.mxu0 %v4131_v28  ;;  %v4233_v55 = vld [vmem:[#allocation6 + $0x550] sm:$0xff]  ;;  %v4200_v1 = vld [vmem:[#allocation6 + $0x448] sm:$0xff]  ;;  %v4247_v63 = vld [vmem:[#allocation6 + $0x5c0] sm:$0xff] }
 0x421   : > { %5783 = vmatpush3.msra.mxu1 %v4163_v8  ;;  %5749 = vmatprep.subr.mxu0 %v4146_v5  ;;  %v4232_v24 = vld [vmem:[#allocation6 + $0x548] sm:$0xff]  ;;  %v4199_v9 = vld [vmem:[#allocation6 + $0x440] sm:$0xff]  ;;  %v4214_v39 = vld [vmem:[#allocation6 + $0x4b8] sm:$0xff] }
 0x422   : > { %5784 = vmatprep.subr.mxu1 %v4178_v56  ;;  %5750 = vmatpush3.msra.mxu0 %v4130_v13  ;;  %v4231_v53 = vld [vmem:[#allocation6 + $0x540] sm:$0xff]  ;;  %v4246_v33 = vld [vmem:[#allocation6 + $0x5b8] sm:$0xff]  ;;  %v4213_v5 = vld [vmem:[#allocation6 + $0x4b0] sm:$0xff] }
 0x423   : > { %5785 = vmatpush3.msra.mxu1 %v4162_v46  ;;  %5751 = vmatprep.subr.mxu0 %v4145_v10  ;;  %v4198_v28 = vld [vmem:[#allocation6 + $0x438] sm:$0xff]  ;;  %v4245_v56 = vld [vmem:[#allocation6 + $0x5b0] sm:$0xff]  ;;  %v4212_v10 = vld [vmem:[#allocation6 + $0x4a8] sm:$0xff] }
 0x424   : > { %5786 = vmatprep.subr.mxu1 %v4177_v43  ;;  %5752 = vmatpush3.msra.mxu0 %v4129_v7  ;;  %v4230_v8 = vld [vmem:[#allocation6 + $0x538] sm:$0xff]  ;;  %v4197_v13 = vld [vmem:[#allocation6 + $0x430] sm:$0xff]  ;;  %v4244_v43 = vld [vmem:[#allocation6 + $0x5a8] sm:$0xff] }
 0x425   : > { %5787 = vmatpush3.msra.mxu1 %v4161_v2  ;;  %5753 = vmatprep.subr.mxu0 %v4144_v21  ;;  %v4229_v46 = vld [vmem:[#allocation6 + $0x530] sm:$0xff]  ;;  %v4196_v7 = vld [vmem:[#allocation6 + $0x428] sm:$0xff]  ;;  %v4211_v21 = vld [vmem:[#allocation6 + $0x4a0] sm:$0xff] }
 0x426   : > { %5788 = vmatprep.subr.mxu1 %v4176_v27  ;;  %5754 = vmatpush3.msra.mxu0 %v4128_v51  ;;  %v4228_v2 = vld [vmem:[#allocation6 + $0x528] sm:$0xff]  ;;  %v4243_v27 = vld [vmem:[#allocation6 + $0x5a0] sm:$0xff] }
 0x427   : > { %5789 = vmatpush3.msra.mxu1 %v4160_v45  ;;  %5755 = vmatprep.subr.mxu0 %v4143_v6  ;;  %v4195_v51 = vld [vmem:[#allocation6 + $0x420] sm:$0xff]  ;;  %v4210_v6 = vld [vmem:[#allocation6 + $0x498] sm:$0xff] }
 0x428   : > { %5790 = vmatprep.subr.mxu1 %v4175_v41  ;;  %5756 = vmatpush3.msra.mxu0 %v4127_v40  ;;  %v4227_v45 = vld [vmem:[#allocation6 + $0x520] sm:$0xff]  ;;  %v4242_v41 = vld [vmem:[#allocation6 + $0x598] sm:$0xff] }
 0x429   : > { %5791 = vmatpush3.msra.mxu1 %v4159_v48  ;;  %4685 = vmatmul.mubr.f32.vlgmr.msra.gmra.mxu0 %v4419_v52  ;;  %v4194_v40 = vld [vmem:[#allocation6 + $0x418] sm:$0xff]  ;;  %v4209_v52 = vld [vmem:[#allocation6 + $0x490] sm:$0xff] }
 0x42a   : > { %4755 = vmatmul.mubr.f32.vlgmr.msra.gmra.mxu1 %v4427_v22  ;;  %5795 = vmatprep.subr.mxu0 %v4222_v16  ;;  %v4226_v48 = vld [vmem:[#allocation6 + $0x518] sm:$0xff]  ;;  %v4241_v16 = vld [vmem:[#allocation6 + $0x590] sm:$0xff] }
 0x42b   : > { %5830 = vmatprep.subr.mxu1 %v4254_v42  ;;  %5796 = vmatpush3.msra.mxu0 %v4206_v57  ;;  %v4193_v22 = vld [vmem:[#allocation6 + $0x410] sm:$0xff]  ;;  %v4208_v57 = vld [vmem:[#allocation6 + $0x488] sm:$0xff] }
 0x42c   : > { %4824 = vmatprep.mubr.f32.mxu0 %v4439_v31  ;;  %5831 = vmatpush3.msra.mxu1 %v4238_v60  ;;  %v4225_v42 = vld [vmem:[#allocation6 + $0x510] sm:$0xff]  ;;  %v4240_v60 = vld [vmem:[#allocation6 + $0x588] sm:$0xff] }
 0x42d   : > { %4894 = vmatprep.mubr.f32.mxu1 %v4447_v15  ;;  %5797 = vmatprep.subr.mxu0 %v4221_v47  ;;  %v4192_v31 = vld [vmem:[#allocation6 + $0x408] sm:$0xff]  ;;  %v8672_v47 = vpop.f32.mrf.mxu1 }
 0x42e   : > { %5832 = vmatprep.subr.mxu1 %v4253_v34  ;;  %5798 = vmatpush3.msra.mxu0 %v4205_v25  ;;  %v4224_v15 = vld [vmem:[#allocation6 + $0x508] sm:$0xff]  ;;  %v4207_v34 = vld [vmem:[#allocation6 + $0x480] sm:$0xff] }
 0x42f   : > { %5833 = vmatpush3.msra.mxu1 %v4237_v61  ;;  %5799 = vmatprep.subr.mxu0 %v4220_v29  ;;  %v4239_v25 = vld [vmem:[#allocation6 + $0x580] sm:$0xff]  ;;  %v6181_v29 = vpop.f32.mrf.mxu1 }
 0x430   : > { %5834 = vmatprep.subr.mxu1 %v4252_v12  ;;  %5800 = vmatpush3.msra.mxu0 %v4204_v37  ;;  %v4191_v61 = vld [vmem:[#allocation6 + $0x400] sm:$0xff]  ;;  %v4435_v37 = vrot.slane %v8635_v19, %v7515_v54  ;;  %v4301_v54 = vld [vmem:[#allocation6 + $0x770] sm:$0xff]  ;;  %v4284_v19 = vld [vmem:[#allocation6 + $0x6e8] sm:$0xff] }
 0x431   : > { %5835 = vmatpush3.msra.mxu1 %v4236_v30  ;;  %5801 = vmatprep.subr.mxu0 %v4219_v32  ;;  %v4223_v12 = vld [vmem:[#allocation6 + $0x500] sm:$0xff]  ;;  %v4286_v30 = vld [vmem:[#allocation6 + $0x6f8] sm:$0xff]  ;;  %v4304_v29 = vld [vmem:[#allocation6 + $0x788] sm:$0xff] }
 0x432   : > { %5836 = vmatprep.subr.mxu1 %v4251_v18  ;;  %5802 = vmatpush3.msra.mxu0 %v4203_v35  ;;  %v4318_v32 = vld [vmem:[#allocation6 + $0x7f8] sm:$0xff] }
 0x433   : > { %5837 = vmatpush3.msra.mxu1 %v4235_v4  ;;  %5803 = vmatprep.subr.mxu0 %v4218_v62  ;;  %v4270_v18 = vld [vmem:[#allocation6 + $0x678] sm:$0xff]  ;;  %v4285_v4 = vld [vmem:[#allocation6 + $0x6f0] sm:$0xff] }
 0x434   : > { %5838 = vmatprep.subr.mxu1 %v4250_v38  ;;  %5804 = vmatpush3.msra.mxu0 %v4202_v58  ;;  %v4302_v35 = vld [vmem:[#allocation6 + $0x778] sm:$0xff]  ;;  %v4317_v62 = vld [vmem:[#allocation6 + $0x7f0] sm:$0xff]  ;;  %v4316_v58 = vld [vmem:[#allocation6 + $0x7e8] sm:$0xff] }
 0x435   : > { %5839 = vmatpush3.msra.mxu1 %v4234_v23  ;;  %5805 = vmatprep.subr.mxu0 %v4217_v50  ;;  %v4269_v38 = vld [vmem:[#allocation6 + $0x670] sm:$0xff]  ;;  %v4268_v23 = vld [vmem:[#allocation6 + $0x668] sm:$0xff] }
 0x436   : > { %5840 = vmatprep.subr.mxu1 %v4249_v11  ;;  %5806 = vmatpush3.msra.mxu0 %v4201_v17  ;;  %v4300_v50 = vld [vmem:[#allocation6 + $0x768] sm:$0xff]  ;;  %v4315_v11 = vld [vmem:[#allocation6 + $0x7e0] sm:$0xff] }
 0x437   : > { %5841 = vmatpush3.msra.mxu1 %v4233_v55  ;;  %5807 = vmatprep.subr.mxu0 %v4216_v20  ;;  %v4267_v17 = vld [vmem:[#allocation6 + $0x660] sm:$0xff]  ;;  %v4314_v20 = vld [vmem:[#allocation6 + $0x7d8] sm:$0xff] }
 0x438   : > { %5842 = vmatprep.subr.mxu1 %v4248_v44  ;;  %5808 = vmatpush3.msra.mxu0 %v4200_v1  ;;  %v4299_v55 = vld [vmem:[#allocation6 + $0x760] sm:$0xff]  ;;  %v4266_v44 = vld [vmem:[#allocation6 + $0x658] sm:$0xff]  ;;  %v4281_v1 = vld [vmem:[#allocation6 + $0x6d0] sm:$0xff] }
 0x439   : > { %5843 = vmatpush3.msra.mxu1 %v4232_v24  ;;  %5809 = vmatprep.subr.mxu0 %v4215_v3  ;;  %v4313_v24 = vld [vmem:[#allocation6 + $0x7d0] sm:$0xff] }
 0x43a   : > { %5844 = vmatprep.subr.mxu1 %v4247_v63  ;;  %5810 = vmatpush3.msra.mxu0 %v4199_v9  ;;  %v4265_v3 = vld [vmem:[#allocation6 + $0x650] sm:$0xff]  ;;  %v4280_v9 = vld [vmem:[#allocation6 + $0x6c8] sm:$0xff] }
 0x43b   : > { %5845 = vmatpush3.msra.mxu1 %v4231_v53  ;;  %5811 = vmatprep.subr.mxu0 %v4214_v39  ;;  %v4297_v63 = vld [vmem:[#allocation6 + $0x750] sm:$0xff]  ;;  %v4312_v53 = vld [vmem:[#allocation6 + $0x7c8] sm:$0xff] }
 0x43c   : > { %5846 = vmatprep.subr.mxu1 %v4246_v33  ;;  %5812 = vmatpush3.msra.mxu0 %v4198_v28  ;;  %v4264_v39 = vld [vmem:[#allocation6 + $0x648] sm:$0xff]  ;;  %v4279_v28 = vld [vmem:[#allocation6 + $0x6c0] sm:$0xff] }
 0x43d   : > { %5847 = vmatpush3.msra.mxu1 %v4230_v8  ;;  %5813 = vmatprep.subr.mxu0 %v4213_v5  ;;  %v4296_v33 = vld [vmem:[#allocation6 + $0x748] sm:$0xff]  ;;  %v4311_v8 = vld [vmem:[#allocation6 + $0x7c0] sm:$0xff] }
 0x43e   : > { %5848 = vmatprep.subr.mxu1 %v4245_v56  ;;  %5814 = vmatpush3.msra.mxu0 %v4197_v13  ;;  %v4263_v5 = vld [vmem:[#allocation6 + $0x640] sm:$0xff]  ;;  %v4278_v13 = vld [vmem:[#allocation6 + $0x6b8] sm:$0xff] }
 0x43f   : > { %5849 = vmatpush3.msra.mxu1 %v4229_v46  ;;  %5815 = vmatprep.subr.mxu0 %v4212_v10  ;;  %v4295_v56 = vld [vmem:[#allocation6 + $0x740] sm:$0xff]  ;;  %v4310_v46 = vld [vmem:[#allocation6 + $0x7b8] sm:$0xff] }
 0x440   : > { %5850 = vmatprep.subr.mxu1 %v4244_v43  ;;  %5816 = vmatpush3.msra.mxu0 %v4196_v7  ;;  %v4262_v10 = vld [vmem:[#allocation6 + $0x638] sm:$0xff]  ;;  %v4277_v7 = vld [vmem:[#allocation6 + $0x6b0] sm:$0xff] }
 0x441   : > { %5851 = vmatpush3.msra.mxu1 %v4228_v2  ;;  %5817 = vmatprep.subr.mxu0 %v4211_v21  ;;  %v4294_v43 = vld [vmem:[#allocation6 + $0x738] sm:$0xff]  ;;  %v4309_v2 = vld [vmem:[#allocation6 + $0x7b0] sm:$0xff] }
 0x442   : > { %5852 = vmatprep.subr.mxu1 %v4243_v27  ;;  %5818 = vmatpush3.msra.mxu0 %v4195_v51  ;;  %v4261_v21 = vld [vmem:[#allocation6 + $0x630] sm:$0xff]  ;;  %v4276_v51 = vld [vmem:[#allocation6 + $0x6a8] sm:$0xff] }
 0x443   : > { %5853 = vmatpush3.msra.mxu1 %v4227_v45  ;;  %5819 = vmatprep.subr.mxu0 %v4210_v6  ;;  %v4293_v27 = vld [vmem:[#allocation6 + $0x730] sm:$0xff]  ;;  %v4308_v45 = vld [vmem:[#allocation6 + $0x7a8] sm:$0xff] }
 0x444   : > { %5854 = vmatprep.subr.mxu1 %v4242_v41  ;;  %5820 = vmatpush3.msra.mxu0 %v4194_v40  ;;  %v4260_v6 = vld [vmem:[#allocation6 + $0x628] sm:$0xff]  ;;  %v4275_v40 = vld [vmem:[#allocation6 + $0x6a0] sm:$0xff] }
 0x445   : > { %5855 = vmatpush3.msra.mxu1 %v4226_v48  ;;  %5821 = vmatprep.subr.mxu0 %v4209_v52  ;;  %v4292_v41 = vld [vmem:[#allocation6 + $0x728] sm:$0xff]  ;;  %v4307_v48 = vld [vmem:[#allocation6 + $0x7a0] sm:$0xff] }
 0x446   : > { %5856 = vmatprep.subr.mxu1 %v4241_v16  ;;  %5822 = vmatpush3.msra.mxu0 %v4193_v22  ;;  %v4259_v52 = vld [vmem:[#allocation6 + $0x620] sm:$0xff]  ;;  %v4274_v22 = vld [vmem:[#allocation6 + $0x698] sm:$0xff] }
 0x447   : > { %5857 = vmatpush3.msra.mxu1 %v4225_v42  ;;  %5823 = vmatprep.subr.mxu0 %v4208_v57  ;;  %v4291_v16 = vld [vmem:[#allocation6 + $0x720] sm:$0xff]  ;;  %v4306_v42 = vld [vmem:[#allocation6 + $0x798] sm:$0xff] }
 0x448   : > { %5858 = vmatprep.subr.mxu1 %v4240_v60  ;;  %5824 = vmatpush3.msra.mxu0 %v4192_v31  ;;  %v4258_v57 = vld [vmem:[#allocation6 + $0x618] sm:$0xff]  ;;  %v4273_v31 = vld [vmem:[#allocation6 + $0x690] sm:$0xff] }
 0x449   : > { %5859 = vmatpush3.msra.mxu1 %v4224_v15  ;;  %5825 = vmatprep.subr.mxu0 %v4207_v34  ;;  %v4290_v60 = vld [vmem:[#allocation6 + $0x718] sm:$0xff]  ;;  %v4305_v15 = vld [vmem:[#allocation6 + $0x790] sm:$0xff] }
 0x44a   : > { %5860 = vmatprep.subr.mxu1 %v4239_v25  ;;  %5826 = vmatpush3.msra.mxu0 %v4191_v61  ;;  %v4257_v34 = vld [vmem:[#allocation6 + $0x610] sm:$0xff]  ;;  %v4272_v61 = vld [vmem:[#allocation6 + $0x688] sm:$0xff] }
 0x44b   : > { %5861 = vmatpush3.msra.mxu1 %v4223_v12  ;;  %4825 = vmatmul.mubr.f32.vlgmr.msra.gmra.mxu0 %v4435_v37  ;;  %v4289_v25 = vld [vmem:[#allocation6 + $0x710] sm:$0xff]  ;;  %v4256_v12 = vld [vmem:[#allocation6 + $0x608] sm:$0xff] }
 0x44c   : > { %4895 = vmatmul.mubr.f32.vlgmr.msra.gmra.mxu1 %v8642_v59  ;;  %5865 = vmatprep.subr.mxu0 %v4286_v30  ;;  %v4283_v59 = vld [vmem:[#allocation6 + $0x6e0] sm:$0xff]  ;;  %v4288_v37 = vld [vmem:[#allocation6 + $0x708] sm:$0xff] }
 0x44d   : > { %5900 = vmatprep.subr.mxu1 %v4318_v32  ;;  %5866 = vmatpush3.msra.mxu0 %v4270_v18  ;;  %v4271_v30 = vld [vmem:[#allocation6 + $0x680] sm:$0xff] }
 0x44e   : > { %4964 = vmatprep.mubr.f32.mxu0 %v8647_v0  ;;  %5901 = vmatpush3.msra.mxu1 %v4302_v35  ;;  %v4282_v0 = vld [vmem:[#allocation6 + $0x6d8] sm:$0xff]  ;;  %v4303_v32 = vld [vmem:[#allocation6 + $0x780] sm:$0xff] }
 0x44f   : > { %5034 = vmatprep.mubr.f32.mxu1 %v8652_v49  ;;  %5867 = vmatprep.subr.mxu0 %v4285_v4  ;;  %v4298_v49 = vld [vmem:[#allocation6 + $0x758] sm:$0xff]  ;;  %v4255_v18 = vld [vmem:[#allocation6 + $0x600] sm:$0xff] }
 0x450   : > { %5902 = vmatprep.subr.mxu1 %v4317_v62  ;;  %5868 = vmatpush3.msra.mxu0 %v4269_v38  ;;  %v4287_v35 = vld [vmem:[#allocation6 + $0x700] sm:$0xff]  ;;  %v5058_v4 = vld [vmem:[%s8815_s9 + $0x78] sm:$0xff] }
 0x451   : > { %5903 = vmatpush3.msra.mxu1 %v4301_v54  ;;  %5869 = vmatprep.subr.mxu0 %v4284_v19  ;;  %v5055_v62 = vld [vmem:[%s8815_s9 + $0x60] sm:$0xff]  ;;  %v5054_v38 = vld [vmem:[%s8815_s9 + $0x58] sm:$0xff]  ;;  %v5053_v54 = vld [vmem:[%s8815_s9 + $0x50] sm:$0xff] }
 0x452   : > { %5904 = vmatprep.subr.mxu1 %v4316_v58  ;;  %5870 = vmatpush3.msra.mxu0 %v4268_v23  ;;  %v5052_v19 = vld [vmem:[%s8815_s9 + $0x48] sm:$0xff]  ;;  %v5051_v58 = vld [vmem:[%s8815_s9 + $0x40] sm:$0xff]  ;;  %v5050_v23 = vld [vmem:[%s8815_s9 + $0x38] sm:$0xff] }
 0x453   : > { %5905 = vmatpush3.msra.mxu1 %v4300_v50  ;;  %5871 = vmatprep.subr.mxu0 %v4283_v59  ;;  %v5049_v50 = vld [vmem:[%s8815_s9 + $0x30] sm:$0xff]  ;;  %v5048_v59 = vld [vmem:[%s8815_s9 + $0x28] sm:$0xff] }
 0x454   : > { %5906 = vmatprep.subr.mxu1 %v4315_v11  ;;  %5872 = vmatpush3.msra.mxu0 %v4267_v17  ;;  %v5047_v11 = vld [vmem:[%s8815_s9 + $0x20] sm:$0xff]  ;;  %v5046_v17 = vld [vmem:[%s8815_s9 + $0x18] sm:$0xff] }
 0x455   : > { %5907 = vmatpush3.msra.mxu1 %v4299_v55  ;;  %5873 = vmatprep.subr.mxu0 %v4282_v0  ;;  %v5138_v55 = vld [vmem:[%s8817_s11 + $0x38] sm:$0xff]  ;;  %v5137_v0 = vld [vmem:[%s8817_s11 + $0x30] sm:$0xff] }
 0x456   : > { %5908 = vmatprep.subr.mxu1 %v4314_v20  ;;  %5874 = vmatpush3.msra.mxu0 %v4266_v44  ;;  %v5045_v20 = vld [vmem:[%s8815_s9 + $0x10] sm:$0xff]  ;;  %v5136_v44 = vld [vmem:[%s8817_s11 + $0x28] sm:$0xff] }
 0x457   : > { %5909 = vmatpush3.msra.mxu1 %v4298_v49  ;;  %5875 = vmatprep.subr.mxu0 %v4281_v1  ;;  %v5044_v49 = vld [vmem:[%s8815_s9 + $0x8] sm:$0xff]  ;;  %v5135_v1 = vld [vmem:[%s8817_s11 + $0x20] sm:$0xff] }
 0x458   : > { %5910 = vmatprep.subr.mxu1 %v4313_v24  ;;  %5876 = vmatpush3.msra.mxu0 %v4265_v3  ;;  %v5043_v24 = vld [vmem:[%s8815_s9] sm:$0xff]  ;;  %v5134_v3 = vld [vmem:[%s8817_s11 + $0x18] sm:$0xff] }
 0x459   : > { %5911 = vmatpush3.msra.mxu1 %v4297_v63  ;;  %5877 = vmatprep.subr.mxu0 %v4280_v9 }
 0x45a   : > { %5912 = vmatprep.subr.mxu1 %v4312_v53  ;;  %5878 = vmatpush3.msra.mxu0 %v4264_v39 }
 0x45b   : > { %5913 = vmatpush3.msra.mxu1 %v4296_v33  ;;  %5879 = vmatprep.subr.mxu0 %v4279_v28 }
 0x45c   : > { %5914 = vmatprep.subr.mxu1 %v4311_v8  ;;  %5880 = vmatpush3.msra.mxu0 %v4263_v5 }
 0x45d   : > { %5915 = vmatpush3.msra.mxu1 %v4295_v56  ;;  %5881 = vmatprep.subr.mxu0 %v4278_v13 }
 0x45e   : > { %5916 = vmatprep.subr.mxu1 %v4310_v46  ;;  %5882 = vmatpush3.msra.mxu0 %v4262_v10 }
 0x45f   : > { %5917 = vmatpush3.msra.mxu1 %v4294_v43  ;;  %5883 = vmatprep.subr.mxu0 %v4277_v7 }
 0x460   : > { %5918 = vmatprep.subr.mxu1 %v4309_v2  ;;  %5884 = vmatpush3.msra.mxu0 %v4261_v21 }
 0x461   : > { %5919 = vmatpush3.msra.mxu1 %v4293_v27  ;;  %5885 = vmatprep.subr.mxu0 %v4276_v51 }
 0x462   : > { %5920 = vmatprep.subr.mxu1 %v4308_v45  ;;  %5886 = vmatpush3.msra.mxu0 %v4260_v6 }
 0x463   : > { %5921 = vmatpush3.msra.mxu1 %v4292_v41  ;;  %5887 = vmatprep.subr.mxu0 %v4275_v40 }
 0x464   : > { %5922 = vmatprep.subr.mxu1 %v4307_v48  ;;  %5888 = vmatpush3.msra.mxu0 %v4259_v52 }
 0x465   : > { %5923 = vmatpush3.msra.mxu1 %v4291_v16  ;;  %5889 = vmatprep.subr.mxu0 %v4274_v22 }
 0x466   : > { %5924 = vmatprep.subr.mxu1 %v4306_v42  ;;  %5890 = vmatpush3.msra.mxu0 %v4258_v57 }
 0x467   : > { %5925 = vmatpush3.msra.mxu1 %v4290_v60  ;;  %5891 = vmatprep.subr.mxu0 %v4273_v31 }
 0x468   : > { %5926 = vmatprep.subr.mxu1 %v4305_v15  ;;  %5892 = vmatpush3.msra.mxu0 %v4257_v34  ;;  %v5040_v15 = vld [vmem:[%s8814_s8] sm:$0x1] }
 0x469   : > { %5927 = vmatpush3.msra.mxu1 %v4289_v25  ;;  %5893 = vmatprep.subr.mxu0 %v4272_v61 }
 0x46a   : > { %5928 = vmatprep.subr.mxu1 %v4304_v29  ;;  %5894 = vmatpush3.msra.mxu0 %v4256_v12  ;;  %v5133_v29 = vld [vmem:[%s8817_s11 + $0x10] sm:$0xff]  ;;  %v5132_v12 = vld [vmem:[%s8817_s11 + $0x8] sm:$0xff] }
 0x46b   : > { %5929 = vmatpush3.msra.mxu1 %v4288_v37  ;;  %5895 = vmatprep.subr.mxu0 %v4271_v30  ;;  %v5131_v37 = vld [vmem:[%s8817_s11] sm:$0xff] }
 0x46c   : > { %5930 = vmatprep.subr.mxu1 %v4303_v32  ;;  %5896 = vmatpush3.msra.mxu0 %v4255_v18  ;;  %v5059_v30 = vld [vmem:[%s8892_s25] sm:$0x1] }
 0x46d   : > { %5931 = vmatpush3.msra.mxu1 %v4287_v35  ;;  %4965 = vmatmul.mubr.f32.vlgmr.msra.gmra.mxu0 %v8655_v26  ;;  %v5057_v26 = vld [vmem:[%s8815_s9 + $0x70] sm:$0xff] }
 0x46e   : > { %5035 = vmatmul.mubr.f32.vlgmr.msra.gmra.mxu1 %v8660_v36  ;;  %6182 = vmatprep.subr.mxu0 %v8858_v14  ;;  %v5056_v36 = vld [vmem:[%s8815_s9 + $0x68] sm:$0xff] }
 0x46f   : > { %6214 = vmatprep.mubr.msk.f32.mxu0 %vm6411_vm14, %v8858_v14  ;;  %6217 = vmatprep.subr.mxu1 %v8858_v14 }
 0x470   : > { %6233 = vmatprep.mubr.msk.f32.mxu1 %vm6411_vm14, %v8858_v14  ;;  %6183 = vmatpush3.msra.mxu0 %v5058_v4 }
 0x471   : > { %6184 = vmatprep.subr.mxu0 %v8858_v14  ;;  %6218 = vmatpush3.msra.mxu1 %v5138_v55 }
 0x472   : > { %6185 = vmatpush3.msra.mxu0 %v5057_v26  ;;  %6219 = vmatprep.subr.mxu1 %v8858_v14  ;;  %v5139_v26 = vld [vmem:[#allocation3] sm:$0x1] }
 0x473   : > { %6186 = vmatprep.subr.mxu0 %v8858_v14  ;;  %6220 = vmatpush3.msra.mxu1 %v5137_v0 }
 0x474   : > { %6187 = vmatpush3.msra.mxu0 %v5056_v36  ;;  %6221 = vmatprep.subr.mxu1 %v8858_v14 }
 0x475   : > { %6188 = vmatprep.subr.mxu0 %v8858_v14  ;;  %6222 = vmatpush3.msra.mxu1 %v5136_v44 }
 0x476   : > { %6189 = vmatpush3.msra.mxu0 %v5055_v62  ;;  %6223 = vmatprep.subr.mxu1 %v8858_v14 }
 0x477   : > { %6190 = vmatprep.subr.mxu0 %v8858_v14  ;;  %6224 = vmatpush3.msra.mxu1 %v5135_v1 }
 0x478   : > { %6191 = vmatpush3.msra.mxu0 %v5054_v38  ;;  %6225 = vmatprep.subr.mxu1 %v8858_v14 }
 0x479   : > { %6192 = vmatprep.subr.mxu0 %v8858_v14  ;;  %6226 = vmatpush3.msra.mxu1 %v5134_v3 }
 0x47a   : > { %6193 = vmatpush3.msra.mxu0 %v5053_v54  ;;  %6227 = vmatprep.subr.mxu1 %v8858_v14 }
 0x47b   : > { %6194 = vmatprep.subr.mxu0 %v8858_v14  ;;  %6228 = vmatpush3.msra.mxu1 %v5133_v29 }
 0x47c   : > { %6195 = vmatpush3.msra.mxu0 %v5052_v19  ;;  %6229 = vmatprep.subr.mxu1 %v8858_v14 }
 0x47d   : > { %6196 = vmatprep.subr.mxu0 %v8858_v14  ;;  %6230 = vmatpush3.msra.mxu1 %v5132_v12 }
 0x47e   : > { %6197 = vmatpush3.msra.mxu0 %v5051_v58  ;;  %6231 = vmatprep.subr.mxu1 %v8858_v14 }
 0x47f   : > { %6198 = vmatprep.subr.mxu0 %v8858_v14  ;;  %6232 = vmatpush3.msra.mxu1 %v5131_v37 }
 0x480   : > { %6199 = vmatpush3.msra.mxu0 %v5050_v23 }
 0x481   : > { %6200 = vmatprep.subr.mxu0 %v8858_v14 }
 0x482   : > { %6201 = vmatpush3.msra.mxu0 %v5049_v50 }
 0x483   : > { %6202 = vmatprep.subr.mxu0 %v8858_v14 }
 0x484   : > { %6203 = vmatpush3.msra.mxu0 %v5048_v59 }
 0x485   : > { %6204 = vmatprep.subr.mxu0 %v8858_v14 }
 0x486   : > { %6205 = vmatpush3.msra.mxu0 %v5047_v11 }
 0x487   : > { %6206 = vmatprep.subr.mxu0 %v8858_v14 }
 0x488   : > { %6207 = vmatpush3.msra.mxu0 %v5046_v17 }
 0x489   : > { %6208 = vmatprep.subr.mxu0 %v8858_v14 }
 0x48a   : > { %6209 = vmatpush3.msra.mxu0 %v5045_v20 }
 0x48b   : > { %6210 = vmatprep.subr.mxu0 %v8858_v14 }
 0x48c   : > { %6211 = vmatpush3.msra.mxu0 %v5044_v49 }
 0x48d   : > { %6212 = vmatprep.subr.mxu0 %v8858_v14 }
 0x48e   : > { %6213 = vmatpush3.msra.mxu0 %v5043_v24 }
 0x4c8   : > { %v5687_v63 = vpop.f32.mrf.mxu0 }
 0x4c9   : > { %v5722_v53 = vpop.f32.mrf.mxu1 }
 0x4ca   : > { %v5688_v9 = vpop.f32.mrf.mxu0 }
 0x4cb   : > { %v5689_v33 = vadd.f32 %v5688_v9, %v5687_v63  ;;  %v5723_v28 = vpop.f32.mrf.mxu1 }
 0x4cc   : > { %v5724_v46 = vadd.f32 %v5723_v28, %v5722_v53 }
 0x4cd   : > { %v4547_v5 = vadd.f32 %v5689_v33, %v8672_v47 }
 0x4cf   : > { %v4617_v43 = vadd.f32 %v5724_v46, %v4547_v5 }
 0x4e9   : > { %v5757_v39 = vpop.f32.mrf.mxu0 }
 0x4ea   : > { %v5792_v56 = vpop.f32.mrf.mxu1 }
 0x4eb   : > { %v5758_v8 = vpop.f32.mrf.mxu0 }
 0x4ec   : > { %v5759_v10 = vadd.f32 %v5758_v8, %v5757_v39  ;;  %v5793_v7 = vpop.f32.mrf.mxu1 }
 0x4ed   : > { %v5794_v51 = vadd.f32 %v5793_v7, %v5792_v56 }
 0x4ee   : > { %v4687_v21 = vadd.f32 %v5759_v10, %v4617_v43 }
 0x4f0   : > { %v4757_v6 = vadd.f32 %v5794_v51, %v4687_v21 }
 0x50b   : > { %v5827_v13 = vpop.f32.mrf.mxu0 }
 0x50c   : > { %v5862_v27 = vpop.f32.mrf.mxu1 }
 0x50d   : > { %v5828_v2 = vpop.f32.mrf.mxu0 }
 0x50e   : > { %v5829_v45 = vadd.f32 %v5828_v2, %v5827_v13  ;;  %v5863_v41 = vpop.f32.mrf.mxu1 }
 0x50f   : > { %v5864_v52 = vadd.f32 %v5863_v41, %v5862_v27 }
 0x510   : > { %v4827_v40 = vadd.f32 %v5829_v45, %v4757_v6 }
 0x512   : > { %v4897_v42 = vadd.f32 %v5864_v52, %v4827_v40 }
 0x52d   : > { %v5897_v48 = vpop.f32.mrf.mxu0 }
 0x52e   : > { %v5932_v16 = vpop.f32.mrf.mxu1 }
 0x52f   : > { %v5898_v22 = vpop.f32.mrf.mxu0 }
 0x530   : > { %v5899_v47 = vadd.f32 %v5898_v22, %v5897_v48  ;;  %v5933_v57 = vpop.f32.mrf.mxu1 }
 0x531   : > { %v5934_v31 = vadd.f32 %v5933_v57, %v5932_v16 }
 0x532   : > { %v4967_v60 = vadd.f32 %v5899_v47, %v4897_v42 }
 0x534   : > { %v5037_v34 = vadd.f32 %v5934_v31, %v4967_v60 }
 0x536   : > { %v5041_v25 = vadd.f32 %v5040_v15, %v5037_v34 }
 0x538   : > { %v5042_v61 = vmax.f32 %v5041_v25, 0.0 }
 0x53a   : > { %6215 = vmatmul.mubr.f32.vlgmr.msra.gmra.mxu0 %v5042_v61 }
 0x5fa   : > { %v5126_v32 = vpop.f32.mrf.mxu0 }
 0x5fb   : > { %v5127_v18 = vadd.f32 %v5126_v32, %v5059_v30 }
 0x5fc   : > { %v6216_v35 = vpop.f32.mrf.mxu0 }
 0x5fd   : > { %v5130_v4 = vmax.f32 %v5127_v18, 0.0 }
 0x5ff   : > { %6234 = vmatmul.mubr.msk.f32.vlgmr.msra.gmra.mxu1 %vm1217_vm4, %v5130_v4 }
 0x6bf   : > { %v5209_v36 = vpop.f32.mrf.mxu1 }
 0x6c0   : > { %v5210_v62 = vadd.f32 %v5209_v36, %v5139_v26 }
 0x6c1   : > { %v6235_v38 = vpop.f32.mrf.mxu1 }
 0x6c2   : > { %v5213_v54 = vand.u32 2147483647, %v5210_v62  ;;  %vm5217_vm1 = vcmp.ge.f32.partialorder %v5210_v62, 0.0 }
 0x6c4   : > { %v5214_v19 = vsub.f32 0.0, %v5213_v54 }
 0x6c6   : > { %v5215_v58 = vmul.f32 1.442695, %v5214_v19 }
 0x6c8   : > { %6304 = vpow2.f32 %v5215_v58 }
 0x6d5   : > { %v6305_v14 = vpop.eup %6304 }
 0x6d6   : > { %v5218_v23 = vadd.f32 1.0, %v6305_v14 }
 0x6d8   : > { %6306 = vrcp.f32 %v5218_v23 }
 0x6e5   : > { %v6307_v50 = vpop.eup %6306 }
 0x6e6   : > { %v5221_v59 = vmul.f32 %v6307_v50, %v6305_v14 }
 0x6e8   : > { %v5222_v11 = vsel %vm5217_vm1, %v6307_v50, %v5221_v59 }
 0x6e9   : > { %5224 = vst.msk [vmem:[%s487_s13] sm:$0x1] %vm5223_vm0, %v5222_v11 }
 0x6ea PF: > { %s8894_s30 = sld [smem:[#allocation10_spill]]  ;;  %s8895_s23 = smov %s6550_s27 }
 0x6eb   : > { %s8896_s27 = smov %s6393_s28  ;;  %s8897_s28 = smov %s6397_s29 }
 0x6ec   : > { %s8898_s29 = smov %s8895_s23 }
 0x6f0   : > { %p26_p0 = scmp.ge.s32.totalorder %s8894_s30, 4  }
 0x6f2   :  { %28 = sbr.rel (!%p26_p0) target bundleno = 7 (0x7), region = 119 }
 0x6f7   :  { %5242 = vsyncpa [#allocation5], 1 }
 0x6f8   :  { %5244 = vsyncpa [#allocation5 + $0x1], 1 }
 0x6f9   :  { %5245 = vsyncpa [#allocation7], 1 }

</bundles_post_ra>
